<compile_context>
chip_gen: v7x
topology: tpu7x:2x2x1
jax: 0.10.0
libtpu: 0.0.40
codegen_flags: <defaults>
</compile_context>

<pallas_src>
import functools
import math

import numpy as np
import jax
import jax.numpy as jnp
from jax.experimental import pallas as pl
from jax.experimental.pallas import tpu as pltpu


def _sine_embed_kernel(y_ref, x_ref, inv_ref, phase_ref, out_ref, *,
                       num_pos_feats):
    """One grid step.

    y_ref, x_ref : (bt, 1, tp)   normalized cumulative row / col coordinates
    inv_ref      : (F, 1)        1 / dim_t per channel (constant, resident)
    phase_ref    : (F, 1)        0 for even channels, pi/2 for odd (constant)
    out_ref      : (bt, 2F, tp)  output block, lane dim = pixels
    """
    F = num_pos_feats
    bt = out_ref.shape[0]
    tp = out_ref.shape[-1]
    # Hoist the (F,1)->(F,tp) lane broadcasts of the per-channel constants out
    # of the per-image unroll; they are reused for both the y and x halves of
    # every image in this block.
    inv_b = jnp.broadcast_to(inv_ref[...], (F, tp))
    ph_b = jnp.broadcast_to(phase_ref[...], (F, tp))
    # Static (small) unroll over the images in this block; each iteration is a
    # clean 2D (F, tp) broadcast-mul + add + sin + lane-dense store.
    for b in range(bt):
        yb = y_ref[b]     # (1, tp)
        xb = x_ref[b]     # (1, tp)
        # Single transcendental per output element: cos(z) == sin(z + pi/2).
        out_ref[b, :F, :] = jnp.sin(yb * inv_b + ph_b).astype(out_ref.dtype)
        out_ref[b, F:, :] = jnp.sin(xb * inv_b + ph_b).astype(out_ref.dtype)


def _choose_tiling(B, P, two_f, out_elem_bytes,
                   target_block_bytes=8 << 20, max_block_bytes=16 << 20):
    """Choose (batch_tile, pixel_tile, padded_pixel_count)."""
    img_bytes = P * two_f * out_elem_bytes
    if img_bytes > max_block_bytes:
        # Large feature map: tile the pixel axis with ~target-sized tiles that
        # are multiples of 128 lanes; pad P up so the tile divides it exactly
        # (padding waste is < one tile out of >= 3 tiles).
        max_tp = max((target_block_bytes // (two_f * out_elem_bytes)) // 128, 1) * 128
        n_tiles = -(-P // max_tp)                       # ceil
        tp = ((-(-P // n_tiles)) + 127) // 128 * 128    # ceil(P/n) -> mult of 128
        p_pad = n_tiles * tp
        return 1, tp, p_pad

    # Whole image(s) per block.
    tp = P
    p_pad = P
    bt = 1
    for d in range(1, B + 1):
        if B % d:
            continue
        if d * img_bytes > target_block_bytes:
            continue
        if B >= 2 and B // d < 2:
            continue   # keep >= 2 grid steps so both v7x TensorCores get work
        bt = d
    if B == 1 and P % 256 == 0 and img_bytes >= (1 << 20):
        # Single image: split the pixel axis in two so the grid has 2 steps.
        tp = P // 2
    return bt, tp, p_pad


def position_embedding_sine(mask, *, num_pos_feats=64, temperature=10000.0,
                            normalize=False, scale=None,
                            out_dtype=jnp.float32):
    """mask: (B, H, W) bool (True = padded). Returns (B, 2*num_pos_feats, H, W)."""
    if scale is not None and normalize is False:
        raise ValueError('normalize should be True if scale is passed')
    if scale is None:
        scale = 2 * math.pi

    B, H, W = mask.shape
    F = num_pos_feats
    P = H * W
    out_elem = jnp.dtype(out_dtype).itemsize

    # Tiny preprocessing (O(B*H*W) = 1/(2F) of the output bytes): cumsums and
    # normalization in plain JAX so the kernel body is pure mul+sin+store.
    not_mask = (~mask).astype(jnp.float32)
    y_embed = jnp.cumsum(not_mask, axis=1)
    x_embed = jnp.cumsum(not_mask, axis=2)
    if normalize:
        eps = 1e-6
        y_embed = y_embed / (y_embed[:, -1:, :] + eps) * scale
        x_embed = x_embed / (x_embed[:, :, -1:] + eps) * scale
    y_flat = y_embed.reshape(B, 1, P)
    x_flat = x_embed.reshape(B, 1, P)

    # Per-channel constants, computed once at trace time with numpy.
    d = np.arange(F)
    dim_t = np.power(float(temperature), (2.0 * (d // 2)).astype(np.float64) / F)
    inv_dim_t = jnp.asarray((1.0 / dim_t).astype(np.float32).reshape(F, 1))
    phase = jnp.asarray(((d % 2) * (math.pi / 2.0)).astype(np.float32)
                        .reshape(F, 1))

    bt, tp, p_pad = _choose_tiling(B, P, 2 * F, out_elem)
    if p_pad != P:
        pad = p_pad - P
        y_flat = jnp.pad(y_flat, ((0, 0), (0, 0), (0, pad)))
        x_flat = jnp.pad(x_flat, ((0, 0), (0, 0), (0, pad)))
    grid = (B // bt, p_pad // tp)

    # Explicit VMEM budget: double-buffered output + double-buffered coord
    # inputs + constants/headroom, capped for v7x's 64 MiB physical VMEM.
    out_block_bytes = bt * 2 * F * tp * out_elem
    in_block_bytes = bt * tp * 4
    vmem_limit = 2 * out_block_bytes + 4 * in_block_bytes + (2 << 20)
    vmem_limit = int(min(max(vmem_limit, 16 << 20), 48 << 20))

    kernel = functools.partial(_sine_embed_kernel, num_pos_feats=F)

    out = pl.pallas_call(
        kernel,
        out_shape=jax.ShapeDtypeStruct((B, 2 * F, p_pad), out_dtype),
        grid=grid,
        in_specs=[
            pl.BlockSpec((bt, 1, tp), lambda b, p: (b, 0, p)),   # y coords
            pl.BlockSpec((bt, 1, tp), lambda b, p: (b, 0, p)),   # x coords
            pl.BlockSpec((F, 1), lambda b, p: (0, 0)),           # 1/dim_t
            pl.BlockSpec((F, 1), lambda b, p: (0, 0)),           # phase
        ],
        out_specs=pl.BlockSpec((bt, 2 * F, tp), lambda b, p: (b, 0, p)),
        compiler_params=pltpu.CompilerParams(
            dimension_semantics=("parallel", "parallel"),
            vmem_limit_bytes=vmem_limit),
    )(y_flat, x_flat, inv_dim_t, phase)

    if p_pad != P:
        out = out[:, :, :P]
    # Free (minor-dim split) reshape to PyTorch's NCHW layout.
    return out.reshape(B, 2 * F, H, W)


def _reference_pos_embed(mask, *, num_pos_feats, temperature, normalize, scale):
    """Pure-JAX transliteration of the PyTorch forward, for validation."""
    F = num_pos_feats
    not_mask = (~mask).astype(jnp.float32)
    y_embed = jnp.cumsum(not_mask, axis=1)
    x_embed = jnp.cumsum(not_mask, axis=2)
    if normalize:
        eps = 1e-6
        y_embed = y_embed / (y_embed[:, -1:, :] + eps) * scale
        x_embed = x_embed / (x_embed[:, :, -1:] + eps) * scale
    dim_t = jnp.arange(F, dtype=jnp.float32)
    dim_t = temperature ** (2 * (dim_t // 2) / F)
    pos_x = x_embed[..., None] / dim_t
    pos_y = y_embed[..., None] / dim_t
    B, H, W = mask.shape
    pos_x = jnp.stack([jnp.sin(pos_x[..., 0::2]), jnp.cos(pos_x[..., 1::2])],
                      axis=4).reshape(B, H, W, F)
    pos_y = jnp.stack([jnp.sin(pos_y[..., 0::2]), jnp.cos(pos_y[..., 1::2])],
                      axis=4).reshape(B, H, W, F)
    return jnp.concatenate([pos_y, pos_x], axis=3).transpose(0, 3, 1, 2)


if __name__ == "__main__":
    B, C, H, W = 2, 4, 16, 16
    num_pos_feats = 64
    temperature = 10000.0
    normalize = True          # DETR's builder uses normalize=True
    scale = 2 * math.pi

    key = jax.random.PRNGKey(0)
    kx, kh, kw = jax.random.split(key, 3)

    # x (the image feature tensor) is only used for device/dtype in PyTorch;
    # build it anyway for shape fidelity.
    x = jax.random.normal(kx, (B, C, H, W), dtype=jnp.float32)

    # DETR-style padding mask: True outside the valid region of each image.
    valid_h = jax.random.randint(kh, (B,), 8, H + 1)
    valid_w = jax.random.randint(kw, (B,), 8, W + 1)
    ii = jnp.arange(H)[None, :, None]
    jj = jnp.arange(W)[None, None, :]
    mask = (ii >= valid_h[:, None, None]) | (jj >= valid_w[:, None, None])

    pos = position_embedding_sine(
        mask, num_pos_feats=num_pos_feats, temperature=temperature,
        normalize=normalize, scale=scale)
    pos = jax.block_until_ready(pos)

    ref = _reference_pos_embed(
        mask, num_pos_feats=num_pos_feats, temperature=temperature,
        normalize=normalize, scale=scale)

    assert pos.shape == (B, 2 * num_pos_feats, H, W), pos.shape
    assert pos.dtype == jnp.float32
    # cos(x) is computed as sin(x + pi/2) and 1/dim_t is precomputed, so allow
    # a slightly looser (but still tight) absolute tolerance.
    assert jnp.allclose(pos, ref, atol=2e-5, rtol=1e-5), \
        float(jnp.max(jnp.abs(pos - ref)))

    print("KERNEL_OK")
</pallas_src>

<mosaic_0001>
module attributes {stable_mosaic.version = 11 : i64} {
  func.func @_sine_embed_kernel(%arg0: i32, %arg1: i32, %arg2: memref<1x1x256xf32, #tpu.memory_space<vmem>>, %arg3: memref<1x1x256xf32, #tpu.memory_space<vmem>>, %arg4: memref<64x1xf32, #tpu.memory_space<vmem>>, %arg5: memref<64x1xf32, #tpu.memory_space<vmem>>, %arg6: memref<1x128x256xf32, #tpu.memory_space<vmem>>) attributes {dimension_semantics = [#tpu.dimension_semantics<parallel>, #tpu.dimension_semantics<parallel>], iteration_bounds = array<i64: 2, 1>, scalar_prefetch = 0 : i64, scratch_operands = 0 : i64, tpu.core_type = #tpu.core_type<tc>, window_params = [{transform_indices = @transform_0, window_bounds = array<i64: 1, 1, 256>}, {transform_indices = @transform_1, window_bounds = array<i64: 1, 1, 256>}, {pipeline_mode = #tpu.pipeline_mode<synchronous>, transform_indices = @transform_2, window_bounds = array<i64: 64, 1>}, {pipeline_mode = #tpu.pipeline_mode<synchronous>, transform_indices = @transform_3, window_bounds = array<i64: 64, 1>}, {transform_indices = @transform_4, window_bounds = array<i64: 1, 128, 256>}]} {
    %c0 = arith.constant 0 : index
    %c0_0 = arith.constant 0 : index
    %0 = vector.load %arg4[%c0, %c0_0] : memref<64x1xf32, #tpu.memory_space<vmem>>, vector<64x1xf32>
    %1 = vector.shape_cast %0 : vector<64x1xf32> to vector<64x1xf32>
    %2 = vector.broadcast %1 : vector<64x1xf32> to vector<64x256xf32>
    %c0_1 = arith.constant 0 : index
    %c0_2 = arith.constant 0 : index
    %3 = vector.load %arg5[%c0_1, %c0_2] : memref<64x1xf32, #tpu.memory_space<vmem>>, vector<64x1xf32>
    %4 = vector.shape_cast %3 : vector<64x1xf32> to vector<64x1xf32>
    %5 = vector.broadcast %4 : vector<64x1xf32> to vector<64x256xf32>
    %c0_3 = arith.constant 0 : index
    %c0_4 = arith.constant 0 : index
    %c0_5 = arith.constant 0 : index
    %6 = vector.load %arg2[%c0_3, %c0_4, %c0_5] : memref<1x1x256xf32, #tpu.memory_space<vmem>>, vector<1x1x256xf32>
    %7 = vector.shape_cast %6 : vector<1x1x256xf32> to vector<1x256xf32>
    %c0_6 = arith.constant 0 : index
    %c0_7 = arith.constant 0 : index
    %c0_8 = arith.constant 0 : index
    %8 = vector.load %arg3[%c0_6, %c0_7, %c0_8] : memref<1x1x256xf32, #tpu.memory_space<vmem>>, vector<1x1x256xf32>
    %9 = vector.shape_cast %8 : vector<1x1x256xf32> to vector<1x256xf32>
    %10 = vector.broadcast %7 : vector<1x256xf32> to vector<64x256xf32>
    %11 = arith.mulf %10, %2 : vector<64x256xf32>
    %12 = arith.addf %11, %5 : vector<64x256xf32>
    %13 = math.sin %12 : vector<64x256xf32>
    %c0_9 = arith.constant 0 : index
    %c0_10 = arith.constant 0 : index
    %c0_11 = arith.constant 0 : index
    %14 = vector.load %arg6[%c0_9, %c0_10, %c0_11] : memref<1x128x256xf32, #tpu.memory_space<vmem>>, vector<1x64x256xf32>
    %15 = vector.shape_cast %14 : vector<1x64x256xf32> to vector<64x256xf32>
    %16 = vector.shape_cast %13 : vector<64x256xf32> to vector<1x64x256xf32>
    tpu.vector_store %arg6[%c0_9, %c0_10, %c0_11], %16 {strides = array<i32>} : memref<1x128x256xf32, #tpu.memory_space<vmem>>, vector<1x64x256xf32>,
    %17 = vector.broadcast %9 : vector<1x256xf32> to vector<64x256xf32>
    %18 = arith.mulf %17, %2 : vector<64x256xf32>
    %19 = arith.addf %18, %5 : vector<64x256xf32>
    %20 = math.sin %19 : vector<64x256xf32>
    %c0_12 = arith.constant 0 : index
    %c64 = arith.constant 64 : index
    %c0_13 = arith.constant 0 : index
    %21 = vector.load %arg6[%c0_12, %c64, %c0_13] : memref<1x128x256xf32, #tpu.memory_space<vmem>>, vector<1x64x256xf32>
    %22 = vector.shape_cast %21 : vector<1x64x256xf32> to vector<64x256xf32>
    %23 = vector.shape_cast %20 : vector<64x256xf32> to vector<1x64x256xf32>
    tpu.vector_store %arg6[%c0_12, %c64, %c0_13], %23 {strides = array<i32>} : memref<1x128x256xf32, #tpu.memory_space<vmem>>, vector<1x64x256xf32>,
    return
  }
  func.func @transform_0(%arg0: i32, %arg1: i32) -> (i32, i32, i32) {
    %c0_i32 = arith.constant 0 : i32
    %c0_i32_0 = arith.constant 0 : i32
    return %arg0, %c0_i32, %arg1 : i32, i32, i32
  }
  func.func @transform_1(%arg0: i32, %arg1: i32) -> (i32, i32, i32) {
    %c0_i32 = arith.constant 0 : i32
    %c0_i32_0 = arith.constant 0 : i32
    return %arg0, %c0_i32, %arg1 : i32, i32, i32
  }
  func.func @transform_2(%arg0: i32, %arg1: i32) -> (i32, i32) {
    %c0_i32 = arith.constant 0 : i32
    %c0_i32_0 = arith.constant 0 : i32
    %c0_i32_1 = arith.constant 0 : i32
    return %c0_i32, %c0_i32_0 : i32, i32
  }
  func.func @transform_3(%arg0: i32, %arg1: i32) -> (i32, i32) {
    %c0_i32 = arith.constant 0 : i32
    %c0_i32_0 = arith.constant 0 : i32
    %c0_i32_1 = arith.constant 0 : i32
    return %c0_i32, %c0_i32_0 : i32, i32
  }
  func.func @transform_4(%arg0: i32, %arg1: i32) -> (i32, i32, i32) {
    %c0_i32 = arith.constant 0 : i32
    %c0_i32_0 = arith.constant 0 : i32
    return %arg0, %c0_i32, %arg1 : i32, i32, i32
  }
}

</mosaic_0001>

<bundles_post_ra>
// kernel: tpu_custom_call.1
= control target key start
LH: loop header
LB: loop body
LE: loop exit
PB: predicated region body
PF: predicated region fallthrough
CT: control target
= control target key end

     0   :  { %9 = vsyncpa [#allocation3], 0  ;;  %s7360_s0 = inlined_call_operand.vmem [shape: f32[2,1,256], index: 0, kind: input, shape index: {}]   ;;  %s7361_s1 = inlined_call_operand.vmem [shape: f32[2,1,256], index: 1, kind: input, shape index: {}]   ;;  %s7362_s2 = inlined_call_operand.vmem [shape: f32[64,1], index: 2, kind: input, shape index: {}]   ;;  %s7363_s3 = inlined_call_operand.vmem [shape: f32[64,1], index: 3, kind: input, shape index: {}]   ;;  %s7364_s4 = inlined_call_operand.hbm [shape: f32[2,128,256], index: 4, kind: output, shape index: {}]  }
   0x1   :  { %11 = vsyncpa [#allocation3 + $0x1], 0  ;;  %s4487_s15 = smov 0   ;;  %s4489_s16 = smov 0  }
   0x2   :  { %s4491_s17 = smov 0   ;;  %s4493_s18 = smov 0  }
   0x3   :  { %s4495_s19 = smov 0   ;;  %s4497_s20 = smov 0  }
   0x4 LB: > { %s3908_s21 = sadd.s32 4294967295, %s4450_s20   ;;  %s3909_s22 = sadd.s32 4294967294, %s4450_s20   ;;  %s4450_s20 = sphi %s4497_s20, %s17_s20   ;;  %s4446_s19 = sphi %s4495_s19, %s7444_s19   ;;  %s4442_s18 = sphi %s4493_s18, %s7443_s18   ;;  %s4438_s17 = sphi %s4491_s17, %s7442_s17   ;;  %s4434_s16 = sphi %s4489_s16, %s7441_s16   ;;  %s4430_s15 = sphi %s4487_s15, %s7440_s15  }
   0x5   : > { %s29_s23 = sadd.s32 1, %s4446_s19  ;;  %s136_s24 = sadd.s32 1, %s4438_s17 }
   0x6   : > { %p31_p0 = scmp.ge.s32.totalorder %s29_s23, 2  ;;  %p146_p1 = scmp.ne.s32.totalorder %s4438_s17, %s4434_s16 }
   0x7   : > { %p147_p2 = scmp.eq.s32.totalorder %s3908_s21, 1  ;;  %p152_p3 = scmp.ne.s32.totalorder %s4434_s16, %s4430_s15 }
   0x8   : > { %s7446_s23 = smov (%p31_p0, %s29_s23), 0  ;;  %p153_p5 = scmp.eq.s32.totalorder %s3909_s22, 1 }
   0x9   : > { %p4527_p4 = por %p147_p2, %p146_p1  ;;  %s131_s26 = ssub.s32 %s4446_s19, %s7446_s23 }
   0xa   : > { %p3912_p6 = scmp.ge.s32.totalorder %s4450_s20, 1  ;;  %p134_p7 = scmp.eq.s32.totalorder %s131_s26, 0 }
   0xb   : > { %p4534_p8 = por %p153_p5, %p152_p3  ;;  %p201_p9 = scmp.lt.s32.totalorder %s4450_s20, 3 }
   0xc   : > { %s4540_s28 = scalar_select %p134_p7, %s4438_s17, %s136_s24  }
   0xd   : > { %p202_p10 = pnand %p3912_p6, %p201_p9 }
   0xe   : > { %v259_v0 = vld [vmem:[%s7362_s2 + $0x10] sm:$0xff] (!%p202_p10)  ;;  %v257_v1 = vld [vmem:[%s7362_s2] sm:$0xff] (!%p202_p10)  ;;  %v4452_v2 = vmov (!%p202_p10), 0   ;;  %v260_v3 = vld [vmem:[%s7362_s2 + $0x18] sm:$0xff] (!%p202_p10)  ;;  %p239_p11 = scmp.lt.s32.totalorder (!%p202_p10), %s4442_s18, 1  ;;  %v356_v17 = vlaneseq (!%p202_p10)  ;;  %s235_s8 = sand.u32 (!%p202_p10), 1, %s4434_s16  }
   0xf   : > { %205 = sbr.rel (%p202_p10) target bundleno = 1015 (0x3f7), region = 36  ;;  %4243 = vset.pattern.permute.xlu1 (!%p202_p10), %v4452_v2  ;;  %4242 = vset.pattern.permute.xlu0 (!%p202_p10), %v4452_v2  ;;  %v258_v4 = vld [vmem:[%s7362_s2 + $0x8] sm:$0xff] (!%p202_p10)  ;;  %v261_v6 = vld [vmem:[%s7362_s2 + $0x20] sm:$0xff] (!%p202_p10)  ;;  %v264_v7 = vld [vmem:[%s7362_s2 + $0x38] sm:$0xff] (!%p202_p10)  ;;  %s3913_s9 = sshll.u32 (!%p202_p10), %s235_s8, 8 }
  0x10   : > { %277 = vperm.xlu1 (!%p202_p10), %4243, %v259_v0   ;;  %267 = vperm.xlu0 (!%p202_p10), %4242, %v257_v1   ;;  %v262_v5 = vld [vmem:[%s7362_s2 + $0x28] sm:$0xff] (!%p202_p10)  ;;  %v263_v8 = vld [vmem:[%s7362_s2 + $0x30] sm:$0xff] (!%p202_p10)  ;;  %v305_v10 = vld [vmem:[%s7363_s3] sm:$0xff] (!%p202_p10)  ;;  %v4599_v20 = vshrl.u32 (!%p202_p10), %v356_v17, 7  ;;  %s4951_s10 = scalar_lea.vmem (!%p202_p10), [#allocation2], %s3913_s9  ;;  %s4049_s14 = sshll.u32 (!%p202_p10), %s4442_s18, 12 }
  0x11   : > { %v306_v9 = vld [vmem:[%s7363_s3 + $0x8] sm:$0xff] (!%p202_p10)  ;;  %v308_v11 = vld [vmem:[%s7363_s3 + $0x18] sm:$0xff] (!%p202_p10)  ;;  %v307_v12 = vld [vmem:[%s7363_s3 + $0x10] sm:$0xff] (!%p202_p10)  ;;  %s3817_s21 = sshll.u32 (!%p202_p10), %s4951_s10, 4  ;;  %s7306_s26 = scalar_lea.hbm (!%p202_p10), %s7364_s4, %s4049_s14  ;;  %s7308_s21 = int_to_ptr.vmem [resolvable:$true] %s3817_s21 }
  0x12   : > { %v310_v13 = vld [vmem:[%s7363_s3 + $0x28] sm:$0xff] (!%p202_p10)  ;;  %v309_v14 = vld [vmem:[%s7363_s3 + $0x20] sm:$0xff] (!%p202_p10)  ;;  %v312_v15 = vld [vmem:[%s7363_s3 + $0x38] sm:$0xff] (!%p202_p10)  ;;  %v7366_v23 = vsub.s32 (!%p202_p10), 0, %v4599_v20  ;;  %v7365_v24 = vsub.s32 (!%p202_p10), 1, %v4599_v20 }
  0x13   : > { %v311_v16 = vld [vmem:[%s7363_s3 + $0x30] sm:$0xff] (!%p202_p10) }
  0x14   : > { %282 = vperm.xlu1 (!%p202_p10), %4243, %v260_v3   ;;  %272 = vperm.xlu0 (!%p202_p10), %4242, %v258_v4   ;;  %v4453_v4 = vmov (!%p202_p10), 683565275  }
  0x16   : > { %s4592_s29 = scalar_select %p239_p11, %s4442_s18, 1 }
  0x17   : > { %s7314_s18 = scalar_lea.sflag [#allocation3], %s235_s8 }
  0x18   : > { %292 = vperm.xlu1 %4243, %v262_v5   ;;  %287 = vperm.xlu0 %4242, %v261_v6   ;;  %s3914_s30 = sshll.u32 %s4592_s29, 1  ;;  %s4372_s29 = scalar_lea.vmem %s7308_s21, 4096 }
  0x19   : > { %s245_s7 = scalar_lea.vmem %s7360_s0, %s3914_s30  ;;  %s254_s13 = scalar_lea.vmem %s7361_s1, %s3914_s30 }
  0x1a   : > { %v353_v27 = vld [vmem:[%s245_s7] sm:$0x3]  ;;  %p4373_p12 = scmp.ne.s32.totalorder %s7308_s21, %s4372_s29  ;;  %s4459_s30 = smov [#allocation2]  }
  0x1b   : > { %v4618_v28 = vrot.slane %v353_v27, %v7366_v23  ;;  %v4622_v29 = vrot.slane %v353_v27, %v7365_v24  ;;  %s4376_s5 = sshll.u32 %s4459_s30, 4  ;;  %s4377_s5 = int_to_ptr.vmem [resolvable:$false] %s4376_s5 }
  0x1c   : > { %302 = vperm.xlu1 %4243, %v264_v7   ;;  %297 = vperm.xlu0 %4242, %v263_v8   ;;  %v4454_v8 = vmov 2475754826   ;;  %p4374_p13 = pnand %p4373_p12, %p4527_p4  ;;  %s4378_s6 = scalar_lea.vmem %s4377_s5, 8192 }
  0x1d   : > { %p4379_p1 = scmp.lt.s32.totalorder %s7308_s21, %s4377_s5  ;;  %p4380_p2 = scmp.lt.s32.totalorder %s4378_s6, %s4372_s29 }
  0x1e   : > { %p4375_p0 = pneg %p4374_p13 }
  0x1f   : > { %p4381_p3 = por %p4380_p2, %p4379_p1 }
  0x20   : > { %320 = vperm.xlu1 %4243, %v306_v9   ;;  %315 = vperm.xlu0 %4242, %v305_v10   ;;  %v4455_v10 = vmov 2131351028  }
  0x21   : > { %p4382_p5 = pnand %p4381_p3, %p4375_p0 }
  0x24   : > { %330 = vperm.xlu1 %4243, %v308_v11   ;;  %325 = vperm.xlu0 %4242, %v307_v12   ;;  %v4456_v12 = vmov 2102212464  }
  0x28   : > { %340 = vperm.xlu1 %4243, %v310_v13   ;;  %335 = vperm.xlu0 %4242, %v309_v14   ;;  %v4457_v14 = vmov 920167782  }
  0x2c   : > { %350 = vperm.xlu1 %4243, %v312_v15   ;;  %345 = vperm.xlu0 %4242, %v311_v16  }
  0x8f   : > { %v4594_v18 = vpop.permute.xlu1 %277  ;;  %v4596_v19 = vpop.permute.xlu0 %267 }
  0x90   : > { %v366_v32 = vmul.f32 %v4618_v28, %v4596_v19  ;;  %v367_v33 = vmul.f32 %v4622_v29, %v4596_v19 }
  0x93   : > { %v4601_v21 = vpop.permute.xlu1 %282  ;;  %v4603_v22 = vpop.permute.xlu0 %272 }
  0x94   : > { %v368_v42 = vmul.f32 %v4618_v28, %v4603_v22  ;;  %v369_v56 = vmul.f32 %v4622_v29, %v4603_v22 }
  0x97   : > { %v4612_v25 = vpop.permute.xlu1 %292  ;;  %v4614_v26 = vpop.permute.xlu0 %287 }
  0x9b   : > { %v4624_v30 = vpop.permute.xlu0 %297  ;;  %v4626_v31 = vpop.permute.xlu1 %302 }
  0x9f   : > { %v4632_v34 = vpop.permute.xlu0 %315  ;;  %v4641_v38 = vpop.permute.xlu1 %320 }
  0xa0   : > { %v4635_v35 = vadd.f32 %v366_v32, %v4632_v34  ;;  %v4638_v36 = vadd.f32 %v367_v33, %v4632_v34  ;;  %v4649_v45 = vadd.f32 %v368_v42, %v4641_v38  ;;  %v4660_v60 = vadd.f32 %v369_v56, %v4641_v38 }
  0xa2   : > { %v401_v37 = vand.u32 2139095040, %v4635_v35  ;;  %v398_v39 = vand.u32 2147483647, %v4635_v35  ;;  %v502_v40 = vand.u32 2147483647, %v4638_v36  ;;  %v505_v41 = vand.u32 2139095040, %v4638_v36 }
  0xa3   : > { %v606_v52 = vand.u32 2147483647, %v4649_v45  ;;  %v609_v53 = vand.u32 2139095040, %v4649_v45  ;;  %vm400_vm13 = vcmp.lt.s32.totalorder %v4635_v35, 0  ;;  %vm504_vm15 = vcmp.lt.s32.totalorder %v4638_v36, 0 }
  0xa4   : > { %v402_v43 = vshrl.u32 %v401_v37, 23  ;;  %v506_v44 = vshrl.u32 %v505_v41, 23  ;;  %v405_v47 = vand.u32 8388607, %v398_v39  ;;  %v509_v49 = vand.u32 8388607, %v502_v40 }
  0xa5   : > { %v610_v59 = vshrl.u32 %v609_v53, 23  ;;  %v4670_v2 = vand.u32 8388607, %v606_v52  ;;  %v7368_v37 = vmov 1326507024  }
  0xa6   : > { %v3916_v46 = vadd.s32 4294967169, %v402_v43  ;;  %v3920_v48 = vadd.s32 4294967169, %v506_v44  ;;  %v406_v54 = vor.u32 8388608, %v405_v47  ;;  %v510_v55 = vor.u32 8388608, %v509_v49 }
  0xa7   : > { %v4673_v7 = vadd.s32 4294967169, %v610_v59  ;;  %vm4757_vm14 = vcmp.le.f32.partialorder %v398_v39, 0.7853982 }
  0xa8   : > { %v408_v50 = vadd.s32 1, %v3916_v46  ;;  %v512_v51 = vadd.s32 1, %v3920_v48  ;;  %v4662_v63 = vshll.u32 %v406_v54, 8  ;;  %v4666_v1 = vshll.u32 %v510_v55, 8 }
  0xaa   : > { %vm409_vm0 = vcmp.gt.s32.totalorder %v408_v50, 0  ;;  %vm513_vm1 = vcmp.gt.s32.totalorder %v512_v51, 0 }
  0xab   : > { %v410_v57 = vsel %vm409_vm0, %v408_v50, 0  ;;  %v514_v58 = vsel %vm513_vm1, %v512_v51, 0 }
  0xac   : > { %v411_v61 = vshrl.u32 %v410_v57, 5  ;;  %v412_v62 = vand.u32 31, %v410_v57  ;;  %v4664_v0 = vshrl.u32 %v514_v58, 5  ;;  %v516_v6 = vand.u32 31, %v514_v58 }
  0xae   : > { %v413_v3 = vsub.s32 32, %v412_v62  ;;  %v415_v5 = vshll.u32 %v4453_v4, %v412_v62  ;;  %v418_v9 = vshll.u32 %v4454_v8, %v412_v62  ;;  %v421_v11 = vshll.u32 %v4455_v10, %v412_v62 }
  0xaf   : > { %v424_v13 = vshll.u32 %v4456_v12, %v412_v62  ;;  %v427_v15 = vshll.u32 %v4457_v14, %v412_v62  ;;  %vm430_vm2 = vcmp.lt.s32.totalorder %v411_v61, 1  ;;  %vm431_vm3 = vcmp.lt.s32.totalorder %v411_v61, 2 }
  0xb0   : > { %v416_v16 = vshrl.u32 %v4454_v8, %v413_v3  ;;  %v419_v17 = vshrl.u32 %v4455_v10, %v413_v3  ;;  %v422_v27 = vshrl.u32 %v4456_v12, %v413_v3  ;;  %v414_v32 = vshrl.u32 %v4453_v4, %v413_v3 }
  0xb1   : > { %v425_v33 = vshrl.u32 %v4457_v14, %v413_v3  ;;  %v428_v41 = vshrl.u32 %v7368_v37, %v413_v3  ;;  %v517_v46 = vsub.s32 32, %v516_v6  ;;  %vm432_vm4 = vcmp.lt.s32.totalorder %v411_v61, 3 }
  0xb2   : > { %v417_v42 = vor.u32 %v416_v16, %v415_v5  ;;  %v420_v43 = vor.u32 %v419_v17, %v418_v9  ;;  %v423_v44 = vor.u32 %v422_v27, %v421_v11  ;;  %vm433_vm5 = vcmp.lt.s32.totalorder %v411_v61, 4 }
  0xb3   : > { %v426_v47 = vor.u32 %v425_v33, %v424_v13  ;;  %v429_v48 = vor.u32 %v428_v41, %v427_v15  ;;  %v519_v57 = vshll.u32 %v4453_v4, %v516_v6  ;;  %v520_v62 = vshrl.u32 %v4454_v8, %v517_v46 }
  0xb4   : > { %v434_v49 = vsel %vm430_vm2, %v414_v32, %v417_v42  ;;  %v435_v50 = vsel %vm433_vm5, %v423_v44, 2102212464  ;;  %v438_v51 = vsel %vm430_vm2, %v417_v42, %v420_v43  ;;  %v442_v53 = vsel %vm430_vm2, %v420_v43, %v423_v44 }
  0xb5   : > { %v436_v54 = vsel %vm432_vm4, %v420_v43, %v435_v50  ;;  %v439_v55 = vsel %vm433_vm5, %v426_v47, 920167782  ;;  %v443_v56 = vsel %vm433_vm5, %v429_v48, 1326507024  ;;  %v522_v3 = vshll.u32 %v4454_v8, %v516_v6 }
  0xb6   : > { %v440_v58 = vsel %vm432_vm4, %v423_v44, %v439_v55  ;;  %v444_v59 = vsel %vm432_vm4, %v426_v47, %v443_v56  ;;  %v437_v5 = vsel %vm431_vm3, %v434_v49, %v436_v54  ;;  %v523_v13 = vshrl.u32 %v4455_v10, %v517_v46 }
  0xb7   : > { %v441_v9 = vsel %vm431_vm3, %v438_v51, %v440_v58  ;;  %v445_v11 = vsel %vm431_vm3, %v442_v53, %v444_v59  ;;  %v521_v32 = vor.u32 %v520_v62, %v519_v57  ;;  %v525_v41 = vshll.u32 %v4455_v10, %v516_v6 }
  0xb8   : > { %v4696_v15 = vmul.u32.u64.low %v4662_v63, %v445_v11  ;;  %v4697_v16 = vmul.u32.u64.high %v4662_v63, %v445_v11, %v4696_v15  ;;  %v4700_v17 = vmul.u32.u64.low %v4662_v63, %v441_v9  ;;  %v4701_v27 = vmul.u32.u64.high %v4662_v63, %v441_v9, %v4700_v17 }
  0xb9   : > { %v524_v33 = vor.u32 %v523_v13, %v522_v3  ;;  %v526_v42 = vshrl.u32 %v4456_v12, %v517_v46  ;;  %v518_v61 = vshrl.u32 %v4453_v4, %v517_v46  ;;  %v528_v43 = vshll.u32 %v4456_v12, %v516_v6 }
  0xba   : > { %v529_v44 = vshrl.u32 %v4457_v14, %v517_v46  ;;  %v532_v47 = vshrl.u32 %v7368_v37, %v517_v46  ;;  %v453_v48 = vmul.u32 %v4662_v63, %v437_v5  ;;  %v531_v50 = vshll.u32 %v4457_v14, %v516_v6 }
  0xbb   : > { %v527_v49 = vor.u32 %v526_v42, %v525_v41  ;;  %vm534_vm6 = vcmp.lt.s32.totalorder %v4664_v0, 1  ;;  %vm455_vm7 = vc.u32 %v4697_v16, %v4700_v17  ;;  %v456_v51 = vadd.s32 1, %v4701_v27 }
  0xbc   : > { %v530_v53 = vor.u32 %v529_v44, %v528_v43  ;;  %vm535_vm8 = vcmp.lt.s32.totalorder %v4664_v0, 2  ;;  %v533_v54 = vor.u32 %v532_v47, %v531_v50  ;;  %vm536_vm9 = vcmp.lt.s32.totalorder %v4664_v0, 3 }
  0xbd   : > { %vm537_vm10 = vcmp.lt.s32.totalorder %v4664_v0, 4  ;;  %v542_v46 = vsel %vm534_vm6, %v521_v32, %v524_v33  ;;  %v457_v63 = vsel %vm455_vm7, %v456_v51, %v4701_v27  ;;  %v546_v56 = vsel %vm534_vm6, %v524_v33, %v527_v49 }
  0xbe   : > { %v539_v55 = vsel %vm537_vm10, %v527_v49, 2102212464  ;;  %v543_v6 = vsel %vm537_vm10, %v530_v53, 920167782  ;;  %v458_v57 = vadd.s32 %v457_v63, %v453_v48  ;;  %v538_v58 = vsel %vm534_vm6, %v518_v61, %v521_v32 }
  0xbf   : > { %v544_v59 = vsel %vm536_vm9, %v527_v49, %v543_v6  ;;  %v547_v62 = vsel %vm537_vm10, %v533_v54, 1326507024  ;;  %v540_v3 = vsel %vm536_vm9, %v524_v33, %v539_v55  ;;  %v616_v11 = vadd.s32 1, %v4673_v7 }
  0xc0   : > { %v545_v5 = vsel %vm535_vm8, %v542_v46, %v544_v59  ;;  %v548_v9 = vsel %vm536_vm9, %v530_v53, %v547_v62  ;;  %v459_v13 = vadd.s32 536870912, %v458_v57  ;;  %v541_v61 = vsel %vm535_vm8, %v538_v58, %v540_v3 }
  0xc1   : > { %v549_v15 = vsel %vm535_vm8, %v546_v56, %v548_v9  ;;  %v4726_v27 = vmul.u32.u64.low %v4666_v1, %v545_v5  ;;  %v4727_v41 = vmul.u32.u64.high %v4666_v1, %v545_v5, %v4726_v27  ;;  %vm617_vm11 = vcmp.gt.s32.totalorder %v616_v11, 0 }
  0xc2   : > { %v4731_v32 = vmul.u32.u64.low %v4666_v1, %v549_v15  ;;  %v4732_v42 = vmul.u32.u64.high %v4666_v1, %v549_v15, %v4731_v32  ;;  %v460_v33 = vshrl.u32 %v459_v13, 30  ;;  %v618_v43 = vsel %vm617_vm11, %v616_v11, 0 }
  0xc3   : > { %v620_v7 = vand.u32 31, %v618_v43  ;;  %v713_v44 = vand.u32 2139095040, %v4660_v60  ;;  %v560_v48 = vadd.s32 1, %v4727_v41  ;;  %v614_v49 = vor.u32 8388608, %v4670_v2 }
  0xc4   : > { %v461_v47 = vshll.u32 %v460_v33, 30  ;;  %v557_v50 = vmul.u32 %v4666_v1, %v541_v61  ;;  %vm559_vm12 = vc.u32 %v4732_v42, %v4726_v27  ;;  %v710_v53 = vand.u32 2147483647, %v4660_v60 }
  0xc5   : > { %v621_v51 = vsub.s32 32, %v620_v7  ;;  %v4745_v0 = vmul.f32 %v4618_v28, %v4594_v18  ;;  %v484_v46 = vsub.s32 4, %v460_v33  ;;  %v561_v63 = vsel %vm559_vm12, %v560_v48, %v4727_v41 }
  0xc6   : > { %v4747_v54 = vsub.s32 %v458_v57, %v461_v47  ;;  %v4752_v2 = vmul.f32 %v4622_v29, %v4594_v18  ;;  %v562_v1 = vadd.s32 %v561_v63, %v557_v50  ;;  %v714_v55 = vshrl.u32 %v713_v44, 23 }
  0xc7   : > { %v454_v56 = vadd.s32 %v4700_v17, %v4697_v16  ;;  %v4764_v58 = vshll.u32 %v614_v49, 8  ;;  %v4766_v62 = vshrl.u32 %v618_v43, 5  ;;  %v624_v3 = vshrl.u32 %v4454_v8, %v621_v51 }
  0xc8   : > { %v464_v57 = vsub.s32 0, %v4747_v54  ;;  %v563_v59 = vadd.s32 536870912, %v562_v1  ;;  %v4771_v5 = vand.u32 8388607, %v710_v53  ;;  %v485_v9 = vsel %vm400_vm13, %v484_v46, %v460_v33 }
  0xc9   : > { %v627_v16 = vshrl.u32 %v4455_v10, %v621_v51  ;;  %v630_v17 = vshrl.u32 %v4456_v12, %v621_v51  ;;  %v623_v13 = vshll.u32 %v4453_v4, %v620_v7  ;;  %v633_v15 = vshrl.u32 %v4457_v14, %v621_v51 }
  0xca   : > { %v3917_v39 = vmin.u32 %v464_v57, %v4747_v54  ;;  %v564_v11 = vshrl.u32 %v563_v59, 30  ;;  %v3928_v41 = vadd.s32 4294967169, %v714_v55  ;;  %v626_v61 = vshll.u32 %v4454_v8, %v620_v7 }
  0xcb   : > { %v629_v43 = vshll.u32 %v4455_v10, %v620_v7  ;;  %v636_v44 = vshrl.u32 %v7368_v37, %v621_v51  ;;  %v487_v33 = vsel %vm4757_vm14, 0, %v485_v9  ;;  %v625_v48 = vor.u32 %v624_v3, %v623_v13 }
  0xcc   : > { %v466_v32 = vclz %v3917_v39  ;;  %v565_v47 = vshll.u32 %v564_v11, 30  ;;  %v632_v49 = vshll.u32 %v4456_v12, %v620_v7  ;;  %v628_v46 = vor.u32 %v627_v16, %v626_v61 }
  0xcd   : > { %v631_v63 = vor.u32 %v630_v17, %v629_v43  ;;  %v635_v55 = vshll.u32 %v4457_v14, %v620_v7  ;;  %v588_v59 = vsub.s32 4, %v564_v11  ;;  %v622_v39 = vshrl.u32 %v4453_v4, %v621_v51 }
  0xce   : > { %v3918_v50 = vadd.s32 4294967294, %v466_v32  ;;  %v4788_v57 = vsub.s32 %v562_v1, %v565_v47  ;;  %v634_v24 = vor.u32 %v633_v15, %v632_v49  ;;  %vm638_vm1 = vcmp.lt.s32.totalorder %v4766_v62, 1 }
  0xcf   : > { %v637_v23 = vor.u32 %v636_v44, %v635_v55  ;;  %vm639_vm2 = vcmp.lt.s32.totalorder %v4766_v62, 2  ;;  %vm4795_vm3 = vcmp.le.f32.partialorder %v502_v40, 0.7853982  ;;  %vm640_vm4 = vcmp.lt.s32.totalorder %v4766_v62, 3 }
  0xd0   : > { %vm3919_vm0 = vcmp.lt.s32.totalorder %v3918_v50, 0  ;;  %v568_v7 = vsub.s32 0, %v4788_v57  ;;  %vm641_vm5 = vcmp.lt.s32.totalorder %v4766_v62, 4  ;;  %v646_v17 = vsel %vm638_vm1, %v625_v48, %v628_v46 }
  0xd1   : > { %v469_v3 = vsel %vm3919_vm0, 0, %v3918_v50  ;;  %v643_v16 = vsel %vm641_vm5, %v631_v63, 2102212464  ;;  %v647_v40 = vsel %vm641_vm5, %v634_v24, 920167782  ;;  %v650_v32 = vsel %vm638_vm1, %v628_v46, %v631_v63 }
  0xd2   : > { %v470_v51 = vsub.s32 32, %v469_v3  ;;  %v474_v1 = vsub.s32 4294967266, %v469_v3  ;;  %v471_v13 = vshll.u32 %v4747_v54, %v469_v3  ;;  %v3921_v15 = vmin.u32 %v568_v7, %v4788_v57 }
  0xd3   : > { %v648_v44 = vsel %vm640_vm4, %v631_v63, %v647_v40  ;;  %v651_v47 = vsel %vm641_vm5, %v637_v23, 1326507024  ;;  %v589_v50 = vsel %vm504_vm15, %v588_v59, %v564_v11  ;;  %v642_v55 = vsel %vm638_vm1, %v622_v39, %v625_v48 }
  0xd4   : > { %v472_v61 = vshrl.u32 %v454_v56, %v470_v51  ;;  %v475_v43 = vadd.s32 127, %v474_v1  ;;  %v570_v49 = vclz %v3921_v15  ;;  %v644_v54 = vsel %vm640_vm4, %v628_v46, %v643_v16 }
  0xd5   : > { %v649_v56 = vsel %vm639_vm2, %v646_v17, %v648_v44  ;;  %v652_v51 = vsel %vm640_vm4, %v634_v24, %v651_v47  ;;  %v645_v46 = vsel %vm639_vm2, %v642_v55, %v644_v54  ;;  %v491_v16 = vadd.s32 3, %v487_v33  ;;  %v4838_v47 = vpop.permute.xlu0 %325 }
  0xd6   : > { %v473_v3 = vor.u32 %v472_v61, %v471_v13  ;;  %v476_v7 = vshll.u32 %v475_v43, 23  ;;  %v3922_v63 = vadd.s32 4294967294, %v570_v49  ;;  %v653_v23 = vsel %vm639_vm2, %v650_v32, %v652_v51 }
  0xd7   : > { %v4823_v11 = vmul.u32.u64.low %v4764_v58, %v649_v56  ;;  %v4824_v59 = vmul.u32.u64.high %v4764_v58, %v649_v56, %v4823_v11  ;;  %v4829_v39 = vmul.u32.u64.low %v4764_v58, %v653_v23  ;;  %v4830_v1 = vmul.u32.u64.high %v4764_v58, %v653_v23, %v4829_v39 }
  0xd8   : > { %v477_v48 = vor.u32 4788187, %v476_v7  ;;  %v558_v24 = vadd.s32 %v4726_v27, %v4732_v42  ;;  %vm3923_vm6 = vcmp.lt.s32.totalorder %v3922_v63, 0  ;;  %v720_v17 = vadd.s32 1, %v3928_v41 }
  0xd9   : > { %v480_v15 = vcvt.s32.f32 %v473_v3  ;;  %v573_v40 = vsel %vm3923_vm6, 0, %v3922_v63  ;;  %v591_v32 = vsel %vm4795_vm3, 0, %v589_v50  ;;  %v661_v62 = vmul.u32 %v4764_v58, %v645_v46 }
  0xda   : > { %v478_v13 = vand.u32 2147483647, %v477_v48  ;;  %v574_v61 = vsub.s32 32, %v573_v40  ;;  %v578_v43 = vsub.s32 4294967266, %v573_v40  ;;  %v664_v44 = vadd.s32 1, %v4824_v59 }
  0xdb   : > { %v575_v49 = vshll.u32 %v4788_v57, %v573_v40  ;;  %vm663_vm7 = vc.u32 %v4830_v1, %v4823_v11  ;;  %vm721_vm8 = vcmp.gt.s32.totalorder %v720_v17, 0  ;;  %v595_v54 = vadd.s32 3, %v591_v32 }
  0xdc   : > { %v481_v33 = vmul.f32 %v480_v15, %v478_v13  ;;  %v576_v27 = vshrl.u32 %v558_v24, %v574_v61  ;;  %v579_v42 = vadd.s32 127, %v578_v43  ;;  %v665_v41 = vsel %vm663_vm7, %v664_v44, %v4824_v59 }
  0xdd   : > { %v722_v55 = vsel %vm721_vm8, %v720_v17, 0  ;;  %v666_v3 = vadd.s32 %v665_v41, %v661_v62  ;;  %v4845_v58 = vadd.f32 %v4745_v0, %v4838_v47  ;;  %v4849_v57 = vadd.f32 %v4752_v2, %v4838_v47 }
  0xde   : > { %v482_v50 = vxor.u32 2147483648, %v481_v33  ;;  %v724_v7 = vand.u32 31, %v722_v55  ;;  %v577_v56 = vor.u32 %v576_v27, %v575_v49  ;;  %v580_v51 = vshll.u32 %v579_v42, 23 }
  0xdf   : > { %v667_v23 = vadd.s32 536870912, %v666_v3  ;;  %v4856_v46 = vand.u32 3, %v491_v16  ;;  %vm608_vm9 = vcmp.lt.s32.totalorder %v4649_v45, 0  ;;  %v4859_v0 = vand.u32 3, %v595_v54 }
  0xe0   : > { %v483_v63 = vsel %vm400_vm13, %v482_v50, %v481_v33  ;;  %v725_v59 = vsub.s32 32, %v724_v7  ;;  %v581_v39 = vor.u32 4788187, %v580_v51  ;;  %v718_v2 = vor.u32 8388608, %v4771_v5 }
  0xe1   : > { %v486_v48 = vsel %vm4757_vm14, %v4635_v35, %v483_v63  ;;  %v668_v24 = vshrl.u32 %v667_v23, 30  ;;  %v584_v13 = vcvt.s32.f32 %v577_v56  ;;  %v4863_v15 = vadd.s32 %v4823_v11, %v4830_v1 }
  0xe2   : > { %4244 = vcosq.f32 %v486_v48  ;;  %v582_v17 = vand.u32 2147483647, %v581_v39  ;;  %vm4867_vm10 = vcmp.le.f32.partialorder %v606_v52, 0.7853982  ;;  %v4871_v40 = vshrl.u32 %v722_v55, 5 }
  0xe3   : > { %4246 = vsinq.f32 %v486_v48  ;;  %v669_v16 = vshll.u32 %v668_v24, 30  ;;  %v728_v32 = vshrl.u32 %v4454_v8, %v725_v59  ;;  %v731_v61 = vshrl.u32 %v4455_v10, %v725_v59 }
  0xe4   : > { %v585_v5 = vmul.f32 %v584_v13, %v582_v17  ;;  %v734_v43 = vshrl.u32 %v4456_v12, %v725_v59  ;;  %v736_v62 = vshll.u32 %v4456_v12, %v724_v7  ;;  %v737_v11 = vshrl.u32 %v4457_v14, %v725_v59 }
  0xe5   : > { %vm497_vm11 = vcmp.eq.s32.totalorder %v4856_v46, 2  ;;  %v4879_v52 = vsub.s32 %v666_v3, %v669_v16  ;;  %v692_v1 = vsub.s32 4, %v668_v24  ;;  %v727_v44 = vshll.u32 %v4453_v4, %v724_v7 }
  0xe6   : > { %v730_v33 = vshll.u32 %v4454_v8, %v724_v7  ;;  %vm494_vm12 = vcmp.eq.s32.totalorder %v4856_v46, 0  ;;  %v586_v49 = vxor.u32 2147483648, %v585_v5  ;;  %v733_v27 = vshll.u32 %v4455_v10, %v724_v7 }
  0xe7   : > { %v738_v42 = vor.u32 %v737_v11, %v736_v62  ;;  %v740_v41 = vshrl.u32 %v7368_v37, %v725_v59  ;;  %vm493_vm13 = vcmp.lt.s32.totalorder %v4856_v46, 2  ;;  %v672_v55 = vsub.s32 0, %v4879_v52 }
  0xe8   : > { %v729_v50 = vor.u32 %v728_v32, %v727_v44  ;;  %v732_v54 = vor.u32 %v731_v61, %v730_v33  ;;  %v4888_v3 = vshll.u32 %v718_v2, 8  ;;  %vm490_vm14 = vweird.f32 %v4635_v35 }
  0xe9   : > { %v587_v56 = vsel %vm504_vm15, %v586_v49, %v585_v5  ;;  %v735_v51 = vor.u32 %v734_v43, %v733_v27  ;;  %v739_v63 = vshll.u32 %v4457_v14, %v724_v7  ;;  %v817_v23 = vand.u32 2139095040, %v4845_v58 }
  0xea   : > { %v590_v48 = vsel %vm4795_vm3, %v4638_v36, %v587_v56  ;;  %v3925_v39 = vmin.u32 %v672_v55, %v4879_v52  ;;  %v693_v2 = vsel %vm608_vm9, %v692_v1, %v668_v24  ;;  %vm745_vm0 = vcmp.lt.s32.totalorder %v4871_v40, 4 }
  0xeb   : > { %4248 = vcosq.f32 %v590_v48  ;;  %v741_v17 = vor.u32 %v740_v41, %v739_v63  ;;  %vm742_vm15 = vcmp.lt.s32.totalorder %v4871_v40, 1  ;;  %v751_v7 = vsel %vm745_vm0, %v738_v42, 920167782 }
  0xec   : > { %v4245_v13 = vpop.eup %4244  ;;  %4250 = vsinq.f32 %v590_v48  ;;  %v674_v16 = vclz %v3925_v39  ;;  %vm744_vm1 = vcmp.lt.s32.totalorder %v4871_v40, 3  ;;  %v750_v9 = vsel %vm742_vm15, %v729_v50, %v732_v54 }
  0xed   : > { %v4247_v32 = vpop.eup %4246  ;;  %v498_v24 = vxor.u32 2147483648, %v4245_v13  ;;  %v695_v61 = vsel %vm4867_vm10, 0, %v693_v2  ;;  %v726_v5 = vshrl.u32 %v4453_v4, %v725_v59  ;;  %v752_v43 = vsel %vm744_vm1, %v735_v51, %v751_v7 }
  0xee   : > { %v495_v62 = vxor.u32 2147483648, %v4247_v32  ;;  %v3926_v11 = vadd.s32 4294967294, %v674_v16  ;;  %vm743_vm2 = vcmp.lt.s32.totalorder %v4871_v40, 2  ;;  %v747_v1 = vsel %vm745_vm0, %v735_v51, 2102212464 }
  0xef   : > { %v499_v44 = vsel %vm497_vm11, %v498_v24, %v4247_v32  ;;  %v753_v33 = vsel %vm743_vm2, %v750_v9, %v752_v43  ;;  %v754_v49 = vsel %vm742_vm15, %v732_v54, %v735_v51  ;;  %v755_v59 = vsel %vm745_vm0, %v741_v17, 1326507024 }
  0xf0   : > { %v496_v27 = vsel %vm494_vm12, %v4245_v13, %v495_v62  ;;  %vm3927_vm3 = vcmp.lt.s32.totalorder %v3926_v11, 0  ;;  %v756_v41 = vsel %vm744_vm1, %v738_v42, %v755_v59  ;;  %v818_v55 = vshrl.u32 %v817_v23, 23 }
  0xf1   : > { %v500_v56 = vsel %vm493_vm13, %v496_v27, %v499_v44  ;;  %v677_v63 = vsel %vm3927_vm3, 0, %v3926_v11  ;;  %v746_v48 = vsel %vm742_vm15, %v726_v5, %v729_v50  ;;  %v757_v51 = vsel %vm743_vm2, %v754_v49, %v756_v41 }
  0xf2   : > { %v501_v39 = vsel %vm490_vm14, nan, %v500_v56  ;;  %vm594_vm4 = vweird.f32 %v4638_v36  ;;  %v678_v2 = vsub.s32 32, %v677_v63  ;;  %v682_v17 = vsub.s32 4294967266, %v677_v63 }
  0xf3   : > { %v748_v42 = vsel %vm744_vm1, %v732_v54, %v747_v1  ;;  %v4943_v46 = vmul.u32.u64.low %v4888_v3, %v757_v51  ;;  %v4944_v23 = vmul.u32.u64.high %v4888_v3, %v757_v51, %v4943_v46  ;;  %2062 = vst [vmem:[%s4951_s10] sm:$0xff] %v501_v39  ;;  %v679_v35 = vshll.u32 %v4879_v52, %v677_v63 }
  0xf4   : > { %v4947_v7 = vmul.u32.u64.low %v4888_v3, %v753_v33  ;;  %v4948_v50 = vmul.u32.u64.high %v4888_v3, %v753_v33, %v4947_v7  ;;  %v680_v13 = vshrl.u32 %v4863_v15, %v678_v2  ;;  %v683_v16 = vadd.s32 127, %v682_v17 }
  0xf5   : > { %v3932_v9 = vadd.s32 4294967169, %v818_v55  ;;  %v4249_v54 = vpop.eup %4248  ;;  %vm598_vm5 = vcmp.eq.s32.totalorder %v4859_v0, 0  ;;  %vm601_vm6 = vcmp.eq.s32.totalorder %v4859_v0, 2  ;;  %v749_v32 = vsel %vm743_vm2, %v746_v48, %v748_v42 }
  0xf6   : > { %v814_v24 = vand.u32 2147483647, %v4845_v58  ;;  %v4251_v5 = vpop.eup %4250  ;;  %v602_v43 = vxor.u32 2147483648, %v4249_v54  ;;  %v681_v62 = vor.u32 %v680_v13, %v679_v35  ;;  %v684_v11 = vshll.u32 %v683_v16, 23 }
  0xf7   : > { %v824_v1 = vadd.s32 1, %v3932_v9  ;;  %v599_v52 = vxor.u32 2147483648, %v4251_v5  ;;  %v699_v44 = vadd.s32 3, %v695_v61  ;;  %vm767_vm7 = vc.u32 %v4944_v23, %v4947_v7 }
  0xf8   : > { %v768_v15 = vadd.s32 1, %v4948_v50  ;;  %v603_v33 = vsel %vm601_vm6, %v602_v43, %v4251_v5  ;;  %v685_v49 = vor.u32 4788187, %v684_v11  ;;  %v765_v59 = vmul.u32 %v4888_v3, %v749_v32 }
  0xf9   : > { %vm825_vm8 = vcmp.gt.s32.totalorder %v824_v1, 0  ;;  %vm597_vm11 = vcmp.lt.s32.totalorder %v4859_v0, 2  ;;  %v600_v40 = vsel %vm598_vm5, %v4249_v54, %v599_v52  ;;  %v688_v56 = vcvt.s32.f32 %v681_v62 }
  0xfa   : > { %v769_v27 = vsel %vm767_vm7, %v768_v15, %v4948_v50  ;;  %v826_v41 = vsel %vm825_vm8, %v824_v1, 0  ;;  %v604_v61 = vsel %vm597_vm11, %v600_v40, %v603_v33  ;;  %v686_v55 = vand.u32 2147483647, %v685_v49 }
  0xfb   : > { %v770_v63 = vadd.s32 %v769_v27, %v765_v59  ;;  %v4971_v48 = vmul.f32 %v4618_v28, %v4601_v21  ;;  %v4975_v3 = vmul.f32 %v4622_v29, %v4601_v21  ;;  %v605_v0 = vsel %vm594_vm4, nan, %v604_v61 }
  0xfc   : > { %v828_v51 = vand.u32 31, %v826_v41  ;;  %v4981_v39 = vmul.f32 %v4618_v28, %v4614_v26  ;;  %v689_v2 = vmul.f32 %v688_v56, %v686_v55  ;;  %v4983_v17 = vand.u32 3, %v699_v44  ;;  %2063 = vst [vmem:[%s4951_s10 + $0x8] sm:$0xff] %v605_v0 }
  0xfd   : > { %v771_v42 = vadd.s32 536870912, %v770_v63  ;;  %v821_v46 = vand.u32 8388607, %v814_v24  ;;  %v827_v50 = vshrl.u32 %v826_v41, 5  ;;  %v921_v13 = vand.u32 2139095040, %v4849_v57 }
  0xfe   : > { %v829_v35 = vsub.s32 32, %v828_v51  ;;  %v690_v16 = vxor.u32 2147483648, %v689_v2  ;;  %v831_v9 = vshll.u32 %v4453_v4, %v828_v51  ;;  %v834_v54 = vshll.u32 %v4454_v8, %v828_v51 }
  0xff   : > { %v4989_v36 = vshrl.u32 %v771_v42, 30  ;;  %v837_v43 = vshll.u32 %v4455_v10, %v828_v51  ;;  %v840_v52 = vshll.u32 %v4456_v12, %v828_v51  ;;  %v822_v27 = vor.u32 8388608, %v821_v46 }
 0x100   : > { %v832_v32 = vshrl.u32 %v4454_v8, %v829_v35  ;;  %v835_v5 = vshrl.u32 %v4455_v10, %v829_v35  ;;  %v838_v62 = vshrl.u32 %v4456_v12, %v829_v35  ;;  %v691_v11 = vsel %vm608_vm9, %v690_v16, %v689_v2 }
 0x101   : > { %v773_v1 = vshll.u32 %v4989_v36, 30  ;;  %v841_v44 = vshrl.u32 %v4457_v14, %v829_v35  ;;  %v694_v15 = vsel %vm4867_vm10, %v4649_v45, %v691_v11  ;;  %v843_v61 = vshll.u32 %v4457_v14, %v828_v51 }
 0x102   : > { %v833_v33 = vor.u32 %v832_v32, %v831_v9  ;;  %v836_v49 = vor.u32 %v835_v5, %v834_v54  ;;  %v839_v59 = vor.u32 %v838_v62, %v837_v43  ;;  %4252 = vcosq.f32 %v694_v15 }
 0x103   : > { %v5005_v40 = vsub.s32 %v770_v63, %v773_v1  ;;  %v842_v41 = vor.u32 %v841_v44, %v840_v52  ;;  %4254 = vsinq.f32 %v694_v15  ;;  %v844_v55 = vshrl.u32 %v7368_v37, %v829_v35 }
 0x104   : > { %v922_v56 = vshrl.u32 %v921_v13, 23  ;;  %vm846_vm9 = vcmp.lt.s32.totalorder %v827_v50, 1  ;;  %vm848_vm12 = vcmp.lt.s32.totalorder %v827_v50, 3  ;;  %vm849_vm13 = vcmp.lt.s32.totalorder %v827_v50, 4 }
 0x105   : > { %v776_v0 = vsub.s32 0, %v5005_v40  ;;  %v845_v6 = vor.u32 %v844_v55, %v843_v61  ;;  %v851_v2 = vsel %vm849_vm13, %v839_v59, 2102212464  ;;  %v854_v42 = vsel %vm846_vm9, %v833_v33, %v836_v49 }
 0x106   : > { %v855_v16 = vsel %vm849_vm13, %v842_v41, 920167782  ;;  %v830_v46 = vshrl.u32 %v4453_v4, %v829_v35  ;;  %vm847_vm10 = vcmp.lt.s32.totalorder %v827_v50, 2  ;;  %v858_v13 = vsel %vm846_vm9, %v836_v49, %v839_v59 }
 0x107   : > { %v3929_v63 = vmin.u32 %v776_v0, %v5005_v40  ;;  %v856_v51 = vsel %vm848_vm12, %v839_v59, %v855_v16  ;;  %v859_v54 = vsel %vm849_vm13, %v845_v6, 1326507024  ;;  %v862_v32 = vshll.u32 %v822_v27, 8 }
 0x108   : > { %v857_v9 = vsel %vm847_vm10, %v854_v42, %v856_v51  ;;  %vm712_vm14 = vcmp.lt.s32.totalorder %v4660_v60, 0  ;;  %v850_v43 = vsel %vm846_vm9, %v830_v46, %v833_v33  ;;  %v852_v62 = vsel %vm848_vm12, %v836_v49, %v851_v2 }
 0x109   : > { %v778_v5 = vclz %v3929_v63  ;;  %vm698_vm0 = vweird.f32 %v4649_v45  ;;  %vm5022_vm15 = vcmp.le.f32.partialorder %v710_v53, 0.7853982  ;;  %v796_v11 = vsub.s32 4, %v4989_v36 }
 0x10a   : > { %v860_v1 = vsel %vm848_vm12, %v842_v41, %v859_v54  ;;  %v5028_v52 = vmul.u32.u64.low %v862_v32, %v857_v9  ;;  %v5029_v44 = vmul.u32.u64.high %v862_v32, %v857_v9, %v5028_v52  ;;  %vm701_vm1 = vcmp.lt.s32.totalorder %v4983_v17, 2  ;;  %v5052_v54 = vpop.permute.xlu1 %330 }
 0x10b   : > { %v3930_v15 = vadd.s32 4294967294, %v778_v5  ;;  %v861_v33 = vsel %vm847_vm10, %v858_v13, %v860_v1  ;;  %v3936_v49 = vadd.s32 4294967169, %v922_v56  ;;  %vm702_vm2 = vcmp.eq.s32.totalorder %v4983_v17, 0  ;;  %v5054_v5 = vpop.permute.xlu0 %335 }
 0x10c   : > { %v853_v53 = vsel %vm847_vm10, %v850_v43, %v852_v62  ;;  %v5036_v59 = vmul.u32.u64.low %v862_v32, %v861_v33  ;;  %v5037_v27 = vmul.u32.u64.high %v862_v32, %v861_v33, %v5036_v59  ;;  %v4253_v61 = vpop.eup %4252  ;;  %vm705_vm3 = vcmp.eq.s32.totalorder %v4983_v17, 2 }
 0x10d   : > { %v766_v41 = vadd.s32 %v4947_v7, %v4944_v23  ;;  %vm3931_vm4 = vcmp.lt.s32.totalorder %v3930_v15, 0  ;;  %v928_v55 = vadd.s32 1, %v3936_v49  ;;  %v4255_v0 = vpop.eup %4254  ;;  %v706_v6 = vxor.u32 2147483648, %v4253_v61 }
 0x10e   : > { %v781_v2 = vsel %vm3931_vm4, 0, %v3930_v15  ;;  %v797_v56 = vsel %vm712_vm14, %v796_v11, %v4989_v36  ;;  %v872_v50 = vadd.s32 1, %v5029_v44  ;;  %v703_v42 = vxor.u32 2147483648, %v4255_v0 }
 0x10f   : > { %v782_v16 = vsub.s32 32, %v781_v2  ;;  %v786_v63 = vsub.s32 4294967266, %v781_v2  ;;  %v869_v46 = vmul.u32 %v862_v32, %v853_v53  ;;  %v707_v51 = vsel %vm705_vm3, %v706_v6, %v4255_v0 }
 0x110   : > { %v783_v9 = vshll.u32 %v5005_v40, %v781_v2  ;;  %vm871_vm5 = vc.u32 %v5037_v27, %v5028_v52  ;;  %vm929_vm6 = vcmp.gt.s32.totalorder %v928_v55, 0  ;;  %v704_v23 = vsel %vm702_vm2, %v4253_v61, %v703_v42 }
 0x111   : > { %v784_v7 = vshrl.u32 %v766_v41, %v782_v16  ;;  %v787_v13 = vadd.s32 127, %v786_v63  ;;  %v873_v36 = vsel %vm871_vm5, %v872_v50, %v5029_v44  ;;  %v708_v32 = vsel %vm701_vm1, %v704_v23, %v707_v51 }
 0x112   : > { %v874_v40 = vadd.s32 %v873_v36, %v869_v46  ;;  %v918_v43 = vand.u32 2147483647, %v4849_v57  ;;  %v930_v62 = vsel %vm929_vm6, %v928_v55, 0  ;;  %v709_v11 = vsel %vm698_vm0, nan, %v708_v32 }
 0x113   : > { %v785_v1 = vor.u32 %v784_v7, %v783_v9  ;;  %v788_v15 = vshll.u32 %v787_v13, 23  ;;  %v799_v33 = vsel %vm5022_vm15, 0, %v797_v56  ;;  %v5065_v44 = vmul.f32 %v4622_v29, %v4614_v26  ;;  %2064 = vst [vmem:[%s4951_s10 + $0x10] sm:$0xff] %v709_v11 }
 0x114   : > { %v5069_v17 = vmul.f32 %v4618_v28, %v4612_v25  ;;  %v875_v49 = vadd.s32 536870912, %v874_v40  ;;  %v932_v53 = vand.u32 31, %v930_v62  ;;  %v5074_v45 = vadd.f32 %v4971_v48, %v5052_v54 }
 0x115   : > { %v5078_v59 = vadd.f32 %v4975_v3, %v5052_v54  ;;  %v5082_v61 = vadd.f32 %v4981_v39, %v5054_v5  ;;  %v789_v41 = vor.u32 4788187, %v788_v15  ;;  %v803_v55 = vadd.s32 3, %v799_v33 }
 0x116   : > { %v5084_v0 = vshrl.u32 %v875_v49, 30  ;;  %v925_v6 = vand.u32 8388607, %v918_v43  ;;  %v933_v2 = vsub.s32 32, %v932_v53  ;;  %v792_v50 = vcvt.s32.f32 %v785_v1 }
 0x117   : > { %v790_v56 = vand.u32 2147483647, %v789_v41  ;;  %v5088_v48 = vshrl.u32 %v930_v62, 5  ;;  %v935_v42 = vshll.u32 %v4453_v4, %v932_v53  ;;  %v938_v39 = vshll.u32 %v4454_v8, %v932_v53 }
 0x118   : > { %v877_v3 = vshll.u32 %v5084_v0, 30  ;;  %v936_v16 = vshrl.u32 %v4454_v8, %v933_v2  ;;  %v941_v63 = vshll.u32 %v4455_v10, %v932_v53  ;;  %v939_v51 = vshrl.u32 %v4455_v10, %v933_v2 }
 0x119   : > { %v793_v46 = vmul.f32 %v792_v50, %v790_v56  ;;  %v942_v9 = vshrl.u32 %v4456_v12, %v933_v2  ;;  %v945_v23 = vshrl.u32 %v4457_v14, %v933_v2  ;;  %v5098_v7 = vand.u32 3, %v803_v55 }
 0x11a   : > { %v5100_v13 = vsub.s32 %v874_v40, %v877_v3  ;;  %v944_v36 = vshll.u32 %v4456_v12, %v932_v53  ;;  %v948_v32 = vshrl.u32 %v7368_v37, %v933_v2  ;;  %v937_v11 = vor.u32 %v936_v16, %v935_v42 }
 0x11b   : > { %v794_v62 = vxor.u32 2147483648, %v793_v46  ;;  %v940_v1 = vor.u32 %v939_v51, %v938_v39  ;;  %v943_v15 = vor.u32 %v942_v9, %v941_v63  ;;  %v926_v49 = vor.u32 8388608, %v925_v6 }
 0x11c   : > { %v880_v33 = vsub.s32 0, %v5100_v13  ;;  %v946_v41 = vor.u32 %v945_v23, %v944_v36  ;;  %v947_v56 = vshll.u32 %v4457_v14, %v932_v53  ;;  %v934_v40 = vshrl.u32 %v4453_v4, %v933_v2 }
 0x11d   : > { %v795_v55 = vsel %vm712_vm14, %v794_v62, %v793_v46  ;;  %vm950_vm7 = vcmp.lt.s32.totalorder %v5088_v48, 1  ;;  %v1025_v50 = vand.u32 2139095040, %v5074_v45  ;;  %vm953_vm8 = vcmp.lt.s32.totalorder %v5088_v48, 4 }
 0x11e   : > { %v798_v42 = vsel %vm5022_vm15, %v4660_v60, %v795_v55  ;;  %v3933_v3 = vmin.u32 %v880_v33, %v5100_v13  ;;  %v949_v16 = vor.u32 %v948_v32, %v947_v56  ;;  %v955_v53 = vsel %vm953_vm8, %v943_v15, 2102212464 }
 0x11f   : > { %4256 = vcosq.f32 %v798_v42  ;;  %v958_v6 = vsel %vm950_vm7, %v937_v11, %v940_v1  ;;  %v959_v2 = vsel %vm953_vm8, %v946_v41, 920167782  ;;  %vm952_vm11 = vcmp.lt.s32.totalorder %v5088_v48, 3 }
 0x120   : > { %4258 = vsinq.f32 %v798_v42  ;;  %v882_v39 = vclz %v3933_v3  ;;  %v966_v35 = vshll.u32 %v926_v49, 8  ;;  %vm951_vm9 = vcmp.lt.s32.totalorder %v5088_v48, 2 }
 0x121   : > { %v954_v63 = vsel %vm950_vm7, %v934_v40, %v937_v11  ;;  %v960_v46 = vsel %vm952_vm11, %v943_v15, %v959_v2  ;;  %v962_v51 = vsel %vm950_vm7, %v940_v1, %v943_v15  ;;  %vm5130_vm12 = vcmp.le.f32.partialorder %v814_v24, 0.7853982 }
 0x122   : > { %v3934_v23 = vadd.s32 4294967294, %v882_v39  ;;  %v956_v36 = vsel %vm952_vm11, %v940_v1, %v955_v53  ;;  %v961_v32 = vsel %vm951_vm9, %v958_v6, %v960_v46  ;;  %v963_v62 = vsel %vm953_vm8, %v949_v16, 1326507024 }
 0x123   : > { %v964_v33 = vsel %vm952_vm11, %v946_v41, %v963_v62  ;;  %v5138_v11 = vmul.u32.u64.low %v966_v35, %v961_v32  ;;  %v5139_v49 = vmul.u32.u64.high %v966_v35, %v961_v32, %v5138_v11  ;;  %v1026_v15 = vshrl.u32 %v1025_v50, 23 }
 0x124   : > { %vm3935_vm13 = vcmp.lt.s32.totalorder %v3934_v23, 0  ;;  %v900_v24 = vsub.s32 4, %v5084_v0  ;;  %v965_v56 = vsel %vm951_vm9, %v962_v51, %v964_v33  ;;  %v1022_v1 = vand.u32 2147483647, %v5074_v45 }
 0x125   : > { %v885_v55 = vsel %vm3935_vm13, 0, %v3934_v23  ;;  %v5146_v40 = vmul.u32.u64.low %v966_v35, %v965_v56  ;;  %v5147_v42 = vmul.u32.u64.high %v966_v35, %v965_v56, %v5146_v40  ;;  %v3940_v3 = vadd.s32 4294967169, %v1026_v15 }
 0x126   : > { %vm802_vm10 = vweird.f32 %v4660_v60  ;;  %v870_v41 = vadd.s32 %v5028_v52, %v5037_v27  ;;  %v886_v16 = vsub.s32 32, %v885_v55  ;;  %v890_v50 = vsub.s32 4294967266, %v885_v55 }
 0x127   : > { %v957_v53 = vsel %vm951_vm9, %v954_v63, %v956_v36  ;;  %vm809_vm14 = vcmp.eq.s32.totalorder %v5098_v7, 2  ;;  %vm816_vm0 = vcmp.lt.s32.totalorder %v4845_v58, 0  ;;  %v976_v6 = vadd.s32 1, %v5139_v49 }
 0x128   : > { %v1032_v2 = vadd.s32 1, %v3940_v3  ;;  %v887_v39 = vshll.u32 %v5100_v13, %v885_v55  ;;  %v888_v46 = vshrl.u32 %v870_v41, %v886_v16  ;;  %v891_v51 = vadd.s32 127, %v890_v50 }
 0x129   : > { %v901_v52 = vsel %vm816_vm0, %v900_v24, %v5084_v0  ;;  %v4257_v27 = vpop.eup %4256  ;;  %v973_v23 = vmul.u32 %v966_v35, %v957_v53  ;;  %vm975_vm15 = vc.u32 %v5147_v42, %v5138_v11  ;;  %v1029_v48 = vand.u32 8388607, %v1022_v1 }
 0x12a   : > { %vm1033_vm1 = vcmp.gt.s32.totalorder %v1032_v2, 0  ;;  %v4259_v63 = vpop.eup %4258  ;;  %v810_v36 = vxor.u32 2147483648, %v4257_v27  ;;  %v889_v32 = vor.u32 %v888_v46, %v887_v39  ;;  %v892_v62 = vshll.u32 %v891_v51, 23 }
 0x12b   : > { %v977_v13 = vsel %vm975_vm15, %v976_v6, %v5139_v49  ;;  %v807_v33 = vxor.u32 2147483648, %v4259_v63  ;;  %v903_v15 = vsel %vm5130_vm12, 0, %v901_v52  ;;  %v1034_v24 = vsel %vm1033_vm1, %v1032_v2, 0 }
 0x12c   : > { %v978_v0 = vadd.s32 %v977_v13, %v973_v23  ;;  %vm806_vm2 = vcmp.eq.s32.totalorder %v5098_v7, 0  ;;  %v811_v35 = vsel %vm809_vm14, %v810_v36, %v4259_v63  ;;  %v893_v56 = vor.u32 4788187, %v892_v62 }
 0x12d   : > { %v1129_v55 = vand.u32 2139095040, %v5078_v59  ;;  %vm805_vm3 = vcmp.lt.s32.totalorder %v5098_v7, 2  ;;  %v808_v40 = vsel %vm806_vm2, %v4257_v27, %v807_v33  ;;  %v1036_v49 = vand.u32 31, %v1034_v24 }
 0x12e   : > { %v979_v3 = vadd.s32 536870912, %v978_v0  ;;  %v812_v41 = vsel %vm805_vm3, %v808_v40, %v811_v35  ;;  %v894_v16 = vand.u32 2147483647, %v893_v56  ;;  %v896_v50 = vcvt.s32.f32 %v889_v32 }
 0x12f   : > { %v907_v53 = vadd.s32 3, %v903_v15  ;;  %v813_v6 = vsel %vm802_vm10, nan, %v812_v41  ;;  %v1030_v39 = vor.u32 8388608, %v1029_v48  ;;  %v1037_v46 = vsub.s32 32, %v1036_v49 }
 0x130   : > { %v5175_v2 = vshrl.u32 %v979_v3, 30  ;;  %v897_v51 = vmul.f32 %v896_v50, %v894_v16  ;;  %v1035_v52 = vshrl.u32 %v1034_v24, 5  ;;  %v1039_v23 = vshll.u32 %v4453_v4, %v1036_v49  ;;  %2065 = vst [vmem:[%s4951_s10 + $0x18] sm:$0xff] %v813_v6 }
 0x131   : > { %v1130_v7 = vshrl.u32 %v1129_v55, 23  ;;  %v1040_v63 = vshrl.u32 %v4454_v8, %v1037_v46  ;;  %v1042_v36 = vshll.u32 %v4454_v8, %v1036_v49  ;;  %v1045_v32 = vshll.u32 %v4455_v10, %v1036_v49 }
 0x132   : > { %v981_v27 = vshll.u32 %v5175_v2, 30  ;;  %v898_v60 = vxor.u32 2147483648, %v897_v51  ;;  %v1043_v62 = vshrl.u32 %v4455_v10, %v1037_v46  ;;  %v1046_v48 = vshrl.u32 %v4456_v12, %v1037_v46 }
 0x133   : > { %v1049_v13 = vshrl.u32 %v4457_v14, %v1037_v46  ;;  %v5186_v33 = vand.u32 3, %v907_v53  ;;  %v1048_v24 = vshll.u32 %v4456_v12, %v1036_v49  ;;  %v5191_v35 = vshll.u32 %v1030_v39, 8 }
 0x134   : > { %v5188_v15 = vsub.s32 %v978_v0, %v981_v27  ;;  %v899_v56 = vsel %vm816_vm0, %v898_v60, %v897_v51  ;;  %v1041_v55 = vor.u32 %v1040_v63, %v1039_v23  ;;  %v1044_v40 = vor.u32 %v1043_v62, %v1042_v36 }
 0x135   : > { %v1047_v3 = vor.u32 %v1046_v48, %v1045_v32  ;;  %v902_v41 = vsel %vm5130_vm12, %v4845_v58, %v899_v56  ;;  %v1050_v50 = vor.u32 %v1049_v13, %v1048_v24  ;;  %v3944_v53 = vadd.s32 4294967169, %v1130_v7 }
 0x136   : > { %v984_v16 = vsub.s32 0, %v5188_v15  ;;  %4260 = vcosq.f32 %v902_v41  ;;  %v1051_v0 = vshll.u32 %v4457_v14, %v1036_v49  ;;  %v1052_v6 = vshrl.u32 %v7368_v37, %v1037_v46 }
 0x137   : > { %vm1054_vm4 = vcmp.lt.s32.totalorder %v1035_v52, 1  ;;  %4262 = vsinq.f32 %v902_v41  ;;  %vm920_vm5 = vcmp.lt.s32.totalorder %v4849_v57, 0  ;;  %v1038_v51 = vshrl.u32 %v4453_v4, %v1037_v46 }
 0x138   : > { %v3937_v39 = vmin.u32 %v984_v16, %v5188_v15  ;;  %vm1057_vm6 = vcmp.lt.s32.totalorder %v1035_v52, 4  ;;  %v1053_v9 = vor.u32 %v1052_v6, %v1051_v0  ;;  %v1062_v27 = vsel %vm1054_vm4, %v1041_v55, %v1044_v40 }
 0x139   : > { %v1059_v23 = vsel %vm1057_vm6, %v1047_v3, 2102212464  ;;  %v1063_v63 = vsel %vm1057_vm6, %v1050_v50, 920167782  ;;  %vm1055_vm7 = vcmp.lt.s32.totalorder %v1035_v52, 2  ;;  %vm1056_vm8 = vcmp.lt.s32.totalorder %v1035_v52, 3 }
 0x13a   : > { %v986_v7 = vclz %v3937_v39  ;;  %v1058_v49 = vsel %vm1054_vm4, %v1038_v51, %v1041_v55  ;;  %v1060_v36 = vsel %vm1056_vm8, %v1044_v40, %v1059_v23  ;;  %v1064_v32 = vsel %vm1056_vm8, %v1047_v3, %v1063_v63 }
 0x13b   : > { %v1066_v60 = vsel %vm1054_vm4, %v1044_v40, %v1047_v3  ;;  %v1067_v62 = vsel %vm1057_vm6, %v1053_v9, 1326507024  ;;  %vm5209_vm11 = vcmp.le.f32.partialorder %v918_v43, 0.7853982  ;;  %v1065_v13 = vsel %vm1055_vm7, %v1062_v27, %v1064_v32 }
 0x13c   : > { %v3938_v48 = vadd.s32 4294967294, %v986_v7  ;;  %v1068_v24 = vsel %vm1056_vm8, %v1050_v50, %v1067_v62  ;;  %vm909_vm9 = vcmp.lt.s32.totalorder %v5186_v33, 2  ;;  %v1004_v56 = vsub.s32 4, %v5175_v2 }
 0x13d   : > { %v1069_v55 = vsel %vm1055_vm7, %v1066_v60, %v1068_v24  ;;  %v5218_v41 = vmul.u32.u64.low %v5191_v35, %v1065_v13  ;;  %v5219_v40 = vmul.u32.u64.high %v5191_v35, %v1065_v13, %v5218_v41  ;;  %v1061_v43 = vsel %vm1055_vm7, %v1058_v49, %v1060_v36 }
 0x13e   : > { %vm3939_vm12 = vcmp.lt.s32.totalorder %v3938_v48, 0  ;;  %v5224_v3 = vmul.u32.u64.low %v5191_v35, %v1069_v55  ;;  %v5225_v16 = vmul.u32.u64.high %v5191_v35, %v1069_v55, %v5224_v3  ;;  %vm910_vm13 = vcmp.eq.s32.totalorder %v5186_v33, 0 }
 0x13f   : > { %v989_v50 = vsel %vm3939_vm12, 0, %v3938_v48  ;;  %v7367_v0 = vand.u32 2147483647, %v5078_v59  ;;  %v1136_v6 = vadd.s32 1, %v3944_v53  ;;  %vm913_vm10 = vcmp.eq.s32.totalorder %v5186_v33, 2 }
 0x140   : > { %v974_v39 = vadd.s32 %v5138_v11, %v5147_v42  ;;  %v990_v51 = vsub.s32 32, %v989_v50  ;;  %v994_v9 = vsub.s32 4294967266, %v989_v50  ;;  %v4261_v23 = vpop.eup %4260  ;;  %v1005_v52 = vsel %vm920_vm5, %v1004_v56, %v5175_v2 }
 0x141   : > { %v1077_v27 = vmul.u32 %v5191_v35, %v1061_v43  ;;  %v1080_v63 = vadd.s32 1, %v5219_v40  ;;  %vm1137_vm14 = vcmp.gt.s32.totalorder %v1136_v6, 0  ;;  %v4263_v7 = vpop.eup %4262  ;;  %v914_v49 = vxor.u32 2147483648, %v4261_v23 }
 0x142   : > { %v991_v53 = vshll.u32 %v5188_v15, %v989_v50  ;;  %v992_v36 = vshrl.u32 %v974_v39, %v990_v51  ;;  %v995_v32 = vadd.s32 127, %v994_v9  ;;  %v911_v60 = vxor.u32 2147483648, %v4263_v7 }
 0x143   : > { %vm1079_vm0 = vc.u32 %v5225_v16, %v5218_v41  ;;  %v1133_v11 = vand.u32 8388607, %v7367_v0  ;;  %v1138_v42 = vsel %vm1137_vm14, %v1136_v6, 0  ;;  %v915_v2 = vsel %vm913_vm10, %v914_v49, %v4263_v7 }
 0x144   : > { %v993_v35 = vor.u32 %v992_v36, %v991_v53  ;;  %v996_v62 = vshll.u32 %v995_v32, 23  ;;  %v1081_v48 = vsel %vm1079_vm0, %v1080_v63, %v5219_v40  ;;  %v912_v15 = vsel %vm910_vm13, %v4261_v23, %v911_v60 }
 0x145   : > { %v1007_v13 = vsel %vm5209_vm11, 0, %v1005_v52  ;;  %v1082_v24 = vadd.s32 %v1081_v48, %v1077_v27  ;;  %v1140_v56 = vand.u32 31, %v1138_v42  ;;  %v5251_v55 = vmul.f32 %v4622_v29, %v4612_v25 }
 0x146   : > { %vm906_vm15 = vweird.f32 %v4845_v58  ;;  %v916_v43 = vsel %vm909_vm9, %v912_v15, %v915_v2  ;;  %v997_v3 = vor.u32 4788187, %v996_v62  ;;  %v5258_v40 = vmul.f32 %v4618_v28, %v4624_v30 }
 0x147   : > { %v917_v50 = vsel %vm906_vm15, nan, %v916_v43  ;;  %v1083_v6 = vadd.s32 536870912, %v1082_v24  ;;  %v1141_v39 = vsub.s32 32, %v1140_v56  ;;  %v1000_v9 = vcvt.s32.f32 %v993_v35 }
 0x148   : > { %v998_v51 = vand.u32 2147483647, %v997_v3  ;;  %v1011_v23 = vadd.s32 3, %v1007_v13  ;;  %v1134_v52 = vor.u32 8388608, %v1133_v11  ;;  %2066 = vst [vmem:[%s4951_s10 + $0x20] sm:$0xff] %v917_v50  ;;  %v1139_v63 = vshrl.u32 %v1138_v42, 5 }
 0x149   : > { %v5261_v27 = vshrl.u32 %v1083_v6, 30  ;;  %v1144_v58 = vshrl.u32 %v4454_v8, %v1141_v39  ;;  %v1233_v33 = vand.u32 2139095040, %v5082_v61  ;;  %v1147_v49 = vshrl.u32 %v4455_v10, %v1141_v39 }
 0x14a   : > { %v1001_v7 = vmul.f32 %v1000_v9, %v998_v51  ;;  %v1150_v53 = vshrl.u32 %v4456_v12, %v1141_v39  ;;  %v1153_v36 = vshrl.u32 %v4457_v14, %v1141_v39  ;;  %v1143_v60 = vshll.u32 %v4453_v4, %v1140_v56 }
 0x14b   : > { %v1085_v32 = vshll.u32 %v5261_v27, 30  ;;  %v1146_v11 = vshll.u32 %v4454_v8, %v1140_v56  ;;  %v1149_v2 = vshll.u32 %v4455_v10, %v1140_v56  ;;  %v1152_v35 = vshll.u32 %v4456_v12, %v1140_v56 }
 0x14c   : > { %v1002_v42 = vxor.u32 2147483648, %v1001_v7  ;;  %v1155_v62 = vshll.u32 %v4457_v14, %v1140_v56  ;;  %v1156_v48 = vshrl.u32 %v7368_v37, %v1141_v39  ;;  %v5277_v15 = vadd.f32 %v5065_v44, %v5054_v5 }
 0x14d   : > { %v5279_v13 = vsub.s32 %v1082_v24, %v1085_v32  ;;  %v1145_v43 = vor.u32 %v1144_v58, %v1143_v60  ;;  %v1151_v3 = vor.u32 %v1150_v53, %v1149_v2  ;;  %v1148_v6 = vor.u32 %v1147_v49, %v1146_v11 }
 0x14e   : > { %v1003_v50 = vsel %vm920_vm5, %v1002_v42, %v1001_v7  ;;  %v1154_v51 = vor.u32 %v1153_v36, %v1152_v35  ;;  %v1157_v9 = vor.u32 %v1156_v48, %v1155_v62  ;;  %v5286_v0 = vand.u32 3, %v1011_v23 }
 0x14f   : > { %v1006_v56 = vsel %vm5209_vm11, %v4849_v57, %v1003_v50  ;;  %v1088_v37 = vsub.s32 0, %v5279_v13  ;;  %v1174_v44 = vshll.u32 %v1134_v52, 8  ;;  %vm1024_vm1 = vcmp.lt.s32.totalorder %v5074_v45, 0 }
 0x150   : > { %4264 = vcosq.f32 %v1006_v56  ;;  %v1142_v24 = vshrl.u32 %v4453_v4, %v1141_v39  ;;  %vm1161_vm2 = vcmp.lt.s32.totalorder %v1139_v63, 4  ;;  %v1234_v58 = vshrl.u32 %v1233_v33, 23 }
 0x151   : > { %4266 = vsinq.f32 %v1006_v56  ;;  %v3941_v7 = vmin.u32 %v1088_v37, %v5279_v13  ;;  %vm1158_vm3 = vcmp.lt.s32.totalorder %v1139_v63, 1  ;;  %v1163_v49 = vsel %vm1161_vm2, %v1151_v3, 2102212464 }
 0x152   : > { %v1166_v53 = vsel %vm1158_vm3, %v1145_v43, %v1148_v6  ;;  %v1167_v46 = vsel %vm1161_vm2, %v1154_v51, 920167782  ;;  %v1170_v36 = vsel %vm1158_vm3, %v1148_v6, %v1151_v3  ;;  %v1171_v23 = vsel %vm1161_vm2, %v1157_v9, 1326507024 }
 0x153   : > { %vm5294_vm4 = vcmp.le.f32.partialorder %v1022_v1, 0.7853982  ;;  %v1090_v32 = vclz %v3941_v7  ;;  %vm1159_vm5 = vcmp.lt.s32.totalorder %v1139_v63, 2  ;;  %vm1160_vm6 = vcmp.lt.s32.totalorder %v1139_v63, 3 }
 0x154   : > { %v1162_v39 = vsel %vm1158_vm3, %v1142_v24, %v1145_v43  ;;  %v1164_v33 = vsel %vm1160_vm6, %v1148_v6, %v1163_v49  ;;  %v1168_v60 = vsel %vm1160_vm6, %v1151_v3, %v1167_v46  ;;  %v1172_v11 = vsel %vm1160_vm6, %v1154_v51, %v1171_v23 }
 0x155   : > { %v3948_v37 = vadd.s32 4294967169, %v1234_v58  ;;  %v3942_v2 = vadd.s32 4294967294, %v1090_v32  ;;  %v1108_v42 = vsub.s32 4, %v5261_v27  ;;  %v1169_v35 = vsel %vm1159_vm5, %v1166_v53, %v1168_v60 }
 0x156   : > { %v1173_v62 = vsel %vm1159_vm5, %v1170_v36, %v1172_v11  ;;  %v5302_v1 = vmul.u32.u64.low %v1174_v44, %v1169_v35  ;;  %v5303_v9 = vmul.u32.u64.high %v1174_v44, %v1169_v35, %v5302_v1  ;;  %vm1014_vm7 = vcmp.eq.s32.totalorder %v5286_v0, 0 }
 0x157   : > { %v5299_v48 = vmul.u32.u64.low %v1174_v44, %v1173_v62  ;;  %v5300_v50 = vmul.u32.u64.high %v1174_v44, %v1173_v62, %v5299_v48  ;;  %vm3943_vm8 = vcmp.lt.s32.totalorder %v3942_v2, 0  ;;  %v1165_v63 = vsel %vm1159_vm5, %v1162_v39, %v1164_v33 }
 0x158   : > { %v1240_v43 = vadd.s32 1, %v3948_v37  ;;  %vm1017_vm11 = vcmp.eq.s32.totalorder %v5286_v0, 2  ;;  %v1078_v3 = vadd.s32 %v5218_v41, %v5225_v16  ;;  %v1093_v6 = vsel %vm3943_vm8, 0, %v3942_v2 }
 0x159   : > { %v1230_v51 = vand.u32 2147483647, %v5082_v61  ;;  %v1094_v56 = vsub.s32 32, %v1093_v6  ;;  %v1098_v24 = vsub.s32 4294967266, %v1093_v6  ;;  %v1109_v58 = vsel %vm1024_vm1, %v1108_v42, %v5261_v27 }
 0x15a   : > { %vm1241_vm9 = vcmp.gt.s32.totalorder %v1240_v43, 0  ;;  %v4265_v7 = vpop.eup %4264  ;;  %v1181_v49 = vmul.u32 %v1174_v44, %v1165_v63  ;;  %vm1183_vm12 = vc.u32 %v5300_v50, %v5302_v1  ;;  %v1184_v53 = vadd.s32 1, %v5303_v9 }
 0x15b   : > { %v1242_v46 = vsel %vm1241_vm9, %v1240_v43, 0  ;;  %v4267_v36 = vpop.eup %4266  ;;  %v1018_v41 = vxor.u32 2147483648, %v4265_v7  ;;  %v1095_v16 = vshll.u32 %v5279_v13, %v1093_v6  ;;  %v1096_v23 = vshrl.u32 %v1078_v3, %v1094_v56  ;;  %v5330_v56 = vpop.permute.xlu1 %340 }
 0x15c   : > { %v1099_v32 = vadd.s32 127, %v1098_v24  ;;  %v1015_v39 = vxor.u32 2147483648, %v4267_v36  ;;  %v1111_v33 = vsel %vm5294_vm4, 0, %v1109_v58  ;;  %v1185_v27 = vsel %vm1183_vm12, %v1184_v53, %v5303_v9 }
 0x15d   : > { %v1244_v60 = vand.u32 31, %v1242_v46  ;;  %v1019_v44 = vsel %vm1017_vm11, %v1018_v41, %v4267_v36  ;;  %v1097_v11 = vor.u32 %v1096_v23, %v1095_v16  ;;  %v1186_v2 = vadd.s32 %v1185_v27, %v1181_v49 }
 0x15e   : > { %v1100_v37 = vshll.u32 %v1099_v32, 23  ;;  %vm1010_vm13 = vweird.f32 %v4849_v57  ;;  %vm1013_vm10 = vcmp.lt.s32.totalorder %v5286_v0, 2  ;;  %v1016_v13 = vsel %vm1014_vm7, %v4265_v7, %v1015_v39 }
 0x15f   : > { %v1245_v42 = vsub.s32 32, %v1244_v60  ;;  %v1020_v35 = vsel %vm1013_vm10, %v1016_v13, %v1019_v44  ;;  %v1115_v48 = vadd.s32 3, %v1111_v33  ;;  %v1187_v9 = vadd.s32 536870912, %v1186_v2 }
 0x160   : > { %v1101_v62 = vor.u32 4788187, %v1100_v37  ;;  %v1021_v63 = vsel %vm1010_vm13, nan, %v1020_v35  ;;  %v1104_v43 = vcvt.s32.f32 %v1097_v11  ;;  %v1237_v3 = vand.u32 8388607, %v1230_v51 }
 0x161   : > { %v1248_v6 = vshrl.u32 %v4454_v8, %v1245_v42  ;;  %v1188_v24 = vshrl.u32 %v1187_v9, 30  ;;  %v1251_v0 = vshrl.u32 %v4455_v10, %v1245_v42  ;;  %v1254_v58 = vshrl.u32 %v4456_v12, %v1245_v42  ;;  %2067 = vst [vmem:[%s4951_s10 + $0x28] sm:$0xff] %v1021_v63 }
 0x162   : > { %v1102_v57 = vand.u32 2147483647, %v1101_v62  ;;  %v1243_v7 = vshrl.u32 %v1242_v46, 5  ;;  %v1247_v49 = vshll.u32 %v4453_v4, %v1244_v60  ;;  %v1256_v53 = vshll.u32 %v4456_v12, %v1244_v60 }
 0x163   : > { %v1257_v36 = vshrl.u32 %v4457_v14, %v1245_v42  ;;  %v1189_v16 = vshll.u32 %v1188_v24, 30  ;;  %v1250_v23 = vshll.u32 %v4454_v8, %v1244_v60  ;;  %v1253_v32 = vshll.u32 %v4455_v10, %v1244_v60 }
 0x164   : > { %v1105_v41 = vmul.f32 %v1104_v43, %v1102_v57  ;;  %v5342_v39 = vadd.f32 %v5069_v17, %v5330_v56  ;;  %v1249_v33 = vor.u32 %v1248_v6, %v1247_v49  ;;  %v7389_v44 = vmov 1326507024  }
 0x165   : > { %v1258_v27 = vor.u32 %v1257_v36, %v1256_v53  ;;  %v1260_v46 = vshrl.u32 %v7389_v44, %v1245_v42  ;;  %vm1128_vm14 = vcmp.lt.s32.totalorder %v5078_v59, 0  ;;  %v5346_v37 = vsub.s32 %v1186_v2, %v1189_v16 }
 0x166   : > { %v1106_v11 = vxor.u32 2147483648, %v1105_v41  ;;  %v1252_v13 = vor.u32 %v1251_v0, %v1250_v23  ;;  %v1255_v35 = vor.u32 %v1254_v58, %v1253_v32  ;;  %v5348_v62 = vand.u32 3, %v1115_v48 }
 0x167   : > { %v1238_v9 = vor.u32 8388608, %v1237_v3  ;;  %v1259_v63 = vshll.u32 %v4457_v14, %v1244_v60  ;;  %v1337_v43 = vand.u32 2139095040, %v5277_v15  ;;  %v1192_v6 = vsub.s32 0, %v5346_v37 }
 0x168   : > { %v1107_v17 = vsel %vm1024_vm1, %v1106_v11, %v1105_v41  ;;  %vm1262_vm0 = vcmp.lt.s32.totalorder %v1243_v7, 1  ;;  %vm1265_vm15 = vcmp.lt.s32.totalorder %v1243_v7, 4  ;;  %vm1264_vm2 = vcmp.lt.s32.totalorder %v1243_v7, 3 }
 0x169   : > { %v1110_v2 = vsel %vm5294_vm4, %v5074_v45, %v1107_v17  ;;  %v1261_v57 = vor.u32 %v1260_v46, %v1259_v63  ;;  %v1271_v48 = vsel %vm1265_vm15, %v1258_v27, 920167782  ;;  %v3945_v60 = vmin.u32 %v1192_v6, %v5346_v37 }
 0x16a   : > { %4268 = vcosq.f32 %v1110_v2  ;;  %v1267_v3 = vsel %vm1265_vm15, %v1255_v35, 2102212464  ;;  %v1270_v0 = vsel %vm1262_vm0, %v1249_v33, %v1252_v13  ;;  %v1212_v58 = vsub.s32 4, %v1188_v24 }
 0x16b   : > { %4270 = vsinq.f32 %v1110_v2  ;;  %v1246_v49 = vshrl.u32 %v4453_v4, %v1245_v42  ;;  %v1272_v53 = vsel %vm1264_vm2, %v1255_v35, %v1271_v48  ;;  %v1194_v36 = vclz %v3945_v60 }
 0x16c   : > { %vm1263_vm1 = vcmp.lt.s32.totalorder %v1243_v7, 2  ;;  %v1274_v52 = vsel %vm1262_vm0, %v1252_v13, %v1255_v35  ;;  %v1278_v41 = vshll.u32 %v1238_v9, 8  ;;  %v1268_v23 = vsel %vm1264_vm2, %v1252_v13, %v1267_v3 }
 0x16d   : > { %v1266_v16 = vsel %vm1262_vm0, %v1246_v49, %v1249_v33  ;;  %v1273_v32 = vsel %vm1263_vm1, %v1270_v0, %v1272_v53  ;;  %v1275_v46 = vsel %vm1265_vm15, %v1261_v57, 1326507024  ;;  %v3946_v11 = vadd.s32 4294967294, %v1194_v36 }
 0x16e   : > { %v1276_v63 = vsel %vm1264_vm2, %v1258_v27, %v1275_v46  ;;  %v5370_v17 = vmul.u32.u64.low %v1278_v41, %v1273_v32  ;;  %v5371_v42 = vmul.u32.u64.high %v1278_v41, %v1273_v32, %v5370_v17  ;;  %v7390_v6 = vand.u32 2147483647, %v5078_v59 }
 0x16f   : > { %v1213_v33 = vsel %vm1128_vm14, %v1212_v58, %v1188_v24  ;;  %v1277_v13 = vsel %vm1263_vm1, %v1274_v52, %v1276_v63  ;;  %v1338_v9 = vshrl.u32 %v1337_v43, 23  ;;  %vm1117_vm4 = vcmp.lt.s32.totalorder %v5348_v62, 2 }
 0x170   : > { %vm5376_vm3 = vcmp.le.f32.partialorder %v7390_v6, 0.7853982  ;;  %vm3947_vm5 = vcmp.lt.s32.totalorder %v3946_v11, 0  ;;  %v1269_v27 = vsel %vm1263_vm1, %v1266_v16, %v1268_v23  ;;  %vm1118_vm6 = vcmp.eq.s32.totalorder %v5348_v62, 0 }
 0x171   : > { %v5385_v2 = vmul.u32.u64.low %v1278_v41, %v1277_v13  ;;  %v5386_v57 = vmul.u32.u64.high %v1278_v41, %v1277_v13, %v5385_v2  ;;  %v1197_v48 = vsel %vm3947_vm5, 0, %v3946_v11  ;;  %v1334_v60 = vand.u32 2147483647, %v5277_v15 }
 0x172   : > { %v3952_v3 = vadd.s32 4294967169, %v1338_v9  ;;  %v1182_v24 = vadd.s32 %v5302_v1, %v5300_v50  ;;  %v1198_v0 = vsub.s32 32, %v1197_v48  ;;  %v1202_v58 = vsub.s32 4294967266, %v1197_v48 }
 0x173   : > { %v1288_v43 = vadd.s32 1, %v5371_v42  ;;  %v1199_v49 = vshll.u32 %v5346_v37, %v1197_v48  ;;  %v1215_v7 = vsel %vm5376_vm3, 0, %v1213_v33  ;;  %v1285_v53 = vmul.u32 %v1278_v41, %v1269_v27 }
 0x174   : > { %v1344_v36 = vadd.s32 1, %v3952_v3  ;;  %v4269_v52 = vpop.eup %4268  ;;  %v1200_v16 = vshrl.u32 %v1182_v24, %v1198_v0  ;;  %v1203_v23 = vadd.s32 127, %v1202_v58  ;;  %vm1287_vm7 = vc.u32 %v5386_v57, %v5370_v17 }
 0x175   : > { %v1441_v32 = vand.u32 2139095040, %v5342_v39  ;;  %v4271_v50 = vpop.eup %4270  ;;  %vm1121_vm8 = vcmp.eq.s32.totalorder %v5348_v62, 2  ;;  %v1122_v1 = vxor.u32 2147483648, %v4269_v52  ;;  %v1289_v46 = vsel %vm1287_vm7, %v1288_v43, %v5371_v42 }
 0x176   : > { %vm1345_vm11 = vcmp.gt.s32.totalorder %v1344_v36, 0  ;;  %v1119_v37 = vxor.u32 2147483648, %v4271_v50  ;;  %v1201_v11 = vor.u32 %v1200_v16, %v1199_v49  ;;  %v1204_v63 = vshll.u32 %v1203_v23, 23 }
 0x177   : > { %v1290_v41 = vadd.s32 %v1289_v46, %v1285_v53  ;;  %v1123_v6 = vsel %vm1121_vm8, %v1122_v1, %v4271_v50  ;;  %v1219_v33 = vadd.s32 3, %v1215_v7  ;;  %v1341_v13 = vand.u32 8388607, %v1334_v60 }
 0x178   : > { %v1346_v9 = vsel %vm1345_vm11, %v1344_v36, 0  ;;  %v1120_v27 = vsel %vm1118_vm6, %v4269_v52, %v1119_v37  ;;  %v1205_v2 = vor.u32 4788187, %v1204_v63  ;;  %v1442_v3 = vshrl.u32 %v1441_v32, 23 }
 0x179   : > { %v1291_v48 = vadd.s32 536870912, %v1290_v41  ;;  %v5407_v42 = vadd.f32 %v5251_v55, %v5330_v56  ;;  %vm1114_vm9 = vweird.f32 %v5074_v45  ;;  %v1124_v24 = vsel %vm1117_vm4, %v1120_v27, %v1123_v6 }
 0x17a   : > { %v1348_v0 = vand.u32 31, %v1346_v9  ;;  %v1125_v58 = vsel %vm1114_vm9, nan, %v1124_v24  ;;  %v1206_v43 = vand.u32 2147483647, %v1205_v2  ;;  %v1208_v49 = vcvt.s32.f32 %v1201_v11 }
 0x17b   : > { %v5412_v7 = vshrl.u32 %v1291_v48, 30  ;;  %v5414_v53 = vand.u32 3, %v1219_v33  ;;  %v1342_v36 = vor.u32 8388608, %v1341_v13  ;;  %v1438_v16 = vand.u32 2147483647, %v5342_v39  ;;  %2068 = vst [vmem:[%s4951_s10 + $0x30] sm:$0xff] %v1125_v58 }
 0x17c   : > { %v1349_v52 = vsub.s32 32, %v1348_v0  ;;  %v1209_v55 = vmul.f32 %v1208_v49, %v1206_v43  ;;  %v1351_v45 = vshll.u32 %v4453_v4, %v1348_v0  ;;  %v3956_v62 = vadd.s32 4294967169, %v1442_v3 }
 0x17d   : > { %v1293_v23 = vshll.u32 %v5412_v7, 30  ;;  %v1354_v50 = vshll.u32 %v4454_v8, %v1348_v0  ;;  %v1357_v63 = vshll.u32 %v4455_v10, %v1348_v0  ;;  %v1347_v33 = vshrl.u32 %v1346_v9, 5 }
 0x17e   : > { %v1352_v32 = vshrl.u32 %v4454_v8, %v1349_v52  ;;  %v1355_v1 = vshrl.u32 %v4455_v10, %v1349_v52  ;;  %v1358_v46 = vshrl.u32 %v4456_v12, %v1349_v52  ;;  %v1210_v37 = vxor.u32 2147483648, %v1209_v55 }
 0x17f   : > { %v5424_v11 = vsub.s32 %v1290_v41, %v1293_v23  ;;  %v1361_v6 = vshrl.u32 %v4457_v14, %v1349_v52  ;;  %v1360_v27 = vshll.u32 %v4456_v12, %v1348_v0  ;;  %v5429_v2 = vshll.u32 %v1342_v36, 8 }
 0x180   : > { %v1353_v13 = vor.u32 %v1352_v32, %v1351_v45  ;;  %v1211_v48 = vsel %vm1128_vm14, %v1210_v37, %v1209_v55  ;;  %v1356_v24 = vor.u32 %v1355_v1, %v1354_v50  ;;  %v1359_v58 = vor.u32 %v1358_v46, %v1357_v63 }
 0x181   : > { %v1296_v3 = vsub.s32 0, %v5424_v11  ;;  %v1214_v41 = vsel %vm5376_vm3, %v5078_v59, %v1211_v48  ;;  %vm1232_vm12 = vcmp.lt.s32.totalorder %v5082_v61, 0  ;;  %v1362_v43 = vor.u32 %v1361_v6, %v1360_v27 }
 0x182   : > { %v1363_v9 = vshll.u32 %v4457_v14, %v1348_v0  ;;  %v1364_v49 = vshrl.u32 %v7389_v44, %v1349_v52  ;;  %4272 = vcosq.f32 %v1214_v41  ;;  %v5443_v55 = vand.u32 8388607, %v1438_v16 }
 0x183   : > { %v3949_v36 = vmin.u32 %v1296_v3, %v5424_v11  ;;  %v1448_v23 = vadd.s32 1, %v3956_v62  ;;  %4274 = vsinq.f32 %v1214_v41  ;;  %v1316_v45 = vsub.s32 4, %v5412_v7 }
 0x184   : > { %v1350_v35 = vshrl.u32 %v4453_v4, %v1349_v52  ;;  %v1365_v32 = vor.u32 %v1364_v49, %v1363_v9  ;;  %vm5449_vm13 = vcmp.le.f32.partialorder %v1230_v51, 0.7853982  ;;  %vm1366_vm10 = vcmp.lt.s32.totalorder %v1347_v33, 1 }
 0x185   : > { %v1298_v50 = vclz %v3949_v36  ;;  %vm1367_vm14 = vcmp.lt.s32.totalorder %v1347_v33, 2  ;;  %vm1369_vm0 = vcmp.lt.s32.totalorder %v1347_v33, 4  ;;  %vm1368_vm15 = vcmp.lt.s32.totalorder %v1347_v33, 3 }
 0x186   : > { %v1371_v1 = vsel %vm1369_vm0, %v1359_v58, 2102212464  ;;  %v1374_v46 = vsel %vm1366_vm10, %v1353_v13, %v1356_v24  ;;  %v1375_v62 = vsel %vm1369_vm0, %v1362_v43, 920167782  ;;  %vm1225_vm2 = vcmp.eq.s32.totalorder %v5414_v53, 2 }
 0x187   : > { %v3950_v37 = vadd.s32 4294967294, %v1298_v50  ;;  %v1370_v63 = vsel %vm1366_vm10, %v1350_v35, %v1353_v13  ;;  %v1376_v52 = vsel %vm1368_vm15, %v1359_v58, %v1375_v62  ;;  %v1378_v6 = vsel %vm1366_vm10, %v1356_v24, %v1359_v58 }
 0x188   : > { %vm1222_vm1 = vcmp.eq.s32.totalorder %v5414_v53, 0  ;;  %v1372_v51 = vsel %vm1368_vm15, %v1356_v24, %v1371_v1  ;;  %v1377_v27 = vsel %vm1367_vm14, %v1374_v46, %v1376_v52  ;;  %v1379_v48 = vsel %vm1369_vm0, %v1365_v32, 1326507024 }
 0x189   : > { %vm1449_vm3 = vcmp.gt.s32.totalorder %v1448_v23, 0  ;;  %vm1221_vm4 = vcmp.lt.s32.totalorder %v5414_v53, 2  ;;  %vm3951_vm5 = vcmp.lt.s32.totalorder %v3950_v37, 0  ;;  %v1380_v3 = vsel %vm1368_vm15, %v1362_v43, %v1379_v48 }
 0x18a   : > { %v5461_v41 = vmul.u32.u64.low %v5429_v2, %v1377_v27  ;;  %v5462_v9 = vmul.u32.u64.high %v5429_v2, %v1377_v27, %v5461_v41  ;;  %vm1218_vm6 = vweird.f32 %v5078_v59  ;;  %v1286_v13 = vadd.s32 %v5370_v17, %v5386_v57 }
 0x18b   : > { %v1301_v24 = vsel %vm3951_vm5, 0, %v3950_v37  ;;  %v1381_v58 = vsel %vm1367_vm14, %v1378_v6, %v1380_v3  ;;  %v1450_v49 = vsel %vm1449_vm3, %v1448_v23, 0  ;;  %v1317_v43 = vsel %vm1232_vm12, %v1316_v45, %v5412_v7 }
 0x18c   : > { %v1302_v36 = vsub.s32 32, %v1301_v24  ;;  %v1306_v35 = vsub.s32 4294967266, %v1301_v24  ;;  %v1373_v32 = vsel %vm1367_vm14, %v1370_v63, %v1372_v51  ;;  %v1446_v46 = vor.u32 8388608, %v5443_v55  ;;  %v4273_v17 = vpop.eup %4272 }
 0x18d   : > { %v5474_v50 = vmul.u32.u64.low %v5429_v2, %v1381_v58  ;;  %v5475_v1 = vmul.u32.u64.high %v5429_v2, %v1381_v58, %v5474_v50  ;;  %v1452_v62 = vand.u32 31, %v1450_v49  ;;  %v1303_v57 = vshll.u32 %v5424_v11, %v1301_v24  ;;  %v4275_v6 = vpop.eup %4274 }
 0x18e   : > { %v1304_v37 = vshrl.u32 %v1286_v13, %v1302_v36  ;;  %v1307_v23 = vadd.s32 127, %v1306_v35  ;;  %v1392_v52 = vadd.s32 1, %v5462_v9  ;;  %v1226_v27 = vxor.u32 2147483648, %v4273_v17 }
 0x18f   : > { %v1319_v7 = vsel %vm5449_vm13, 0, %v1317_v43  ;;  %v1389_v33 = vmul.u32 %v5429_v2, %v1373_v32  ;;  %v1453_v45 = vsub.s32 32, %v1452_v62  ;;  %v1223_v63 = vxor.u32 2147483648, %v4275_v6 }
 0x190   : > { %v1305_v51 = vor.u32 %v1304_v37, %v1303_v57  ;;  %v1308_v48 = vshll.u32 %v1307_v23, 23  ;;  %v5483_v55 = vshrl.u32 %v1450_v49, 5  ;;  %v1227_v11 = vsel %vm1225_vm2, %v1226_v27, %v4275_v6 }
 0x191   : > { %vm1391_vm7 = vc.u32 %v5475_v1, %v5461_v41  ;;  %v1455_v3 = vshll.u32 %v4453_v4, %v1452_v62  ;;  %v1458_v13 = vshll.u32 %v4454_v8, %v1452_v62  ;;  %v1224_v24 = vsel %vm1222_vm1, %v4273_v17, %v1223_v63 }
 0x192   : > { %v1309_v2 = vor.u32 4788187, %v1308_v48  ;;  %v1393_v58 = vsel %vm1391_vm7, %v1392_v52, %v5462_v9  ;;  %v1461_v49 = vshll.u32 %v4455_v10, %v1452_v62  ;;  %v1228_v36 = vsel %vm1221_vm4, %v1224_v24, %v1227_v11 }
 0x193   : > { %v1394_v35 = vadd.s32 %v1393_v58, %v1389_v33  ;;  %v1456_v43 = vshrl.u32 %v4454_v8, %v1453_v45  ;;  %v1459_v32 = vshrl.u32 %v4455_v10, %v1453_v45  ;;  %v1229_v50 = vsel %vm1218_vm6, nan, %v1228_v36 }
 0x194   : > { %v1310_v57 = vand.u32 2147483647, %v1309_v2  ;;  %v1312_v37 = vcvt.s32.f32 %v1305_v51  ;;  %v1462_v17 = vshrl.u32 %v4456_v12, %v1453_v45  ;;  %v1464_v9 = vshll.u32 %v4456_v12, %v1452_v62  ;;  %2069 = vst [vmem:[%s4951_s10 + $0x38] sm:$0xff] %v1229_v50 }
 0x195   : > { %v1395_v23 = vadd.s32 536870912, %v1394_v35  ;;  %v1457_v6 = vor.u32 %v1456_v43, %v1455_v3  ;;  %v1465_v52 = vshrl.u32 %v4457_v14, %v1453_v45  ;;  %vm1336_vm8 = vcmp.lt.s32.totalorder %v5277_v15, 0 }
 0x196   : > { %v1313_v53 = vmul.f32 %v1312_v37, %v1310_v57  ;;  %v1460_v27 = vor.u32 %v1459_v32, %v1458_v13  ;;  %v1467_v33 = vshll.u32 %v4457_v14, %v1452_v62  ;;  %v1468_v59 = vshrl.u32 %v7389_v44, %v1453_v45 }
 0x197   : > { %v1323_v63 = vadd.s32 3, %v1319_v7  ;;  %v1396_v48 = vshrl.u32 %v1395_v23, 30  ;;  %v1463_v51 = vor.u32 %v1462_v17, %v1461_v49  ;;  %v1466_v11 = vor.u32 %v1465_v52, %v1464_v9 }
 0x198   : > { %v1314_v24 = vxor.u32 2147483648, %v1313_v53  ;;  %v1469_v2 = vor.u32 %v1468_v59, %v1467_v33  ;;  %vm1470_vm11 = vcmp.lt.s32.totalorder %v5483_v55, 1  ;;  %v1486_v3 = vshll.u32 %v1446_v46, 8 }
 0x199   : > { %v1397_v58 = vshll.u32 %v1396_v48, 30  ;;  %v1454_v36 = vshrl.u32 %v4453_v4, %v1453_v45  ;;  %vm1471_vm9 = vcmp.lt.s32.totalorder %v5483_v55, 2  ;;  %vm1473_vm10 = vcmp.lt.s32.totalorder %v5483_v55, 4 }
 0x19a   : > { %v1315_v62 = vsel %vm1232_vm12, %v1314_v24, %v1313_v53  ;;  %vm1472_vm14 = vcmp.lt.s32.totalorder %v5483_v55, 3  ;;  %v1478_v7 = vsel %vm1470_vm11, %v1457_v6, %v1460_v27  ;;  %v1479_v13 = vsel %vm1473_vm10, %v1466_v11, 920167782 }
 0x19b   : > { %v1318_v46 = vsel %vm5449_vm13, %v5082_v61, %v1315_v62  ;;  %v5520_v49 = vsub.s32 %v1394_v35, %v1397_v58  ;;  %v1420_v45 = vsub.s32 4, %v1396_v48  ;;  %v1475_v43 = vsel %vm1473_vm10, %v1463_v51, 2102212464  ;;  %v5531_v35 = vpop.permute.xlu0 %345 }
 0x19c   : > { %4276 = vcosq.f32 %v1318_v46  ;;  %v1480_v32 = vsel %vm1472_vm14, %v1463_v51, %v1479_v13  ;;  %v1482_v50 = vsel %vm1470_vm11, %v1460_v27, %v1463_v51  ;;  %v1483_v57 = vsel %vm1473_vm10, %v1469_v2, 1326507024 }
 0x19d   : > { %4278 = vsinq.f32 %v1318_v46  ;;  %v1400_v37 = vsub.s32 0, %v5520_v49  ;;  %v1474_v17 = vsel %vm1470_vm11, %v1454_v36, %v1457_v6  ;;  %v1481_v0 = vsel %vm1471_vm9, %v1478_v7, %v1480_v32 }
 0x19e   : > { %v1476_v23 = vsel %vm1472_vm14, %v1460_v27, %v1475_v43  ;;  %v1484_v9 = vsel %vm1472_vm14, %v1466_v11, %v1483_v57  ;;  %v5537_v52 = vmul.u32.u64.low %v1486_v3, %v1481_v0  ;;  %v5538_v53 = vmul.u32.u64.high %v1486_v3, %v1481_v0, %v5537_v52 }
 0x19f   : > { %v1324_v33 = vand.u32 3, %v1323_v63  ;;  %v3953_v59 = vmin.u32 %v1400_v37, %v5520_v49  ;;  %v1421_v6 = vsel %vm1336_vm8, %v1420_v45, %v1396_v48  ;;  %v1485_v51 = vsel %vm1471_vm9, %v1482_v50, %v1484_v9 }
 0x1a0   : > { %v379_v24 = vmul.f32 %v4622_v29, %v4624_v30  ;;  %v5550_v27 = vmul.f32 %v4618_v28, %v4626_v31  ;;  %v5552_v11 = vmul.u32.u64.low %v1486_v3, %v1485_v51  ;;  %v5553_v2 = vmul.u32.u64.high %v1486_v3, %v1485_v51, %v5552_v11 }
 0x1a1   : > { %v5557_v63 = vadd.f32 %v5258_v40, %v5531_v35  ;;  %vm5561_vm12 = vcmp.le.f32.partialorder %v1334_v60, 0.7853982  ;;  %v1402_v58 = vclz %v3953_v59  ;;  %v1477_v36 = vsel %vm1471_vm9, %v1474_v17, %v1476_v23 }
 0x1a2   : > { %v1423_v28 = vsel %vm5561_vm12, 0, %v1421_v6  ;;  %v1496_v62 = vadd.s32 1, %v5538_v53  ;;  %v7370_v7 = vand.u32 2147483647, %v5407_v42  ;;  %v1545_v40 = vand.u32 2139095040, %v5407_v42 }
 0x1a3   : > { %vm1322_vm13 = vweird.f32 %v5082_v61  ;;  %vm1325_vm0 = vcmp.lt.s32.totalorder %v1324_v33, 2  ;;  %vm1326_vm15 = vcmp.eq.s32.totalorder %v1324_v33, 0  ;;  %v3954_v60 = vadd.s32 4294967294, %v1402_v58 }
 0x1a4   : > { %vm1329_vm2 = vcmp.eq.s32.totalorder %v1324_v33, 2  ;;  %v1493_v13 = vmul.u32 %v1486_v3, %v1477_v36  ;;  %vm1495_vm1 = vc.u32 %v5553_v2, %v5537_v52  ;;  %v1546_v55 = vshrl.u32 %v1545_v40, 23 }
 0x1a5   : > { %v1390_v46 = vadd.s32 %v5461_v41, %v5475_v1  ;;  %vm3955_vm3 = vcmp.lt.s32.totalorder %v3954_v60, 0  ;;  %v1427_v45 = vadd.s32 3, %v1423_v28  ;;  %v1497_v43 = vsel %vm1495_vm1, %v1496_v62, %v5538_v53 }
 0x1a6   : > { %v4277_v32 = vpop.eup %4276  ;;  %v1405_v50 = vsel %vm3955_vm3, 0, %v3954_v60  ;;  %v1498_v57 = vadd.s32 %v1497_v43, %v1493_v13  ;;  %v3960_v37 = vadd.s32 4294967169, %v1546_v55  ;;  %v1549_v17 = vand.u32 8388607, %v7370_v7 }
 0x1a7   : > { %v4279_v0 = vpop.eup %4278  ;;  %v1330_v3 = vxor.u32 2147483648, %v4277_v32  ;;  %v1406_v23 = vsub.s32 32, %v1405_v50  ;;  %v1410_v9 = vsub.s32 4294967266, %v1405_v50  ;;  %v1646_v59 = vand.u32 2147483647, %v5557_v63 }
 0x1a8   : > { %v1327_v6 = vxor.u32 2147483648, %v4279_v0  ;;  %v1499_v51 = vadd.s32 536870912, %v1498_v57  ;;  %v1552_v41 = vadd.s32 1, %v3960_v37  ;;  %v1649_v1 = vand.u32 2139095040, %v5557_v63 }
 0x1a9   : > { %v1331_v53 = vsel %vm1329_vm2, %v1330_v3, %v4279_v0  ;;  %v1407_v11 = vshll.u32 %v5520_v49, %v1405_v50  ;;  %v1408_v58 = vshrl.u32 %v1390_v46, %v1406_v23  ;;  %v1411_v36 = vadd.s32 127, %v1410_v9 }
 0x1aa   : > { %v1328_v28 = vsel %vm1326_vm15, %v4277_v32, %v1327_v6  ;;  %v1500_v62 = vshrl.u32 %v1499_v51, 30  ;;  %v1550_v40 = vor.u32 8388608, %v1549_v17  ;;  %vm1553_vm4 = vcmp.gt.s32.totalorder %v1552_v41, 0 }
 0x1ab   : > { %v1332_v60 = vsel %vm1325_vm0, %v1328_v28, %v1331_v53  ;;  %v1409_v13 = vor.u32 %v1408_v58, %v1407_v11  ;;  %v1412_v55 = vshll.u32 %v1411_v36, 23  ;;  %v1554_v43 = vsel %vm1553_vm4, %v1552_v41, 0 }
 0x1ac   : > { %v1333_v37 = vsel %vm1322_vm13, nan, %v1332_v60  ;;  %v1501_v7 = vshll.u32 %v1500_v62, 30  ;;  %v1524_v0 = vsub.s32 4, %v1500_v62  ;;  %v1650_v3 = vshrl.u32 %v1649_v1, 23 }
 0x1ad   : > { %v5589_v49 = vadd.f32 %v379_v24, %v5531_v35  ;;  %v1413_v46 = vor.u32 4788187, %v1412_v55  ;;  %vm1440_vm5 = vcmp.lt.s32.totalorder %v5342_v39, 0  ;;  %v1556_v32 = vand.u32 31, %v1554_v43  ;;  %2070 = vst [vmem:[%s4951_s10 + $0x40] sm:$0xff] %v1333_v37 }
 0x1ae   : > { %v5593_v50 = vand.u32 3, %v1427_v45  ;;  %v1494_v33 = vadd.s32 %v5537_v52, %v5553_v2  ;;  %v1502_v17 = vsub.s32 %v1498_v57, %v1501_v7  ;;  %v5597_v23 = vshll.u32 %v1550_v40, 8 }
 0x1af   : > { %v1414_v61 = vand.u32 2147483647, %v1413_v46  ;;  %v1416_v9 = vcvt.s32.f32 %v1409_v13  ;;  %v1557_v6 = vsub.s32 32, %v1556_v32  ;;  %v5601_v24 = vand.u32 8388607, %v1646_v59 }
 0x1b0   : > { %v1504_v51 = vsub.s32 0, %v1502_v17  ;;  %v5605_v41 = vsel %vm1440_vm5, %v1524_v0, %v1500_v62  ;;  %v1555_v45 = vshrl.u32 %v1554_v43, 5  ;;  %v3964_v1 = vadd.s32 4294967169, %v1650_v3 }
 0x1b1   : > { %v1417_v53 = vmul.f32 %v1416_v9, %v1414_v61  ;;  %v1559_v52 = vshll.u32 %v4453_v4, %v1556_v32  ;;  %v1560_v2 = vshrl.u32 %v4454_v8, %v1557_v6  ;;  %v1563_v7 = vshrl.u32 %v4455_v10, %v1557_v6 }
 0x1b2   : > { %v3957_v57 = vmin.u32 %v1504_v51, %v1502_v17  ;;  %v1562_v11 = vshll.u32 %v4454_v8, %v1556_v32  ;;  %v1565_v58 = vshll.u32 %v4455_v10, %v1556_v32  ;;  %v1566_v36 = vshrl.u32 %v4456_v12, %v1557_v6 }
 0x1b3   : > { %v1418_v28 = vxor.u32 2147483648, %v1417_v53  ;;  %v1561_v40 = vor.u32 %v1560_v2, %v1559_v52  ;;  %v1568_v62 = vshll.u32 %v4456_v12, %v1556_v32  ;;  %v1569_v60 = vshrl.u32 %v4457_v14, %v1557_v6 }
 0x1b4   : > { %v1506_v13 = vclz %v3957_v57  ;;  %v1558_v55 = vshrl.u32 %v4453_v4, %v1557_v6  ;;  %vm1574_vm6 = vcmp.lt.s32.totalorder %v1555_v45, 1  ;;  %vm1575_vm7 = vcmp.lt.s32.totalorder %v1555_v45, 2 }
 0x1b5   : > { %v1419_v43 = vsel %vm1336_vm8, %v1418_v28, %v1417_v53  ;;  %v1564_v37 = vor.u32 %v1563_v7, %v1562_v11  ;;  %v1567_v0 = vor.u32 %v1566_v36, %v1565_v58  ;;  %v1570_v3 = vor.u32 %v1569_v60, %v1568_v62 }
 0x1b6   : > { %v1422_v46 = vsel %vm5561_vm12, %v5277_v15, %v1419_v43  ;;  %v3958_v61 = vadd.s32 4294967294, %v1506_v13  ;;  %v1571_v9 = vshll.u32 %v4457_v14, %v1556_v32  ;;  %v1572_v51 = vshrl.u32 %v7389_v44, %v1557_v6 }
 0x1b7   : > { %4280 = vcosq.f32 %v1422_v46  ;;  %vm1576_vm11 = vcmp.lt.s32.totalorder %v1555_v45, 3  ;;  %vm1577_vm9 = vcmp.lt.s32.totalorder %v1555_v45, 4  ;;  %v1578_v52 = vsel %vm1574_vm6, %v1558_v55, %v1561_v40 }
 0x1b8   : > { %4282 = vsinq.f32 %v1422_v46  ;;  %vm3959_vm10 = vcmp.lt.s32.totalorder %v3958_v61, 0  ;;  %v1573_v53 = vor.u32 %v1572_v51, %v1571_v9  ;;  %v1579_v2 = vsel %vm1577_vm9, %v1567_v0, 2102212464 }
 0x1b9   : > { %v1509_v7 = vsel %vm3959_vm10, 0, %v3958_v61  ;;  %v1580_v57 = vsel %vm1576_vm11, %v1564_v37, %v1579_v2  ;;  %v1582_v48 = vsel %vm1574_vm6, %v1561_v40, %v1564_v37  ;;  %v1583_v11 = vsel %vm1577_vm9, %v1570_v3, 920167782 }
 0x1ba   : > { %v1510_v32 = vsub.s32 32, %v1509_v7  ;;  %v1511_v58 = vshll.u32 %v1502_v17, %v1509_v7  ;;  %v1514_v6 = vsub.s32 4294967266, %v1509_v7  ;;  %v1586_v36 = vsel %vm1574_vm6, %v1564_v37, %v1567_v0 }
 0x1bb   : > { %v1581_v28 = vsel %vm1575_vm7, %v1578_v52, %v1580_v57  ;;  %v1584_v62 = vsel %vm1576_vm11, %v1567_v0, %v1583_v11  ;;  %v1587_v60 = vsel %vm1577_vm9, %v1573_v53, 1326507024  ;;  %v1656_v13 = vadd.s32 1, %v3964_v1 }
 0x1bc   : > { %v1512_v55 = vshrl.u32 %v1494_v33, %v1510_v32  ;;  %v1515_v43 = vadd.s32 127, %v1514_v6  ;;  %v1585_v46 = vsel %vm1575_vm7, %v1582_v48, %v1584_v62  ;;  %v1588_v40 = vsel %vm1576_vm11, %v1570_v3, %v1587_v60 }
 0x1bd   : > { %v1589_v61 = vsel %vm1575_vm7, %v1586_v36, %v1588_v40  ;;  %v5636_v17 = vmul.u32.u64.low %v5597_v23, %v1585_v46  ;;  %v5637_v9 = vmul.u32.u64.high %v5597_v23, %v1585_v46, %v5636_v17  ;;  %vm1657_vm8 = vcmp.gt.s32.totalorder %v1656_v13, 0 }
 0x1be   : > { %v1513_v37 = vor.u32 %v1512_v55, %v1511_v58  ;;  %v1516_v51 = vshll.u32 %v1515_v43, 23  ;;  %v5641_v0 = vmul.u32.u64.low %v5597_v23, %v1589_v61  ;;  %v5642_v52 = vmul.u32.u64.high %v5597_v23, %v1589_v61, %v5641_v0 }
 0x1bf   : > { %vm1426_vm14 = vweird.f32 %v5277_v15  ;;  %vm1429_vm12 = vcmp.lt.s32.totalorder %v5593_v50, 2  ;;  %vm5648_vm13 = vcmp.le.f32.partialorder %v1438_v16, 0.7853982  ;;  %v1658_v45 = vsel %vm1657_vm8, %v1656_v13, 0 }
 0x1c0   : > { %vm1430_vm0 = vcmp.eq.s32.totalorder %v5593_v50, 0  ;;  %v1517_v1 = vor.u32 4788187, %v1516_v51  ;;  %v1527_v3 = vsel %vm5648_vm13, 0, %v5605_v41  ;;  %v1660_v53 = vand.u32 31, %v1658_v45 }
 0x1c1   : > { %v4281_v2 = vpop.eup %4280  ;;  %vm1433_vm15 = vcmp.eq.s32.totalorder %v5593_v50, 2  ;;  %v1597_v7 = vmul.u32 %v5597_v23, %v1581_v28  ;;  %v1600_v57 = vadd.s32 1, %v5637_v9  ;;  %v1654_v16 = vor.u32 8388608, %v5601_v24 }
 0x1c2   : > { %v4283_v48 = vpop.eup %4282  ;;  %v1434_v11 = vxor.u32 2147483648, %v4281_v2  ;;  %v1518_v32 = vand.u32 2147483647, %v1517_v1  ;;  %v1520_v58 = vcvt.s32.f32 %v1513_v37  ;;  %vm1599_vm2 = vc.u32 %v5642_v52, %v5636_v17 }
 0x1c3   : > { %v1431_v6 = vxor.u32 2147483648, %v4283_v48  ;;  %v1531_v36 = vadd.s32 3, %v1527_v3  ;;  %v1601_v41 = vsel %vm1599_vm2, %v1600_v57, %v5637_v9  ;;  %v1661_v62 = vsub.s32 32, %v1660_v53  ;;  %v5677_v3 = vpop.permute.xlu1 %350 }
 0x1c4   : > { %v1435_v60 = vsel %vm1433_vm15, %v1434_v11, %v4283_v48  ;;  %v1521_v13 = vmul.f32 %v1520_v58, %v1518_v32  ;;  %v1602_v55 = vadd.s32 %v1601_v41, %v1597_v7  ;;  %v5663_v23 = vshrl.u32 %v1658_v45, 5 }
 0x1c5   : > { %v1432_v24 = vsel %vm1430_vm0, %v4281_v2, %v1431_v6  ;;  %v1663_v28 = vshll.u32 %v4453_v4, %v1660_v53  ;;  %v1664_v43 = vshrl.u32 %v4454_v8, %v1661_v62  ;;  %v1667_v46 = vshrl.u32 %v4455_v10, %v1661_v62 }
 0x1c6   : > { %v1436_v40 = vsel %vm1429_vm12, %v1432_v24, %v1435_v60  ;;  %v1522_v61 = vxor.u32 2147483648, %v1521_v13  ;;  %v1603_v9 = vadd.s32 536870912, %v1602_v55  ;;  %v1666_v37 = vshll.u32 %v4454_v8, %v1660_v53 }
 0x1c7   : > { %v1437_v51 = vsel %vm1426_vm14, nan, %v1436_v40  ;;  %v1665_v0 = vor.u32 %v1664_v43, %v1663_v28  ;;  %v1669_v45 = vshll.u32 %v4455_v10, %v1660_v53  ;;  %v1670_v1 = vshrl.u32 %v4456_v12, %v1661_v62 }
 0x1c8   : > { %v1523_v2 = vsel %vm1440_vm5, %v1522_v61, %v1521_v13  ;;  %v1604_v7 = vshrl.u32 %v1603_v9, 30  ;;  %v1672_v50 = vshll.u32 %v4456_v12, %v1660_v53  ;;  %v1673_v57 = vshrl.u32 %v4457_v14, %v1661_v62  ;;  %2071 = vst [vmem:[%s4951_s10 + $0x48] sm:$0xff] %v1437_v51 }
 0x1c9   : > { %v1526_v15 = vsel %vm5648_vm13, %v5342_v39, %v1523_v2  ;;  %v1668_v48 = vor.u32 %v1667_v46, %v1666_v37  ;;  %v1675_v11 = vshll.u32 %v4457_v14, %v1660_v53  ;;  %v1676_v32 = vshrl.u32 %v7389_v44, %v1661_v62 }
 0x1ca   : > { %4284 = vcosq.f32 %v1526_v15  ;;  %v1605_v58 = vshll.u32 %v1604_v7, 30  ;;  %v1674_v6 = vor.u32 %v1673_v57, %v1672_v50  ;;  %v5691_v41 = vadd.f32 %v5550_v27, %v5677_v3 }
 0x1cb   : > { %4286 = vsinq.f32 %v1526_v15  ;;  %v1671_v60 = vor.u32 %v1670_v1, %v1669_v45  ;;  %v1677_v13 = vor.u32 %v1676_v32, %v1675_v11  ;;  %v1532_v24 = vand.u32 3, %v1531_v36 }
 0x1cc   : > { %v5693_v28 = vsub.s32 %v1602_v55, %v1605_v58  ;;  %vm1678_vm1 = vcmp.lt.s32.totalorder %v5663_v23, 1  ;;  %v1694_v33 = vshll.u32 %v1654_v16, 8  ;;  %v1662_v53 = vshrl.u32 %v4453_v4, %v1661_v62 }
 0x1cd   : > { %vm1681_vm3 = vcmp.lt.s32.totalorder %v5663_v23, 4  ;;  %v1686_v43 = vsel %vm1678_vm1, %v1665_v0, %v1668_v48  ;;  %v1753_v46 = vand.u32 2139095040, %v5589_v49  ;;  %vm1679_vm4 = vcmp.lt.s32.totalorder %v5663_v23, 2 }
 0x1ce   : > { %v1608_v27 = vsub.s32 0, %v5693_v28  ;;  %vm1680_vm5 = vcmp.lt.s32.totalorder %v5663_v23, 3  ;;  %v1687_v36 = vsel %vm1681_vm3, %v1674_v6, 920167782  ;;  %v1683_v55 = vsel %vm1681_vm3, %v1671_v60, 2102212464 }
 0x1cf   : > { %v1688_v16 = vsel %vm1680_vm5, %v1671_v60, %v1687_v36  ;;  %v1690_v62 = vsel %vm1678_vm1, %v1668_v48, %v1671_v60  ;;  %v1691_v40 = vsel %vm1681_vm3, %v1677_v13, 1326507024  ;;  %v1628_v9 = vsub.s32 4, %v1604_v7 }
 0x1d0   : > { %v3961_v61 = vmin.u32 %v1608_v27, %v5693_v28  ;;  %v1689_v37 = vsel %vm1679_vm4, %v1686_v43, %v1688_v16  ;;  %v1692_v51 = vsel %vm1680_vm5, %v1674_v6, %v1691_v40  ;;  %vm1530_vm6 = vweird.f32 %v5342_v39 }
 0x1d1   : > { %vm1544_vm7 = vcmp.lt.s32.totalorder %v5407_v42, 0  ;;  %v1693_v45 = vsel %vm1679_vm4, %v1690_v62, %v1692_v51  ;;  %v5717_v1 = vmul.u32.u64.low %v1694_v33, %v1689_v37  ;;  %v5718_v2 = vmul.u32.u64.high %v1694_v33, %v1689_v37, %v5717_v1 }
 0x1d2   : > { %v7399_v50 = vand.u32 2147483647, %v5407_v42  ;;  %v1610_v15 = vclz %v3961_v61  ;;  %v1682_v11 = vsel %vm1678_vm1, %v1662_v53, %v1665_v0  ;;  %v1684_v32 = vsel %vm1680_vm5, %v1668_v48, %v1683_v55 }
 0x1d3   : > { %vm1533_vm9 = vcmp.lt.s32.totalorder %v1532_v24, 2  ;;  %v5730_v58 = vmul.u32.u64.low %v1694_v33, %v1693_v45  ;;  %v5731_v6 = vmul.u32.u64.high %v1694_v33, %v1693_v45, %v5730_v58  ;;  %v1754_v60 = vshrl.u32 %v1753_v46, 23 }
 0x1d4   : > { %vm5722_vm11 = vcmp.le.f32.partialorder %v7399_v50, 0.7853982  ;;  %v4285_v13 = vpop.eup %4284  ;;  %vm1534_vm10 = vcmp.eq.s32.totalorder %v1532_v24, 0  ;;  %vm1537_vm8 = vcmp.eq.s32.totalorder %v1532_v24, 2  ;;  %v3962_v43 = vadd.s32 4294967294, %v1610_v15 }
 0x1d5   : > { %v1629_v27 = vsel %vm1544_vm7, %v1628_v9, %v1604_v7  ;;  %v4287_v36 = vpop.eup %4286  ;;  %v1538_v16 = vxor.u32 2147483648, %v4285_v13  ;;  %v1685_v0 = vsel %vm1679_vm4, %v1682_v11, %v1684_v32  ;;  %v1704_v53 = vadd.s32 1, %v5718_v2 }
 0x1d6   : > { %v3968_v48 = vadd.s32 4294967169, %v1754_v60  ;;  %v1535_v55 = vxor.u32 2147483648, %v4287_v36  ;;  %v1598_v62 = vadd.s32 %v5636_v17, %v5642_v52  ;;  %vm3963_vm14 = vcmp.lt.s32.totalorder %v3962_v43, 0 }
 0x1d7   : > { %v1750_v46 = vand.u32 2147483647, %v5589_v49  ;;  %v1539_v40 = vsel %vm1537_vm8, %v1538_v16, %v4287_v36  ;;  %v1613_v61 = vsel %vm3963_vm14, 0, %v3962_v43  ;;  %v1631_v7 = vsel %vm5722_vm11, 0, %v1629_v27 }
 0x1d8   : > { %vm1703_vm12 = vc.u32 %v5731_v6, %v5717_v1  ;;  %v1536_v23 = vsel %vm1534_vm10, %v4285_v13, %v1535_v55  ;;  %v1614_v9 = vsub.s32 32, %v1613_v61  ;;  %v1618_v37 = vsub.s32 4294967266, %v1613_v61 }
 0x1d9   : > { %v1701_v51 = vmul.u32 %v1694_v33, %v1685_v0  ;;  %v1540_v45 = vsel %vm1533_vm9, %v1536_v23, %v1539_v40  ;;  %v1615_v17 = vshll.u32 %v5693_v28, %v1613_v61  ;;  %v1705_v52 = vsel %vm1703_vm12, %v1704_v53, %v5718_v2 }
 0x1da   : > { %v1760_v50 = vadd.s32 1, %v3968_v48  ;;  %v1541_v15 = vsel %vm1530_vm6, nan, %v1540_v45  ;;  %v1616_v11 = vshrl.u32 %v1598_v62, %v1614_v9  ;;  %v1619_v32 = vadd.s32 127, %v1618_v37 }
 0x1db   : > { %v1706_v58 = vadd.s32 %v1705_v52, %v1701_v51  ;;  %v1635_v60 = vadd.s32 3, %v1631_v7  ;;  %v1757_v13 = vand.u32 8388607, %v1750_v46  ;;  %2072 = vst [vmem:[%s4951_s10 + $0x50] sm:$0xff] %v1541_v15  ;;  %v381_v28 = vmul.f32 %v4622_v29, %v4626_v31 }
 0x1dc   : > { %vm1761_vm13 = vcmp.gt.s32.totalorder %v1760_v50, 0  ;;  %v1617_v33 = vor.u32 %v1616_v11, %v1615_v17  ;;  %v1620_v24 = vshll.u32 %v1619_v32, 23  ;;  %v1857_v39 = vand.u32 2139095040, %v5691_v41 }
 0x1dd   : > { %v1707_v43 = vadd.s32 536870912, %v1706_v58  ;;  %v1762_v27 = vsel %vm1761_vm13, %v1760_v50, 0  ;;  %v5759_v0 = vadd.f32 %v381_v28, %v5677_v3  ;;  %v5761_v53 = vand.u32 3, %v1635_v60 }
 0x1de   : > { %v1764_v2 = vand.u32 31, %v1762_v27  ;;  %v1621_v36 = vor.u32 4788187, %v1620_v24  ;;  %v1758_v48 = vor.u32 8388608, %v1757_v13  ;;  %v1624_v40 = vcvt.s32.f32 %v1617_v33 }
 0x1df   : > { %v5756_v16 = vshrl.u32 %v1707_v43, 30  ;;  %v5764_v61 = vadd.s32 %v5717_v1, %v5731_v6  ;;  %v1858_v37 = vshrl.u32 %v1857_v39, 23  ;;  %v1763_v50 = vshrl.u32 %v1762_v27, 5 }
 0x1e0   : > { %v1765_v55 = vsub.s32 32, %v1764_v2  ;;  %v1622_v62 = vand.u32 2147483647, %v1621_v36  ;;  %v1767_v17 = vshll.u32 %v4453_v4, %v1764_v2  ;;  %v1770_v1 = vshll.u32 %v4454_v8, %v1764_v2 }
 0x1e1   : > { %v1709_v29 = vshll.u32 %v5756_v16, 30  ;;  %v1773_v6 = vshll.u32 %v4455_v10, %v1764_v2  ;;  %v5776_v15 = vshll.u32 %v1758_v48, 8  ;;  %v1776_v13 = vshll.u32 %v4456_v12, %v1764_v2 }
 0x1e2   : > { %v1768_v7 = vshrl.u32 %v4454_v8, %v1765_v55  ;;  %v1771_v23 = vshrl.u32 %v4455_v10, %v1765_v55  ;;  %v1774_v9 = vshrl.u32 %v4456_v12, %v1765_v55  ;;  %v1625_v51 = vmul.f32 %v1624_v40, %v1622_v62 }
 0x1e3   : > { %v5770_v45 = vsub.s32 %v1706_v58, %v1709_v29  ;;  %v1777_v52 = vshrl.u32 %v4457_v14, %v1765_v55  ;;  %vm1648_vm0 = vcmp.lt.s32.totalorder %v5557_v63, 0  ;;  %v1779_v24 = vshll.u32 %v4457_v14, %v1764_v2 }
 0x1e4   : > { %v1626_v11 = vxor.u32 2147483648, %v1625_v51  ;;  %v1769_v60 = vor.u32 %v1768_v7, %v1767_v17  ;;  %v1772_v58 = vor.u32 %v1771_v23, %v1770_v1  ;;  %v1775_v33 = vor.u32 %v1774_v9, %v1773_v6 }
 0x1e5   : > { %v1712_v32 = vsub.s32 0, %v5770_v45  ;;  %v1780_v43 = vshrl.u32 %v7389_v44, %v1765_v55  ;;  %v1778_v39 = vor.u32 %v1777_v52, %v1776_v13  ;;  %v3972_v36 = vadd.s32 4294967169, %v1858_v37 }
 0x1e6   : > { %v1627_v27 = vsel %vm1544_vm7, %v1626_v11, %v1625_v51  ;;  %v1732_v62 = vsub.s32 4, %v5756_v16  ;;  %v1766_v40 = vshrl.u32 %v4453_v4, %v1765_v55  ;;  %vm1782_vm15 = vcmp.lt.s32.totalorder %v1763_v50, 1 }
 0x1e7   : > { %v3965_v28 = vmin.u32 %v1712_v32, %v5770_v45  ;;  %v1630_v48 = vsel %vm5722_vm11, %v5407_v42, %v1627_v27  ;;  %v1781_v29 = vor.u32 %v1780_v43, %v1779_v24  ;;  %vm1785_vm2 = vcmp.lt.s32.totalorder %v1763_v50, 4 }
 0x1e8   : > { %4288 = vcosq.f32 %v1630_v48  ;;  %vm1783_vm1 = vcmp.lt.s32.totalorder %v1763_v50, 2  ;;  %v1787_v7 = vsel %vm1785_vm2, %v1775_v33, 2102212464  ;;  %v1790_v23 = vsel %vm1782_vm15, %v1769_v60, %v1772_v58 }
 0x1e9   : > { %v1714_v2 = vclz %v3965_v28  ;;  %4290 = vsinq.f32 %v1630_v48  ;;  %vm1784_vm3 = vcmp.lt.s32.totalorder %v1763_v50, 3  ;;  %v1791_v37 = vsel %vm1785_vm2, %v1778_v39, 920167782 }
 0x1ea   : > { %v1794_v51 = vsel %vm1782_vm15, %v1772_v58, %v1775_v33  ;;  %v1786_v17 = vsel %vm1782_vm15, %v1766_v40, %v1769_v60  ;;  %v1792_v57 = vsel %vm1784_vm3, %v1775_v33, %v1791_v37  ;;  %v1795_v52 = vsel %vm1785_vm2, %v1781_v29, 1326507024 }
 0x1eb   : > { %v3966_v9 = vadd.s32 4294967294, %v1714_v2  ;;  %v1864_v1 = vadd.s32 1, %v3972_v36  ;;  %v1788_v6 = vsel %vm1784_vm3, %v1772_v58, %v1787_v7  ;;  %v1793_v55 = vsel %vm1783_vm1, %v1790_v23, %v1792_v57 }
 0x1ec   : > { %v1796_v11 = vsel %vm1784_vm3, %v1778_v39, %v1795_v52  ;;  %v5794_v24 = vmul.u32.u64.low %v5776_v15, %v1793_v55  ;;  %v5795_v43 = vmul.u32.u64.high %v5776_v15, %v1793_v55, %v5794_v24  ;;  %v1733_v60 = vsel %vm1648_vm0, %v1732_v62, %v5756_v16 }
 0x1ed   : > { %vm3967_vm4 = vcmp.lt.s32.totalorder %v3966_v9, 0  ;;  %v1797_v13 = vsel %vm1783_vm1, %v1794_v51, %v1796_v11  ;;  %vm1865_vm5 = vcmp.gt.s32.totalorder %v1864_v1, 0  ;;  %vm1634_vm6 = vweird.f32 %v5407_v42 }
 0x1ee   : > { %v1717_v32 = vsel %vm3967_vm4, 0, %v3966_v9  ;;  %v1789_v58 = vsel %vm1783_vm1, %v1786_v17, %v1788_v6  ;;  %v5804_v33 = vmul.u32.u64.low %v5776_v15, %v1797_v13  ;;  %v5805_v39 = vmul.u32.u64.high %v5776_v15, %v1797_v13, %v5804_v33 }
 0x1ef   : > { %v1718_v27 = vsub.s32 32, %v1717_v32  ;;  %v1722_v28 = vsub.s32 4294967266, %v1717_v32  ;;  %v1866_v36 = vsel %vm1865_vm5, %v1864_v1, 0  ;;  %v1719_v48 = vshll.u32 %v5770_v45, %v1717_v32 }
 0x1f0   : > { %v1868_v2 = vand.u32 31, %v1866_v36  ;;  %vm1637_vm7 = vcmp.lt.s32.totalorder %v5761_v53, 2  ;;  %vm5812_vm11 = vcmp.le.f32.partialorder %v1646_v59, 0.7853982  ;;  %v1808_v50 = vadd.s32 1, %v5795_v43 }
 0x1f1   : > { %v1720_v40 = vshrl.u32 %v5764_v61, %v1718_v27  ;;  %v1723_v29 = vadd.s32 127, %v1722_v28  ;;  %v1854_v62 = vand.u32 2147483647, %v5691_v41  ;;  %vm1638_vm9 = vcmp.eq.s32.totalorder %v5761_v53, 0 }
 0x1f2   : > { %v4289_v7 = vpop.eup %4288  ;;  %v1735_v61 = vsel %vm5812_vm11, 0, %v1733_v60  ;;  %v1805_v51 = vmul.u32 %v5776_v15, %v1789_v58  ;;  %vm1807_vm10 = vc.u32 %v5805_v39, %v5794_v24  ;;  %v1869_v59 = vsub.s32 32, %v1868_v2 }
 0x1f3   : > { %v1721_v45 = vor.u32 %v1720_v40, %v1719_v48  ;;  %v1724_v23 = vshll.u32 %v1723_v29, 23  ;;  %v4291_v9 = vpop.eup %4290  ;;  %v1642_v37 = vxor.u32 2147483648, %v4289_v7  ;;  %vm1641_vm8 = vcmp.eq.s32.totalorder %v5761_v53, 2 }
 0x1f4   : > { %v1639_v17 = vxor.u32 2147483648, %v4291_v9  ;;  %v1809_v52 = vsel %vm1807_vm10, %v1808_v50, %v5795_v43  ;;  %v1739_v6 = vadd.s32 3, %v1735_v61  ;;  %v1861_v11 = vand.u32 8388607, %v1854_v62 }
 0x1f5   : > { %v1725_v57 = vor.u32 4788187, %v1724_v23  ;;  %v1643_v1 = vsel %vm1641_vm8, %v1642_v37, %v4291_v9  ;;  %v1810_v55 = vadd.s32 %v1809_v52, %v1805_v51  ;;  %v1728_v13 = vcvt.s32.f32 %v1721_v45 }
 0x1f6   : > { %v1640_v32 = vsel %vm1638_vm9, %v4289_v7, %v1639_v17  ;;  %v1867_v27 = vshrl.u32 %v1866_v36, 5  ;;  %v1872_v58 = vshrl.u32 %v4454_v8, %v1869_v59  ;;  %v1875_v43 = vshrl.u32 %v4455_v10, %v1869_v59 }
 0x1f7   : > { %v1726_v15 = vand.u32 2147483647, %v1725_v57  ;;  %v1644_v28 = vsel %vm1637_vm7, %v1640_v32, %v1643_v1  ;;  %v1811_v60 = vadd.s32 536870912, %v1810_v55  ;;  %v1871_v40 = vshll.u32 %v4453_v4, %v1868_v2 }
 0x1f8   : > { %v1645_v33 = vsel %vm1634_vm6, nan, %v1644_v28  ;;  %v1878_v29 = vshrl.u32 %v4456_v12, %v1869_v59  ;;  %v1874_v36 = vshll.u32 %v4454_v8, %v1868_v2  ;;  %v1877_v53 = vshll.u32 %v4455_v10, %v1868_v2 }
 0x1f9   : > { %v1729_v48 = vmul.f32 %v1728_v13, %v1726_v15  ;;  %v5838_v50 = vshrl.u32 %v1811_v60, 30  ;;  %v1881_v7 = vshrl.u32 %v4457_v14, %v1869_v59  ;;  %2073 = vst [vmem:[%s4951_s10 + $0x58] sm:$0xff] %v1645_v33  ;;  %v1880_v23 = vshll.u32 %v4456_v12, %v1868_v2 }
 0x1fa   : > { %v1883_v42 = vshll.u32 %v4457_v14, %v1868_v2  ;;  %v1884_v61 = vshrl.u32 %v7389_v44, %v1869_v59  ;;  %v1862_v37 = vor.u32 8388608, %v1861_v11  ;;  %v1873_v51 = vor.u32 %v1872_v58, %v1871_v40 }
 0x1fb   : > { %v1730_v45 = vxor.u32 2147483648, %v1729_v48  ;;  %v1813_v9 = vshll.u32 %v5838_v50, 30  ;;  %v1876_v17 = vor.u32 %v1875_v43, %v1874_v36  ;;  %v1879_v52 = vor.u32 %v1878_v29, %v1877_v53 }
 0x1fc   : > { %v1882_v1 = vor.u32 %v1881_v7, %v1880_v23  ;;  %v1885_v32 = vor.u32 %v1884_v61, %v1883_v42  ;;  %v5853_v13 = vand.u32 3, %v1739_v6  ;;  %v1961_v28 = vand.u32 2139095040, %v5759_v0 }
 0x1fd   : > { %v1731_v57 = vsel %vm1648_vm0, %v1730_v45, %v1729_v48  ;;  %v1814_v2 = vsub.s32 %v1810_v55, %v1813_v9  ;;  %v1870_v11 = vshrl.u32 %v4453_v4, %v1869_v59  ;;  %vm1886_vm14 = vcmp.lt.s32.totalorder %v1867_v27, 1 }
 0x1fe   : > { %v1734_v15 = vsel %vm5812_vm11, %v5557_v63, %v1731_v57  ;;  %vm1888_vm12 = vcmp.lt.s32.totalorder %v1867_v27, 3  ;;  %vm1889_vm13 = vcmp.lt.s32.totalorder %v1867_v27, 4  ;;  %v1894_v58 = vsel %vm1886_vm14, %v1873_v51, %v1876_v17 }
 0x1ff   : > { %4292 = vcosq.f32 %v1734_v15  ;;  %v1816_v60 = vsub.s32 0, %v1814_v2  ;;  %v1891_v43 = vsel %vm1889_vm13, %v1879_v52, 2102212464  ;;  %v1895_v33 = vsel %vm1889_vm13, %v1882_v1, 920167782 }
 0x200   : > { %4294 = vsinq.f32 %v1734_v15  ;;  %v1898_v16 = vsel %vm1886_vm14, %v1876_v17, %v1879_v52  ;;  %v1899_v48 = vsel %vm1889_vm13, %v1885_v32, 1326507024  ;;  %vm1887_vm0 = vcmp.lt.s32.totalorder %v1867_v27, 2 }
 0x201   : > { %v3969_v6 = vmin.u32 %v1816_v60, %v1814_v2  ;;  %v1896_v55 = vsel %vm1888_vm12, %v1879_v52, %v1895_v33  ;;  %v1900_v40 = vsel %vm1888_vm12, %v1882_v1, %v1899_v48  ;;  %v1902_v36 = vshll.u32 %v1862_v37, 8 }
 0x202   : > { %v1897_v59 = vsel %vm1887_vm0, %v1894_v58, %v1896_v55  ;;  %v1901_v29 = vsel %vm1887_vm0, %v1898_v16, %v1900_v40  ;;  %v1962_v53 = vshrl.u32 %v1961_v28, 23  ;;  %v1890_v45 = vsel %vm1886_vm14, %v1870_v11, %v1873_v51 }
 0x203   : > { %v1818_v7 = vclz %v3969_v6  ;;  %v1892_v23 = vsel %vm1888_vm12, %v1876_v17, %v1891_v43  ;;  %v5865_v42 = vmul.u32.u64.low %v1902_v36, %v1901_v29  ;;  %v5866_v61 = vmul.u32.u64.high %v1902_v36, %v1901_v29, %v5865_v42 }
 0x204   : > { %v5868_v9 = vmul.u32.u64.low %v1902_v36, %v1897_v59  ;;  %v5869_v57 = vmul.u32.u64.high %v1902_v36, %v1897_v59, %v5868_v9  ;;  %v3976_v1 = vadd.s32 4294967169, %v1962_v53  ;;  %vm1738_vm15 = vweird.f32 %v5557_v63 }
 0x205   : > { %v3970_v52 = vadd.s32 4294967294, %v1818_v7  ;;  %vm1742_vm2 = vcmp.eq.s32.totalorder %v5853_v13, 0  ;;  %v1893_v37 = vsel %vm1887_vm0, %v1890_v45, %v1892_v23  ;;  %vm1745_vm1 = vcmp.eq.s32.totalorder %v5853_v13, 2 }
 0x206   : > { %v1806_v51 = vadd.s32 %v5794_v24, %v5805_v39  ;;  %v1968_v17 = vadd.s32 1, %v3976_v1  ;;  %v1836_v28 = vsub.s32 4, %v5838_v50  ;;  %vm1911_vm4 = vc.u32 %v5866_v61, %v5868_v9 }
 0x207   : > { %vm3971_vm3 = vcmp.lt.s32.totalorder %v3970_v52, 0  ;;  %v1912_v11 = vadd.s32 1, %v5869_v57  ;;  %v1909_v33 = vmul.u32 %v1902_v36, %v1893_v37  ;;  %vm1741_vm6 = vcmp.lt.s32.totalorder %v5853_v13, 2 }
 0x208   : > { %v1821_v15 = vsel %vm3971_vm3, 0, %v3970_v52  ;;  %vm1969_vm5 = vcmp.gt.s32.totalorder %v1968_v17, 0  ;;  %v1958_v29 = vand.u32 2147483647, %v5759_v0  ;;  %vm1752_vm7 = vcmp.lt.s32.totalorder %v5589_v49, 0 }
 0x209   : > { %v4293_v32 = vpop.eup %4292  ;;  %v1822_v27 = vsub.s32 32, %v1821_v15  ;;  %v1826_v43 = vsub.s32 4294967266, %v1821_v15  ;;  %v1823_v48 = vshll.u32 %v1814_v2, %v1821_v15  ;;  %v1913_v24 = vsel %vm1911_vm4, %v1912_v11, %v5869_v57 }
 0x20a   : > { %v4295_v60 = vpop.eup %4294  ;;  %v1746_v58 = vxor.u32 2147483648, %v4293_v32  ;;  %v1914_v40 = vadd.s32 %v1913_v24, %v1909_v33  ;;  %v1970_v36 = vsel %vm1969_vm5, %v1968_v17, 0  ;;  %v1837_v52 = vsel %vm1752_vm7, %v1836_v28, %v5838_v50 }
 0x20b   : > { %v1743_v16 = vxor.u32 2147483648, %v4295_v60  ;;  %v1824_v6 = vshrl.u32 %v1806_v51, %v1822_v27  ;;  %v1827_v55 = vadd.s32 127, %v1826_v43  ;;  %v1972_v42 = vand.u32 31, %v1970_v36 }
 0x20c   : > { %v1747_v39 = vsel %vm1745_vm1, %v1746_v58, %v4295_v60  ;;  %v1915_v45 = vadd.s32 536870912, %v1914_v40  ;;  %v1965_v1 = vand.u32 8388607, %v1958_v29  ;;  %vm5902_vm11 = vcmp.le.f32.partialorder %v1750_v46, 0.7853982 }
 0x20d   : > { %v1744_v59 = vsel %vm1742_vm2, %v4293_v32, %v1743_v16  ;;  %v1825_v2 = vor.u32 %v1824_v6, %v1823_v48  ;;  %v1828_v7 = vshll.u32 %v1827_v55, 23  ;;  %v1973_v37 = vsub.s32 32, %v1972_v42 }
 0x20e   : > { %v1748_v53 = vsel %vm1741_vm6, %v1744_v59, %v1747_v39  ;;  %v5895_v13 = vshrl.u32 %v1915_v45, 30  ;;  %v1839_v50 = vsel %vm5902_vm11, 0, %v1837_v52  ;;  %v1975_v46 = vshll.u32 %v4453_v4, %v1972_v42 }
 0x20f   : > { %v1749_v23 = vsel %vm1738_vm15, nan, %v1748_v53  ;;  %v1829_v57 = vor.u32 4788187, %v1828_v7  ;;  %v1832_v17 = vcvt.s32.f32 %v1825_v2  ;;  %v1976_v15 = vshrl.u32 %v4454_v8, %v1973_v37 }
 0x210   : > { %2074 = vst [vmem:[%s4951_s10 + $0x60] sm:$0xff] %v1749_v23  ;;  %v1917_v32 = vshll.u32 %v5895_v13, 30  ;;  %v1979_v28 = vshrl.u32 %v4455_v10, %v1973_v37  ;;  %v1982_v11 = vshrl.u32 %v4456_v12, %v1973_v37  ;;  %v1985_v27 = vshrl.u32 %v4457_v14, %v1973_v37 }
 0x211   : > { %v1830_v51 = vand.u32 2147483647, %v1829_v57  ;;  %v1966_v43 = vor.u32 8388608, %v1965_v1  ;;  %v1971_v33 = vshrl.u32 %v1970_v36, 5  ;;  %v1978_v16 = vshll.u32 %v4454_v8, %v1972_v42 }
 0x212   : > { %v5912_v58 = vsub.s32 %v1914_v40, %v1917_v32  ;;  %v1981_v48 = vshll.u32 %v4455_v10, %v1972_v42  ;;  %v1977_v6 = vor.u32 %v1976_v15, %v1975_v46  ;;  %v1984_v55 = vshll.u32 %v4456_v12, %v1972_v42 }
 0x213   : > { %v1833_v60 = vmul.f32 %v1832_v17, %v1830_v51  ;;  %v1980_v59 = vor.u32 %v1979_v28, %v1978_v16  ;;  %v1987_v40 = vshll.u32 %v4457_v14, %v1972_v42  ;;  %v1988_v2 = vshrl.u32 %v7389_v44, %v1973_v37 }
 0x214   : > { %v1920_v39 = vsub.s32 0, %v5912_v58  ;;  %v1983_v53 = vor.u32 %v1982_v11, %v1981_v48  ;;  %v1986_v45 = vor.u32 %v1985_v27, %v1984_v55  ;;  %v1843_v57 = vadd.s32 3, %v1839_v50 }
 0x215   : > { %v1834_v24 = vxor.u32 2147483648, %v1833_v60  ;;  %v1989_v52 = vor.u32 %v1988_v2, %v1987_v40  ;;  %v2006_v1 = vshll.u32 %v1966_v43, 8  ;;  %vm1990_vm9 = vcmp.lt.s32.totalorder %v1971_v33, 1 }
 0x216   : > { %v3973_v36 = vmin.u32 %v1920_v39, %v5912_v58  ;;  %vm1993_vm10 = vcmp.lt.s32.totalorder %v1971_v33, 4  ;;  %v1974_v42 = vshrl.u32 %v4453_v4, %v1973_v37  ;;  %v1998_v32 = vsel %vm1990_vm9, %v1977_v6, %v1980_v59  ;;  %v354_v39 = vld [vmem:[%s254_s13] sm:$0x3] }
 0x217   : > { %v1835_v7 = vsel %vm1752_vm7, %v1834_v24, %v1833_v60  ;;  %v1995_v17 = vsel %vm1993_vm10, %v1983_v53, 2102212464  ;;  %vm1992_vm8 = vcmp.lt.s32.totalorder %v1971_v33, 3  ;;  %v1999_v28 = vsel %vm1993_vm10, %v1986_v45, 920167782 }
 0x218   : > { %v1838_v23 = vsel %vm5902_vm11, %v5589_v49, %v1835_v7  ;;  %v1922_v51 = vclz %v3973_v36  ;;  %v2002_v11 = vsel %vm1990_vm9, %v1980_v59, %v1983_v53  ;;  %vm1991_vm14 = vcmp.lt.s32.totalorder %v1971_v33, 2 }
 0x219   : > { %4296 = vcosq.f32 %v1838_v23  ;;  %v1994_v63 = vsel %vm1990_vm9, %v1974_v42, %v1977_v6  ;;  %v2000_v50 = vsel %vm1992_vm8, %v1983_v53, %v1999_v28  ;;  %v2003_v60 = vsel %vm1993_vm10, %v1989_v52, 1326507024 }
 0x21a   : > { %4298 = vsinq.f32 %v1838_v23  ;;  %v3974_v15 = vadd.s32 4294967294, %v1922_v51  ;;  %v1996_v46 = vsel %vm1992_vm8, %v1980_v59, %v1995_v17  ;;  %v2001_v27 = vsel %vm1991_vm14, %v1998_v32, %v2000_v50 }
 0x21b   : > { %v2004_v37 = vsel %vm1992_vm8, %v1986_v45, %v2003_v60  ;;  %v5936_v48 = vmul.u32.u64.low %v2006_v1, %v2001_v27  ;;  %v5937_v24 = vmul.u32.u64.high %v2006_v1, %v2001_v27, %v5936_v48  ;;  %v1844_v55 = vand.u32 3, %v1843_v57 }
 0x21c   : > { %vm3975_vm12 = vcmp.lt.s32.totalorder %v3974_v15, 0  ;;  %v2005_v16 = vsel %vm1991_vm14, %v2002_v11, %v2004_v37  ;;  %v1910_v40 = vadd.s32 %v5868_v9, %v5866_v61  ;;  %v1997_v23 = vsel %vm1991_vm14, %v1994_v63, %v1996_v46 }
 0x21d   : > { %v1925_v43 = vsel %vm3975_vm12, 0, %v3974_v15  ;;  %v5942_v2 = vmul.u32.u64.low %v2006_v1, %v2005_v16  ;;  %v5943_v7 = vmul.u32.u64.high %v2006_v1, %v2005_v16, %v5942_v2  ;;  %vm1842_vm13 = vweird.f32 %v5589_v49 }
 0x21e   : > { %v1926_v6 = vsub.s32 32, %v1925_v43  ;;  %v1930_v53 = vsub.s32 4294967266, %v1925_v43  ;;  %v1927_v59 = vshll.u32 %v5912_v58, %v1925_v43  ;;  %v2016_v52 = vadd.s32 1, %v5937_v24 }
 0x21f   : > { %v7406_v57 = vsub.s32 0, %v4599_v20  ;;  %vm1845_vm0 = vcmp.lt.s32.totalorder %v1844_v55, 2  ;;  %vm1856_vm15 = vcmp.lt.s32.totalorder %v5691_v41, 0  ;;  %v1940_v32 = vsub.s32 4, %v5895_v13 }
 0x220   : > { %v1928_v36 = vshrl.u32 %v1910_v40, %v1926_v6  ;;  %v1931_v45 = vadd.s32 127, %v1930_v53  ;;  %v2013_v33 = vmul.u32 %v2006_v1, %v1997_v23  ;;  %vm2015_vm2 = vc.u32 %v5943_v7, %v5936_v48 }
 0x221   : > { %v5951_v51 = vrot.slane %v354_v39, %v7406_v57  ;;  %vm1849_vm1 = vcmp.eq.s32.totalorder %v1844_v55, 2  ;;  %v2017_v11 = vsel %vm2015_vm2, %v2016_v52, %v5937_v24  ;;  %vm1846_vm3 = vcmp.eq.s32.totalorder %v1844_v55, 0 }
 0x222   : > { %v1929_v9 = vor.u32 %v1928_v36, %v1927_v59  ;;  %v1932_v42 = vshll.u32 %v1931_v45, 23  ;;  %v2018_v50 = vadd.s32 %v2017_v11, %v2013_v33  ;;  %v7407_v1 = vsub.s32 1, %v4599_v20 }
 0x223   : > { %v4297_v61 = vpop.eup %4296  ;;  %v2089_v60 = vmul.f32 %v5951_v51, %v4596_v19  ;;  %v1941_v24 = vsel %vm1856_vm15, %v1940_v32, %v5895_v13  ;;  %vm1855_vm4 = vcmp.le.f32.partialorder %v1854_v62, 0.7853982  ;;  %vm1960_vm5 = vcmp.lt.s32.totalorder %v5759_v0, 0 }
 0x224   : > { %v4299_v17 = vpop.eup %4298  ;;  %v1850_v58 = vxor.u32 2147483648, %v4297_v61  ;;  %v1933_v28 = vor.u32 4788187, %v1932_v42  ;;  %v1936_v37 = vcvt.s32.f32 %v1929_v9  ;;  %v5962_v43 = vrot.slane %v354_v39, %v7407_v1 }
 0x225   : > { %v1847_v15 = vxor.u32 2147483648, %v4299_v17  ;;  %v2019_v40 = vadd.s32 536870912, %v2018_v50  ;;  %v5969_v6 = vadd.f32 %v2089_v60, %v4632_v34  ;;  %v1943_v55 = vsel %vm1855_vm4, 0, %v1941_v24 }
 0x226   : > { %v1851_v63 = vsel %vm1849_vm1, %v1850_v58, %v4299_v17  ;;  %v1934_v27 = vand.u32 2147483647, %v1933_v28  ;;  %v2090_v59 = vmul.f32 %v5962_v43, %v4596_v19  ;;  %v1947_v57 = vadd.s32 3, %v1943_v55 }
 0x227   : > { %v1848_v46 = vsel %vm1846_vm3, %v4297_v61, %v1847_v15  ;;  %v2020_v20 = vshrl.u32 %v2019_v40, 30  ;;  %v7372_v13 = vand.u32 2147483647, %v5969_v6  ;;  %v2124_v52 = vand.u32 2139095040, %v5969_v6 }
 0x228   : > { %v1852_v16 = vsel %vm1845_vm0, %v1848_v46, %v1851_v63  ;;  %v1937_v2 = vmul.f32 %v1936_v37, %v1934_v27  ;;  %v5982_v49 = vadd.f32 %v2090_v59, %v4632_v34  ;;  %v2091_v34 = vmul.f32 %v5951_v51, %v4603_v22 }
 0x229   : > { %v1853_v53 = vsel %vm1842_vm13, nan, %v1852_v16  ;;  %v2021_v36 = vshll.u32 %v2020_v20, 30  ;;  %v2044_v23 = vsub.s32 4, %v2020_v20  ;;  %v2125_v9 = vshrl.u32 %v2124_v52, 23 }
 0x22a   : > { %2075 = vst [vmem:[%s4951_s10 + $0x68] sm:$0xff] %v1853_v53  ;;  %v1938_v39 = vxor.u32 2147483648, %v1937_v2  ;;  %v2128_v42 = vand.u32 8388607, %v7372_v13  ;;  %v2228_v32 = vand.u32 2139095040, %v5982_v49  ;;  %v1948_v33 = vand.u32 3, %v1947_v57 }
 0x22b   : > { %v2022_v61 = vsub.s32 %v2018_v50, %v2021_v36  ;;  %v2045_v17 = vsel %vm1960_vm5, %v2044_v23, %v2020_v20  ;;  %v3980_v58 = vadd.s32 4294967169, %v2125_v9  ;;  %vm5996_vm6 = vcmp.le.f32.partialorder %v1958_v29, 0.7853982 }
 0x22c   : > { %v1939_v45 = vsel %vm1856_vm15, %v1938_v39, %v1937_v2  ;;  %v6001_v11 = vadd.f32 %v2091_v34, %v4641_v38  ;;  %v2229_v50 = vshrl.u32 %v2228_v32, 23  ;;  %v2047_v46 = vsel %vm5996_vm6, 0, %v2045_v17 }
 0x22d   : > { %v1942_v62 = vsel %vm1855_vm4, %v5691_v41, %v1939_v45  ;;  %v2024_v19 = vsub.s32 0, %v2022_v61  ;;  %v2131_v63 = vadd.s32 1, %v3980_v58  ;;  %v2129_v27 = vor.u32 8388608, %v2128_v42 }
 0x22e   : > { %4300 = vcosq.f32 %v1942_v62  ;;  %v7371_v37 = vand.u32 2147483647, %v5982_v49  ;;  %v6008_v1 = vmul.f32 %v5962_v43, %v4603_v22  ;;  %v6012_v29 = vmul.f32 %v5951_v51, %v4594_v18 }
 0x22f   : > { %4302 = vsinq.f32 %v1942_v62  ;;  %v3977_v15 = vmin.u32 %v2024_v19, %v2022_v61  ;;  %vm2132_vm7 = vcmp.gt.s32.totalorder %v2131_v63, 0  ;;  %v3984_v16 = vadd.s32 4294967169, %v2229_v50 }
 0x230   : > { %vm1946_vm11 = vweird.f32 %v5691_v41  ;;  %vm1949_vm9 = vcmp.lt.s32.totalorder %v1948_v33, 2  ;;  %vm1950_vm10 = vcmp.eq.s32.totalorder %v1948_v33, 0  ;;  %v2133_v40 = vsel %vm2132_vm7, %v2131_v63, 0 }
 0x231   : > { %v2026_v60 = vclz %v3977_v15  ;;  %vm1953_vm8 = vcmp.eq.s32.totalorder %v1948_v33, 2  ;;  %v2014_v53 = vadd.s32 %v5936_v48, %v5943_v7  ;;  %v6017_v2 = vadd.s32 3, %v2047_v46 }
 0x232   : > { %v2135_v22 = vand.u32 31, %v2133_v40  ;;  %v6019_v20 = vshll.u32 %v2129_v27, 8  ;;  %v6023_v39 = vand.u32 8388607, %v7371_v37  ;;  %v2332_v55 = vand.u32 2139095040, %v6001_v11 }
 0x233   : > { %v3978_v24 = vadd.s32 4294967294, %v2026_v60  ;;  %v6026_v45 = vshrl.u32 %v2133_v40, 5  ;;  %v2235_v52 = vadd.s32 1, %v3984_v16 }
 0x234   : > { %v2136_v23 = vsub.s32 32, %v2135_v22  ;;  %v2138_v9 = vshll.u32 %v4453_v4, %v2135_v22  ;;  %v2141_v17 = vshll.u32 %v4454_v8, %v2135_v22  ;;  %v2144_v46 = vshll.u32 %v4455_v10, %v2135_v22 }
 0x235   : > { %vm3979_vm14 = vcmp.lt.s32.totalorder %v3978_v24, 0  ;;  %vm2153_vm12 = vcmp.lt.s32.totalorder %v6026_v45, 1  ;;  %vm2156_vm13 = vcmp.lt.s32.totalorder %v6026_v45, 4  ;;  %vm2154_vm0 = vcmp.lt.s32.totalorder %v6026_v45, 2 }
 0x236   : > { %v2029_v36 = vsel %vm3979_vm14, 0, %v3978_v24  ;;  %v2139_v42 = vshrl.u32 %v4454_v8, %v2136_v23  ;;  %v2142_v34 = vshrl.u32 %v4455_v10, %v2136_v23  ;;  %v2145_v27 = vshrl.u32 %v4456_v12, %v2136_v23 }
 0x237   : > { %v2030_v7 = vsub.s32 32, %v2029_v36  ;;  %v2034_v57 = vsub.s32 4294967266, %v2029_v36  ;;  %v2031_v32 = vshll.u32 %v2022_v61, %v2029_v36  ;;  %v2147_v61 = vshll.u32 %v4456_v12, %v2135_v22 }
 0x238   : > { %v4301_v59 = vpop.eup %4300  ;;  %v2140_v60 = vor.u32 %v2139_v42, %v2138_v9  ;;  %v2143_v37 = vor.u32 %v2142_v34, %v2141_v17  ;;  %v2151_v33 = vshrl.u32 %v7389_v44, %v2136_v23  ;;  %vm2155_vm15 = vcmp.lt.s32.totalorder %v6026_v45, 3 }
 0x239   : > { %v4303_v62 = vpop.eup %4302  ;;  %v1954_v48 = vxor.u32 2147483648, %v4301_v59  ;;  %v2032_v15 = vshrl.u32 %v2014_v53, %v2030_v7  ;;  %v2035_v63 = vadd.s32 127, %v2034_v57  ;;  %v2148_v53 = vshrl.u32 %v4457_v14, %v2136_v23 }
 0x23a   : > { %v1951_v19 = vxor.u32 2147483648, %v4303_v62  ;;  %vm2236_vm2 = vcmp.gt.s32.totalorder %v2235_v52, 0  ;;  %v2329_v45 = vand.u32 2147483647, %v6001_v11  ;;  %vm2123_vm14 = vcmp.lt.s32.totalorder %v5969_v6, 0 }
 0x23b   : > { %v1955_v58 = vsel %vm1953_vm8, %v1954_v48, %v4303_v62  ;;  %v2033_v24 = vor.u32 %v2032_v15, %v2031_v32  ;;  %v2036_v40 = vshll.u32 %v2035_v63, 23  ;;  %v2146_v62 = vor.u32 %v2145_v27, %v2144_v46 }
 0x23c   : > { %v1952_v50 = vsel %vm1950_vm10, %v4301_v59, %v1951_v19  ;;  %v2137_v59 = vshrl.u32 %v4453_v4, %v2136_v23  ;;  %v2150_v48 = vshll.u32 %v4457_v14, %v2135_v22  ;;  %v2149_v57 = vor.u32 %v2148_v53, %v2147_v61 }
 0x23d   : > { %v1956_v16 = vsel %vm1949_vm9, %v1952_v50, %v1955_v58  ;;  %v2037_v36 = vor.u32 4788187, %v2036_v40  ;;  %v2040_v7 = vcvt.s32.f32 %v2033_v24  ;;  %v2158_v19 = vsel %vm2156_vm13, %v2146_v62, 2102212464 }
 0x23e   : > { %v1957_v13 = vsel %vm1946_vm11, nan, %v1956_v16  ;;  %v2152_v9 = vor.u32 %v2151_v33, %v2150_v48  ;;  %v2162_v42 = vsel %vm2156_vm13, %v2149_v57, 920167782  ;;  %v2165_v17 = vsel %vm2153_vm12, %v2143_v37, %v2146_v62 }
 0x23f   : > { %2076 = vst [vmem:[%s4951_s10 + $0x70] sm:$0xff] %v1957_v13  ;;  %v2038_v41 = vand.u32 2147483647, %v2037_v36  ;;  %v2161_v13 = vsel %vm2153_vm12, %v2140_v60, %v2143_v37  ;;  %v2157_v22 = vsel %vm2153_vm12, %v2137_v59, %v2140_v60  ;;  %v2163_v58 = vsel %vm2155_vm15, %v2146_v62, %v2162_v42 }
 0x240   : > { %v2166_v23 = vsel %vm2156_vm13, %v2152_v9, 1326507024  ;;  %v2159_v32 = vsel %vm2155_vm15, %v2143_v37, %v2158_v19  ;;  %v2164_v15 = vsel %vm2154_vm0, %v2161_v13, %v2163_v58  ;;  %v2237_v40 = vsel %vm2236_vm2, %v2235_v52, 0 }
 0x241   : > { %v2041_v34 = vmul.f32 %v2040_v7, %v2038_v41  ;;  %v2167_v63 = vsel %vm2155_vm15, %v2149_v57, %v2166_v23  ;;  %v6054_v27 = vmul.u32.u64.low %v6019_v20, %v2164_v15  ;;  %v6055_v16 = vmul.u32.u64.high %v6019_v20, %v2164_v15, %v6054_v27 }
 0x242   : > { %v2168_v46 = vsel %vm2154_vm0, %v2165_v17, %v2167_v63  ;;  %v2333_v37 = vshrl.u32 %v2332_v55, 23  ;;  %v6066_v61 = vmul.f32 %v5962_v43, %v4594_v18  ;;  %v2160_v53 = vsel %vm2154_vm0, %v2157_v22, %v2159_v32 }
 0x243   : > { %v2042_v50 = vxor.u32 2147483648, %v2041_v34  ;;  %v6059_v24 = vmul.u32.u64.low %v6019_v20, %v2168_v46  ;;  %v6060_v60 = vmul.u32.u64.high %v6019_v20, %v2168_v46, %v6059_v24  ;;  %v2239_v36 = vand.u32 31, %v2237_v40 }
 0x244   : > { %v6074_v48 = vand.u32 3, %v6017_v2  ;;  %v6078_v55 = vmul.f32 %v5951_v51, %v4601_v21  ;;  %v2233_v52 = vor.u32 8388608, %v6023_v39  ;;  %v2179_v18 = vadd.s32 1, %v6055_v16 }
 0x245   : > { %v2043_v62 = vsel %vm1960_vm5, %v2042_v50, %v2041_v34  ;;  %v2240_v33 = vsub.s32 32, %v2239_v36  ;;  %v2176_v7 = vmul.u32 %v6019_v20, %v2160_v53  ;;  %vm2178_vm1 = vc.u32 %v6060_v60, %v6054_v27 }
 0x246   : > { %v2046_v59 = vsel %vm5996_vm6, %v5759_v0, %v2043_v62  ;;  %v3988_v28 = vadd.s32 4294967169, %v2333_v37  ;;  %v2180_v2 = vsel %vm2178_vm1, %v2179_v18, %v6055_v16  ;;  %v2245_v41 = vshll.u32 %v4454_v8, %v2239_v36 }
 0x247   : > { %4304 = vcosq.f32 %v2046_v59  ;;  %v2243_v57 = vshrl.u32 %v4454_v8, %v2240_v33  ;;  %v2246_v39 = vshrl.u32 %v4455_v10, %v2240_v33  ;;  %v2181_v9 = vadd.s32 %v2180_v2, %v2176_v7 }
 0x248   : > { %4306 = vsinq.f32 %v2046_v59  ;;  %v2238_v19 = vshrl.u32 %v2237_v40, 5  ;;  %v2248_v13 = vshll.u32 %v4455_v10, %v2239_v36  ;;  %v2249_v42 = vshrl.u32 %v4456_v12, %v2240_v33 }
 0x249   : > { %vm2057_vm3 = vcmp.eq.s32.totalorder %v6074_v48, 2  ;;  %v2242_v20 = vshll.u32 %v4453_v4, %v2239_v36  ;;  %v2247_v17 = vor.u32 %v2246_v39, %v2245_v41  ;;  %v2251_v34 = vshll.u32 %v4456_v12, %v2239_v36 }
 0x24a   : > { %v2252_v22 = vshrl.u32 %v4457_v14, %v2240_v33  ;;  %vm2054_vm4 = vcmp.eq.s32.totalorder %v6074_v48, 0  ;;  %v2182_v58 = vadd.s32 536870912, %v2181_v9  ;;  %v2250_v23 = vor.u32 %v2249_v42, %v2248_v13 }
 0x24b   : > { %v2254_v32 = vshll.u32 %v4457_v14, %v2239_v36  ;;  %v2255_v15 = vshrl.u32 %v7389_v44, %v2240_v33  ;;  %vm2053_vm5 = vcmp.lt.s32.totalorder %v6074_v48, 2  ;;  %v2244_v63 = vor.u32 %v2243_v57, %v2242_v20 }
 0x24c   : > { %v2253_v50 = vor.u32 %v2252_v22, %v2251_v34  ;;  %v6100_v46 = vshll.u32 %v2233_v52, 8  ;;  %v2339_v16 = vadd.s32 1, %v3988_v28  ;;  %vm2050_vm6 = vweird.f32 %v5759_v0 }
 0x24d   : > { %v2183_v24 = vshrl.u32 %v2182_v58, 30  ;;  %v2256_v40 = vor.u32 %v2255_v15, %v2254_v32  ;;  %vm2260_vm7 = vcmp.lt.s32.totalorder %v2238_v19, 4  ;;  %v6105_v37 = vand.u32 8388607, %v2329_v45 }
 0x24e   : > { %v2241_v62 = vshrl.u32 %v4453_v4, %v2240_v33  ;;  %vm2257_vm11 = vcmp.lt.s32.totalorder %v2238_v19, 1  ;;  %vm2258_vm9 = vcmp.lt.s32.totalorder %v2238_v19, 2  ;;  %v2266_v53 = vsel %vm2260_vm7, %v2253_v50, 920167782 }
 0x24f   : > { %v2184_v36 = vshll.u32 %v2183_v24, 30  ;;  %vm2259_vm10 = vcmp.lt.s32.totalorder %v2238_v19, 3  ;;  %v2262_v59 = vsel %vm2260_vm7, %v2250_v23, 2102212464  ;;  %v2269_v52 = vsel %vm2257_vm11, %v2247_v17, %v2250_v23 }
 0x250   : > { %v2265_v7 = vsel %vm2257_vm11, %v2244_v63, %v2247_v17  ;;  %v2267_v28 = vsel %vm2259_vm10, %v2250_v23, %v2266_v53  ;;  %v2270_v2 = vsel %vm2260_vm7, %v2256_v40, 1326507024  ;;  %vm2340_vm8 = vcmp.gt.s32.totalorder %v2339_v16, 0 }
 0x251   : > { %v4305_v18 = vpop.eup %4304  ;;  %v6108_v39 = vsub.s32 %v2181_v9, %v2184_v36  ;;  %v2261_v13 = vsel %vm2257_vm11, %v2241_v62, %v2244_v63  ;;  %v2271_v42 = vsel %vm2259_vm10, %v2253_v50, %v2270_v2  ;;  %v2263_v33 = vsel %vm2259_vm10, %v2247_v17, %v2262_v59 }
 0x252   : > { %v4307_v57 = vpop.eup %4306  ;;  %v2058_v41 = vxor.u32 2147483648, %v4305_v18  ;;  %v2272_v34 = vsel %vm2258_vm9, %v2269_v52, %v2271_v42  ;;  %v2341_v22 = vsel %vm2340_vm8, %v2339_v16, 0  ;;  %v2207_v23 = vsub.s32 4, %v2183_v24 }
 0x253   : > { %v2055_v20 = vxor.u32 2147483648, %v4307_v57  ;;  %v2187_v32 = vsub.s32 0, %v6108_v39  ;;  %v2268_v15 = vsel %vm2258_vm9, %v2265_v7, %v2267_v28  ;;  %v2343_v17 = vand.u32 31, %v2341_v22 }
 0x254   : > { %v2059_v58 = vsel %vm2057_vm3, %v2058_v41, %v4307_v57  ;;  %v6118_v63 = vmul.u32.u64.low %v6100_v46, %v2272_v34  ;;  %v6119_v50 = vmul.u32.u64.high %v6100_v46, %v2272_v34, %v6118_v63  ;;  %v6125_v16 = vmul.f32 %v5962_v43, %v4601_v21 }
 0x255   : > { %v2056_v9 = vsel %vm2054_vm4, %v4305_v18, %v2055_v20  ;;  %v3981_v62 = vmin.u32 %v2187_v32, %v6108_v39  ;;  %v2264_v53 = vsel %vm2258_vm9, %v2261_v13, %v2263_v33  ;;  %v2344_v18 = vsub.s32 32, %v2343_v17 }
 0x256   : > { %v2060_v40 = vsel %vm2053_vm5, %v2056_v9, %v2059_v58  ;;  %v6132_v59 = vmul.u32.u64.low %v6100_v46, %v2268_v15  ;;  %v6133_v52 = vmul.u32.u64.high %v6100_v46, %v2268_v15, %v6132_v59  ;;  %v6139_v48 = vmul.f32 %v5951_v51, %v4614_v26 }
 0x257   : > { %v2061_v36 = vsel %vm2050_vm6, nan, %v2060_v40  ;;  %v6143_v21 = vadd.f32 %v6008_v1, %v4641_v38  ;;  %v2189_v19 = vclz %v3981_v62  ;;  %v2177_v0 = vadd.s32 %v6054_v27, %v6060_v60 }
 0x258   : > { %2077 = vst [vmem:[%s4951_s10 + $0x78] sm:$0xff] %v2061_v36  ;;  %v6150_v7 = vsel %vm2123_vm14, %v2207_v23, %v2183_v24  ;;  %v2280_v28 = vmul.u32 %v6100_v46, %v2264_v53  ;;  %v2337_v2 = vor.u32 8388608, %v6105_v37  ;;  %vm2282_vm12 = vc.u32 %v6119_v50, %v6132_v59 }
 0x259   : > { %v3982_v57 = vadd.s32 4294967294, %v2189_v19  ;;  %v2347_v38 = vshrl.u32 %v4454_v8, %v2344_v18  ;;  %v2350_v1 = vshrl.u32 %v4455_v10, %v2344_v18  ;;  %v2283_v41 = vadd.s32 1, %v6133_v52 }
 0x25a   : > { %v6159_v13 = vshrl.u32 %v2341_v22, 5  ;;  %v2346_v27 = vshll.u32 %v4453_v4, %v2343_v17  ;;  %v2353_v60 = vshrl.u32 %v4456_v12, %v2344_v18  ;;  %v2349_v46 = vshll.u32 %v4454_v8, %v2343_v17 }
 0x25b   : > { %vm3983_vm13 = vcmp.lt.s32.totalorder %v3982_v57, 0  ;;  %v2352_v24 = vshll.u32 %v4455_v10, %v2343_v17  ;;  %v2356_v37 = vshrl.u32 %v4457_v14, %v2344_v18  ;;  %v2284_v20 = vsel %vm2282_vm12, %v2283_v41, %v6133_v52 }
 0x25c   : > { %v2192_v42 = vsel %vm3983_vm13, 0, %v3982_v57  ;;  %v2348_v33 = vor.u32 %v2347_v38, %v2346_v27  ;;  %v2355_v34 = vshll.u32 %v4456_v12, %v2343_v17  ;;  %v2285_v32 = vadd.s32 %v2284_v20, %v2280_v28 }
 0x25d   : > { %v2193_v58 = vsub.s32 32, %v2192_v42  ;;  %v2197_v22 = vsub.s32 4294967266, %v2192_v42  ;;  %v2351_v23 = vor.u32 %v2350_v1, %v2349_v46  ;;  %v2354_v15 = vor.u32 %v2353_v60, %v2352_v24 }
 0x25e   : > { %v2357_v9 = vor.u32 %v2356_v37, %v2355_v34  ;;  %v2358_v63 = vshll.u32 %v4457_v14, %v2343_v17  ;;  %v2359_v40 = vshrl.u32 %v7389_v44, %v2344_v18  ;;  %v2194_v62 = vshll.u32 %v6108_v39, %v2192_v42 }
 0x25f   : > { %v2195_v53 = vshrl.u32 %v2177_v0, %v2193_v58  ;;  %v2198_v36 = vadd.s32 127, %v2197_v22  ;;  %v2286_v19 = vadd.s32 536870912, %v2285_v32  ;;  %v2345_v52 = vshrl.u32 %v4453_v4, %v2344_v18 }
 0x260   : > { %v2360_v57 = vor.u32 %v2359_v40, %v2358_v63  ;;  %vm2361_vm0 = vcmp.lt.s32.totalorder %v6159_v13, 1  ;;  %vm2362_vm15 = vcmp.lt.s32.totalorder %v6159_v13, 2  ;;  %vm2364_vm2 = vcmp.lt.s32.totalorder %v6159_v13, 4 }
 0x261   : > { %v2196_v28 = vor.u32 %v2195_v53, %v2194_v62  ;;  %v2199_v38 = vshll.u32 %v2198_v36, 23  ;;  %v2287_v1 = vshrl.u32 %v2286_v19, 30  ;;  %vm2363_vm1 = vcmp.lt.s32.totalorder %v6159_v13, 3 }
 0x262   : > { %v2369_v17 = vsel %vm2361_vm0, %v2348_v33, %v2351_v23  ;;  %v2370_v41 = vsel %vm2364_vm2, %v2357_v9, 920167782  ;;  %v2374_v39 = vsel %vm2364_vm2, %v2360_v57, 1326507024  ;;  %v2366_v60 = vsel %vm2364_vm2, %v2354_v15, 2102212464 }
 0x263   : > { %v2200_v0 = vor.u32 4788187, %v2199_v38  ;;  %v2288_v27 = vshll.u32 %v2287_v1, 30  ;;  %v2373_v46 = vsel %vm2361_vm0, %v2351_v23, %v2354_v15  ;;  %v2365_v18 = vsel %vm2361_vm0, %v2345_v52, %v2348_v33 }
 0x264   : > { %v2371_v24 = vsel %vm2363_vm1, %v2354_v15, %v2370_v41  ;;  %v2375_v37 = vsel %vm2363_vm1, %v2357_v9, %v2374_v39  ;;  %v2377_v42 = vshll.u32 %v2337_v2, 8  ;;  %v2203_v34 = vcvt.s32.f32 %v2196_v28 }
 0x265   : > { %v2201_v20 = vand.u32 2147483647, %v2200_v0  ;;  %v6180_v58 = vsub.s32 %v2285_v32, %v2288_v27  ;;  %v2372_v22 = vsel %vm2362_vm15, %v2369_v17, %v2371_v24  ;;  %v2367_v63 = vsel %vm2363_vm1, %v2351_v23, %v2366_v60 }
 0x266   : > { %v2376_v33 = vsel %vm2362_vm15, %v2373_v46, %v2375_v37  ;;  %v6188_v40 = vmul.u32.u64.low %v2377_v42, %v2372_v22  ;;  %v6189_v62 = vmul.u32.u64.high %v2377_v42, %v2372_v22, %v6188_v40  ;;  %v7410_v15 = vand.u32 2147483647, %v5969_v6 }
 0x267   : > { %v2204_v32 = vmul.f32 %v2203_v34, %v2201_v20  ;;  %v2291_v9 = vsub.s32 0, %v6180_v58  ;;  %v2311_v53 = vsub.s32 4, %v2287_v1  ;;  %v2436_v52 = vand.u32 2139095040, %v6143_v21 }
 0x268   : > { %vm6194_vm3 = vcmp.le.f32.partialorder %v7410_v15, 0.7853982  ;;  %v6202_v36 = vmul.u32.u64.low %v2377_v42, %v2376_v33  ;;  %v6203_v19 = vmul.u32.u64.high %v2377_v42, %v2376_v33, %v6202_v36  ;;  %v6208_v57 = vadd.f32 %v6012_v29, %v4838_v47 }
 0x269   : > { %v2210_v23 = vsel %vm6194_vm3, 0, %v6150_v7  ;;  %v2205_v28 = vxor.u32 2147483648, %v2204_v32  ;;  %v3985_v38 = vmin.u32 %v2291_v9, %v6180_v58  ;;  %v2368_v17 = vsel %vm2362_vm15, %v2365_v18, %v2367_v63 }
 0x26a   : > { %vm2227_vm4 = vcmp.lt.s32.totalorder %v5982_v49, 0  ;;  %v2387_v41 = vadd.s32 1, %v6189_v62  ;;  %v2433_v7 = vand.u32 2147483647, %v6143_v21  ;;  %v2437_v39 = vshrl.u32 %v2436_v52, 23 }
 0x26b   : > { %v2206_v0 = vsel %vm2123_vm14, %v2205_v28, %v2204_v32  ;;  %v2214_v27 = vadd.s32 3, %v2210_v23  ;;  %v2293_v60 = vclz %v3985_v38  ;;  %v2312_v29 = vsel %vm2227_vm4, %v2311_v53, %v2287_v1 }
 0x26c   : > { %v2209_v13 = vsel %vm6194_vm3, %v5969_v6, %v2206_v0  ;;  %v7413_v46 = vand.u32 2147483647, %v5982_v49  ;;  %v2384_v24 = vmul.u32 %v2377_v42, %v2368_v17  ;;  %vm2386_vm6 = vc.u32 %v6203_v19, %v6188_v40 }
 0x26d   : > { %4308 = vcosq.f32 %v2209_v13  ;;  %v3986_v37 = vadd.s32 4294967294, %v2293_v60  ;;  %v2388_v20 = vsel %vm2386_vm6, %v2387_v41, %v6189_v62  ;;  %v3992_v34 = vadd.s32 4294967169, %v2437_v39 }
 0x26e   : > { %vm6225_vm5 = vcmp.le.f32.partialorder %v7413_v46, 0.7853982  ;;  %4310 = vsinq.f32 %v2209_v13  ;;  %v2389_v22 = vadd.s32 %v2388_v20, %v2384_v24  ;;  %v2440_v63 = vand.u32 8388607, %v2433_v7 }
 0x26f   : > { %v2314_v1 = vsel %vm6225_vm5, 0, %v2312_v29  ;;  %v6238_v33 = vadd.f32 %v6066_v61, %v4838_v47  ;;  %v2215_v42 = vand.u32 3, %v2214_v27  ;;  %vm3987_vm7 = vcmp.lt.s32.totalorder %v3986_v37, 0 }
 0x270   : > { %v2443_v15 = vadd.s32 1, %v3992_v34  ;;  %v2281_v2 = vadd.s32 %v6132_v59, %v6119_v50  ;;  %v2296_v62 = vsel %vm3987_vm7, 0, %v3986_v37  ;;  %v2390_v32 = vadd.s32 536870912, %v2389_v22 }
 0x271   : > { %v2540_v9 = vand.u32 2139095040, %v6208_v57  ;;  %v2297_v53 = vsub.s32 32, %v2296_v62  ;;  %v2301_v23 = vsub.s32 4294967266, %v2296_v62  ;;  %v2318_v36 = vadd.s32 3, %v2314_v1 }
 0x272   : > { %vm2331_vm11 = vcmp.lt.s32.totalorder %v6001_v11, 0  ;;  %vm2444_vm9 = vcmp.gt.s32.totalorder %v2443_v15, 0  ;;  %v2391_v52 = vshrl.u32 %v2390_v32, 30  ;;  %v2441_v28 = vor.u32 8388608, %v2440_v63 }
 0x273   : > { %v2445_v47 = vsel %vm2444_vm9, %v2443_v15, 0  ;;  %v2537_v61 = vand.u32 2147483647, %v6208_v57  ;;  %v2298_v38 = vshll.u32 %v6180_v58, %v2296_v62  ;;  %v2299_v17 = vshrl.u32 %v2281_v2, %v2297_v53 }
 0x274   : > { %v2302_v41 = vadd.s32 127, %v2301_v23  ;;  %v2447_v50 = vand.u32 31, %v2445_v47  ;;  %vm2213_vm10 = vweird.f32 %v5969_v6  ;;  %vm2216_vm8 = vcmp.lt.s32.totalorder %v2215_v42, 2 }
 0x275   : > { %vm2217_vm14 = vcmp.eq.s32.totalorder %v2215_v42, 0  ;;  %v2392_v59 = vshll.u32 %v2391_v52, 30  ;;  %v2541_v39 = vshrl.u32 %v2540_v9, 23  ;;  %vm2220_vm12 = vcmp.eq.s32.totalorder %v2215_v42, 2 }
 0x276   : > { %v2300_v0 = vor.u32 %v2299_v17, %v2298_v38  ;;  %v2303_v27 = vshll.u32 %v2302_v41, 23  ;;  %v2448_v60 = vsub.s32 32, %v2447_v50  ;;  %v6247_v29 = vand.u32 3, %v2318_v36 }
 0x277   : > { %v2385_v13 = vadd.s32 %v6188_v40, %v6203_v19  ;;  %v6251_v46 = vsub.s32 %v2389_v22, %v2392_v59  ;;  %v2415_v58 = vsub.s32 4, %v2391_v52  ;;  %v4309_v24 = vpop.eup %4308  ;;  %v6253_v20 = vshrl.u32 %v2445_v47, 5 }
 0x278   : > { %v2304_v37 = vor.u32 4788187, %v2303_v27  ;;  %v6255_v34 = vshll.u32 %v2441_v28, 8  ;;  %v6259_v1 = vand.u32 8388607, %v2537_v61  ;;  %v4311_v63 = vpop.eup %4310  ;;  %v2221_v15 = vxor.u32 2147483648, %v4309_v24 }
 0x279   : > { %v2307_v2 = vcvt.s32.f32 %v2300_v0  ;;  %v2395_v62 = vsub.s32 0, %v6251_v46  ;;  %v3996_v32 = vadd.s32 4294967169, %v2541_v39  ;;  %v2218_v40 = vxor.u32 2147483648, %v4311_v63 }
 0x27a   : > { %v2305_v19 = vand.u32 2147483647, %v2304_v37  ;;  %v2451_v22 = vshrl.u32 %v4454_v8, %v2448_v60  ;;  %v2454_v9 = vshrl.u32 %v4455_v10, %v2448_v60  ;;  %v2222_v53 = vsel %vm2220_vm12, %v2221_v15, %v4311_v63 }
 0x27b   : > { %v3989_v23 = vmin.u32 %v2395_v62, %v6251_v46  ;;  %v6268_v36 = vsel %vm2331_vm11, %v2415_v58, %v2391_v52  ;;  %v2450_v28 = vshll.u32 %v4453_v4, %v2447_v50  ;;  %v2219_v47 = vsel %vm2217_vm14, %v4309_v24, %v2218_v40 }
 0x27c   : > { %v2308_v38 = vmul.f32 %v2307_v2, %v2305_v19  ;;  %v2453_v17 = vshll.u32 %v4454_v8, %v2447_v50  ;;  %v2457_v41 = vshrl.u32 %v4456_v12, %v2448_v60  ;;  %v2223_v59 = vsel %vm2216_vm8, %v2219_v47, %v2222_v53 }
 0x27d   : > { %v2397_v39 = vclz %v3989_v23  ;;  %v2449_v0 = vshrl.u32 %v4453_v4, %v2448_v60  ;;  %v2456_v27 = vshll.u32 %v4455_v10, %v2447_v50  ;;  %v2224_v52 = vsel %vm2213_vm10, nan, %v2223_v59 }
 0x27e   : > { %v2309_v58 = vxor.u32 2147483648, %v2308_v38  ;;  %v2452_v37 = vor.u32 %v2451_v22, %v2450_v28  ;;  %v2455_v63 = vor.u32 %v2454_v9, %v2453_v17  ;;  %v2459_v15 = vshll.u32 %v4456_v12, %v2447_v50  ;;  %3785 = vst [vmem:[%s4951_s10 + $0x80] sm:$0xff] %v2224_v52 }
 0x27f   : > { %v3990_v24 = vadd.s32 4294967294, %v2397_v39  ;;  %v2460_v2 = vshrl.u32 %v4457_v14, %v2448_v60  ;;  %v2463_v62 = vshrl.u32 %v7389_v44, %v2448_v60  ;;  %vm6287_vm13 = vcmp.le.f32.partialorder %v2329_v45, 0.7853982 }
 0x280   : > { %v2310_v42 = vsel %vm2227_vm4, %v2309_v58, %v2308_v38  ;;  %v2458_v6 = vor.u32 %v2457_v41, %v2456_v27  ;;  %v2462_v19 = vshll.u32 %v4457_v14, %v2447_v50  ;;  %vm2465_vm0 = vcmp.lt.s32.totalorder %v6253_v20, 1 }
 0x281   : > { %v2313_v22 = vsel %vm6225_vm5, %v5982_v49, %v2310_v42  ;;  %vm3991_vm15 = vcmp.lt.s32.totalorder %v3990_v24, 0  ;;  %v2461_v60 = vor.u32 %v2460_v2, %v2459_v15  ;;  %vm2466_vm2 = vcmp.lt.s32.totalorder %v6253_v20, 2 }
 0x282   : > { %4312 = vcosq.f32 %v2313_v22  ;;  %v2400_v9 = vsel %vm3991_vm15, 0, %v3990_v24  ;;  %v2464_v53 = vor.u32 %v2463_v62, %v2462_v19  ;;  %vm2467_vm1 = vcmp.lt.s32.totalorder %v6253_v20, 3 }
 0x283   : > { %4314 = vsinq.f32 %v2313_v22  ;;  %v2401_v45 = vsub.s32 32, %v2400_v9  ;;  %v2405_v23 = vsub.s32 4294967266, %v2400_v9  ;;  %vm2468_vm3 = vcmp.lt.s32.totalorder %v6253_v20, 4 }
 0x284   : > { %v2402_v50 = vshll.u32 %v6251_v46, %v2400_v9  ;;  %v2470_v28 = vsel %vm2468_vm3, %v2458_v6, 2102212464  ;;  %v2473_v18 = vsel %vm2465_vm0, %v2452_v37, %v2455_v63  ;;  %v2474_v47 = vsel %vm2468_vm3, %v2461_v60, 920167782 }
 0x285   : > { %v2403_v38 = vshrl.u32 %v2385_v13, %v2401_v45  ;;  %v2406_v17 = vadd.s32 127, %v2405_v23  ;;  %v2475_v41 = vsel %vm2467_vm1, %v2458_v6, %v2474_v47  ;;  %v2477_v59 = vsel %vm2465_vm0, %v2455_v63, %v2458_v6 }
 0x286   : > { %v2469_v39 = vsel %vm2465_vm0, %v2449_v0, %v2452_v37  ;;  %v2476_v27 = vsel %vm2466_vm2, %v2473_v18, %v2475_v41  ;;  %v2478_v46 = vsel %vm2468_vm3, %v2464_v53, 1326507024  ;;  %v2547_v52 = vadd.s32 1, %v3996_v32 }
 0x287   : > { %v2404_v58 = vor.u32 %v2403_v38, %v2402_v50  ;;  %v2407_v24 = vshll.u32 %v2406_v17, 23  ;;  %v2471_v13 = vsel %vm2467_vm1, %v2455_v63, %v2470_v28  ;;  %v2479_v15 = vsel %vm2467_vm1, %v2461_v60, %v2478_v46 }
 0x288   : > { %v2480_v2 = vsel %vm2466_vm2, %v2477_v59, %v2479_v15  ;;  %v6317_v62 = vmul.u32.u64.low %v6255_v34, %v2476_v27  ;;  %v6318_v42 = vmul.u32.u64.high %v6255_v34, %v2476_v27, %v6317_v62  ;;  %vm2548_vm4 = vcmp.gt.s32.totalorder %v2547_v52, 0 }
 0x289   : > { %v2408_v0 = vor.u32 4788187, %v2407_v24  ;;  %v2418_v32 = vsel %vm6287_vm13, 0, %v6268_v36  ;;  %v6325_v37 = vmul.u32.u64.low %v6255_v34, %v2480_v2  ;;  %v6326_v63 = vmul.u32.u64.high %v6255_v34, %v2480_v2, %v6325_v37 }
 0x28a   : > { %vm2317_vm5 = vweird.f32 %v5982_v49  ;;  %vm2320_vm6 = vcmp.lt.s32.totalorder %v6247_v29, 2  ;;  %v2472_v6 = vsel %vm2466_vm2, %v2469_v39, %v2471_v13  ;;  %v2549_v19 = vsel %vm2548_vm4, %v2547_v52, 0 }
 0x28b   : > { %vm2321_vm7 = vcmp.eq.s32.totalorder %v6247_v29, 0  ;;  %v2409_v22 = vand.u32 2147483647, %v2408_v0  ;;  %v2411_v60 = vcvt.s32.f32 %v2404_v58  ;;  %v2551_v9 = vand.u32 31, %v2549_v19 }
 0x28c   : > { %v4313_v53 = vpop.eup %4312  ;;  %vm2324_vm9 = vcmp.eq.s32.totalorder %v6247_v29, 2  ;;  %v2422_v36 = vadd.s32 3, %v2418_v32  ;;  %v2491_v45 = vadd.s32 1, %v6318_v42  ;;  %v2545_v23 = vor.u32 8388608, %v6259_v1 }
 0x28d   : > { %v4315_v50 = vpop.eup %4314  ;;  %v2325_v28 = vxor.u32 2147483648, %v4313_v53  ;;  %v2412_v18 = vmul.f32 %v2411_v60, %v2409_v22  ;;  %v2488_v20 = vmul.u32 %v6255_v34, %v2472_v6  ;;  %vm2490_vm10 = vc.u32 %v6326_v63, %v6317_v62 }
 0x28e   : > { %v2322_v47 = vxor.u32 2147483648, %v4315_v50  ;;  %v2492_v38 = vsel %vm2490_vm10, %v2491_v45, %v6318_v42  ;;  %v6340_v17 = vshrl.u32 %v2549_v19, 5  ;;  %v2552_v41 = vsub.s32 32, %v2551_v9 }
 0x28f   : > { %v2326_v59 = vsel %vm2324_vm9, %v2325_v28, %v4315_v50  ;;  %v2413_v39 = vxor.u32 2147483648, %v2412_v18  ;;  %v2493_v27 = vadd.s32 %v2492_v38, %v2488_v20  ;;  %v2554_v46 = vshll.u32 %v4453_v4, %v2551_v9 }
 0x290   : > { %v2323_v1 = vsel %vm2321_vm7, %v4313_v53, %v2322_v47  ;;  %v2555_v34 = vshrl.u32 %v4454_v8, %v2552_v41  ;;  %v2557_v52 = vshll.u32 %v4454_v8, %v2551_v9  ;;  %v2558_v58 = vshrl.u32 %v4455_v10, %v2552_v41 }
 0x291   : > { %v2327_v24 = vsel %vm2320_vm6, %v2323_v1, %v2326_v59  ;;  %v2414_v13 = vsel %vm2331_vm11, %v2413_v39, %v2412_v18  ;;  %v2494_v15 = vadd.s32 536870912, %v2493_v27  ;;  %v2560_v2 = vshll.u32 %v4455_v10, %v2551_v9 }
 0x292   : > { %v2328_v42 = vsel %vm2317_vm5, nan, %v2327_v24  ;;  %v2417_v0 = vsel %vm6287_vm13, %v6001_v11, %v2414_v13  ;;  %v2556_v32 = vor.u32 %v2555_v34, %v2554_v46  ;;  %v2559_v37 = vor.u32 %v2558_v58, %v2557_v52 }
 0x293   : > { %4316 = vcosq.f32 %v2417_v0  ;;  %v6358_v6 = vshrl.u32 %v2494_v15, 30  ;;  %v2561_v29 = vshrl.u32 %v4456_v12, %v2552_v41  ;;  %v2563_v19 = vshll.u32 %v4456_v12, %v2551_v9  ;;  %3786 = vst [vmem:[%s4951_s10 + $0x88] sm:$0xff] %v2328_v42 }
 0x294   : > { %4318 = vsinq.f32 %v2417_v0  ;;  %v2564_v22 = vshrl.u32 %v4457_v14, %v2552_v41  ;;  %v2566_v49 = vshll.u32 %v4457_v14, %v2551_v9  ;;  %v2567_v60 = vshrl.u32 %v7389_v44, %v2552_v41 }
 0x295   : > { %v6368_v40 = vmul.f32 %v5962_v43, %v4614_v26  ;;  %v2423_v53 = vand.u32 3, %v2422_v36  ;;  %v2496_v45 = vshll.u32 %v6358_v6, 30  ;;  %v2562_v50 = vor.u32 %v2561_v29, %v2560_v2 }
 0x296   : > { %v6373_v28 = vmul.f32 %v5951_v51, %v4612_v25  ;;  %v6377_v18 = vadd.f32 %v6078_v55, %v5052_v54  ;;  %v2565_v20 = vor.u32 %v2564_v22, %v2563_v19  ;;  %v2568_v9 = vor.u32 %v2567_v60, %v2566_v49 }
 0x297   : > { %v6379_v47 = vsub.s32 %v2493_v27, %v2496_v45  ;;  %vm2569_vm11 = vcmp.lt.s32.totalorder %v6340_v17, 1  ;;  %vm2572_vm8 = vcmp.lt.s32.totalorder %v6340_v17, 4  ;;  %v2585_v26 = vshll.u32 %v2545_v23, 8 }
 0x298   : > { %vm2435_vm14 = vcmp.lt.s32.totalorder %v6143_v21, 0  ;;  %vm2571_vm12 = vcmp.lt.s32.totalorder %v6340_v17, 3  ;;  %v2577_v36 = vsel %vm2569_vm11, %v2556_v32, %v2559_v37  ;;  %v2578_v38 = vsel %vm2572_vm8, %v2565_v20, 920167782 }
 0x299   : > { %v2644_v55 = vand.u32 2139095040, %v6238_v33  ;;  %vm2424_vm13 = vcmp.lt.s32.totalorder %v2423_v53, 2  ;;  %v2499_v59 = vsub.s32 0, %v6379_v47  ;;  %vm2570_vm0 = vcmp.lt.s32.totalorder %v6340_v17, 2 }
 0x29a   : > { %v2579_v39 = vsel %vm2571_vm12, %v2562_v50, %v2578_v38  ;;  %vm2421_vm15 = vweird.f32 %v6001_v11  ;;  %v2574_v23 = vsel %vm2572_vm8, %v2562_v50, 2102212464  ;;  %v2581_v46 = vsel %vm2569_vm11, %v2559_v37, %v2562_v50 }
 0x29b   : > { %v2580_v27 = vsel %vm2570_vm0, %v2577_v36, %v2579_v39  ;;  %v2582_v1 = vsel %vm2572_vm8, %v2568_v9, 1326507024  ;;  %vm6399_vm2 = vcmp.le.f32.partialorder %v2433_v7, 0.7853982  ;;  %v3993_v52 = vmin.u32 %v2499_v59, %v6379_v47 }
 0x29c   : > { %v2553_v58 = vshrl.u32 %v4453_v4, %v2552_v41  ;;  %v2583_v24 = vsel %vm2571_vm12, %v2565_v20, %v2582_v1  ;;  %v2641_v13 = vand.u32 2147483647, %v6238_v33  ;;  %v2645_v7 = vshrl.u32 %v2644_v55, 23 }
 0x29d   : > { %v2584_v15 = vsel %vm2570_vm0, %v2581_v46, %v2583_v24  ;;  %v6410_v2 = vmul.u32.u64.low %v2585_v26, %v2580_v27  ;;  %v6411_v42 = vmul.u32.u64.high %v2585_v26, %v2580_v27, %v6410_v2  ;;  %v4317_v0 = vpop.eup %4316  ;;  %v2501_v29 = vclz %v3993_v52 }
 0x29e   : > { %v2519_v19 = vsub.s32 4, %v6358_v6  ;;  %v2573_v41 = vsel %vm2569_vm11, %v2553_v58, %v2556_v32  ;;  %v2575_v22 = vsel %vm2571_vm12, %v2559_v37, %v2574_v23  ;;  %v4319_v49 = vpop.eup %4318  ;;  %v2429_v60 = vxor.u32 2147483648, %v4317_v0 }
 0x29f   : > { %v6419_v45 = vmul.u32.u64.low %v2585_v26, %v2584_v15  ;;  %v6420_v50 = vmul.u32.u64.high %v2585_v26, %v2584_v15, %v6419_v45  ;;  %v4000_v20 = vadd.s32 4294967169, %v2645_v7  ;;  %vm2425_vm1 = vcmp.eq.s32.totalorder %v2423_v53, 0 }
 0x2a0   : > { %v2426_v9 = vxor.u32 2147483648, %v4319_v49  ;;  %vm2428_vm3 = vcmp.eq.s32.totalorder %v2423_v53, 2  ;;  %v3994_v36 = vadd.s32 4294967294, %v2501_v29  ;;  %v2576_v55 = vsel %vm2570_vm0, %v2573_v41, %v2575_v22 }
 0x2a1   : > { %v2430_v38 = vsel %vm2428_vm3, %v2429_v60, %v4319_v49  ;;  %v2595_v59 = vadd.s32 1, %v6411_v42  ;;  %v2651_v32 = vadd.s32 1, %v4000_v20  ;;  %v2520_v37 = vsel %vm2435_vm14, %v2519_v19, %v6358_v6 }
 0x2a2   : > { %v2427_v39 = vsel %vm2425_vm1, %v4317_v0, %v2426_v9  ;;  %vm3995_vm4 = vcmp.lt.s32.totalorder %v3994_v36, 0  ;;  %v2648_v23 = vand.u32 8388607, %v2641_v13  ;;  %v2489_v46 = vadd.s32 %v6317_v62, %v6326_v63 }
 0x2a3   : > { %v2431_v27 = vsel %vm2424_vm13, %v2427_v39, %v2430_v38  ;;  %v2504_v17 = vsel %vm3995_vm4, 0, %v3994_v36  ;;  %vm2594_vm5 = vc.u32 %v6420_v50, %v6410_v2  ;;  %v2592_v24 = vmul.u32 %v2585_v26, %v2576_v55 }
 0x2a4   : > { %v2432_v1 = vsel %vm2421_vm15, nan, %v2431_v27  ;;  %v2505_v52 = vsub.s32 32, %v2504_v17  ;;  %v2509_v58 = vsub.s32 4294967266, %v2504_v17  ;;  %v2506_v6 = vshll.u32 %v6379_v47, %v2504_v17 }
 0x2a5   : > { %v2522_v15 = vsel %vm6399_vm2, 0, %v2520_v37  ;;  %v2596_v53 = vsel %vm2594_vm5, %v2595_v59, %v6411_v42  ;;  %vm2652_vm6 = vcmp.gt.s32.totalorder %v2651_v32, 0  ;;  %3787 = vst [vmem:[%s4951_s10 + $0x90] sm:$0xff] %v2432_v1  ;;  %v6444_v11 = vmul.f32 %v5962_v43, %v4612_v25 }
 0x2a6   : > { %v2507_v62 = vshrl.u32 %v2489_v46, %v2505_v52  ;;  %v2510_v63 = vadd.s32 127, %v2509_v58  ;;  %v2597_v7 = vadd.s32 %v2596_v53, %v2592_v24  ;;  %v2653_v0 = vsel %vm2652_vm6, %v2651_v32, 0 }
 0x2a7   : > { %v6448_v26 = vmul.f32 %v5951_v51, %v4624_v30  ;;  %v6452_v47 = vadd.f32 %v6125_v16, %v5052_v54  ;;  %v2655_v29 = vand.u32 31, %v2653_v0  ;;  %v6456_v42 = vadd.f32 %v6139_v48, %v5054_v5 }
 0x2a8   : > { %v2508_v19 = vor.u32 %v2507_v62, %v2506_v6  ;;  %v2511_v41 = vshll.u32 %v2510_v63, 23  ;;  %v2598_v22 = vadd.s32 536870912, %v2597_v7  ;;  %v6460_v25 = vadd.f32 %v6368_v40, %v5054_v5 }
 0x2a9   : > { %v6464_v49 = vadd.f32 %v6373_v28, %v5330_v56  ;;  %v2526_v60 = vadd.s32 3, %v2522_v15  ;;  %v2656_v45 = vsub.s32 32, %v2655_v29  ;;  %v2649_v20 = vor.u32 8388608, %v2648_v23 }
 0x2aa   : > { %v2512_v54 = vor.u32 4788187, %v2511_v41  ;;  %v6466_v16 = vshrl.u32 %v2598_v22, 30  ;;  %v2748_v48 = vand.u32 2139095040, %v6377_v18  ;;  %v2658_v9 = vshll.u32 %v4453_v4, %v2655_v29 }
 0x2ab   : > { %v2659_v36 = vshrl.u32 %v4454_v8, %v2656_v45  ;;  %v2662_v38 = vshrl.u32 %v4455_v10, %v2656_v45  ;;  %v2665_v5 = vshrl.u32 %v4456_v12, %v2656_v45  ;;  %v2515_v55 = vcvt.s32.f32 %v2508_v19 }
 0x2ac   : > { %v2513_v40 = vand.u32 2147483647, %v2512_v54  ;;  %v2600_v28 = vshll.u32 %v6466_v16, 30  ;;  %v2668_v59 = vshrl.u32 %v4457_v14, %v2656_v45  ;;  %v2654_v32 = vshrl.u32 %v2653_v0, 5 }
 0x2ad   : > { %v2661_v39 = vshll.u32 %v4454_v8, %v2655_v29  ;;  %v2664_v37 = vshll.u32 %v4455_v10, %v2655_v29  ;;  %v2667_v23 = vshll.u32 %v4456_v12, %v2655_v29  ;;  %v2660_v17 = vor.u32 %v2659_v36, %v2658_v9 }
 0x2ae   : > { %v2516_v27 = vmul.f32 %v2515_v55, %v2513_v40  ;;  %v6478_v46 = vsub.s32 %v2597_v7, %v2600_v28  ;;  %v2745_v1 = vand.u32 2147483647, %v6377_v18  ;;  %v2671_v6 = vshrl.u32 %v7389_v44, %v2656_v45 }
 0x2af   : > { %v2663_v52 = vor.u32 %v2662_v38, %v2661_v39  ;;  %v2666_v58 = vor.u32 %v2665_v5, %v2664_v37  ;;  %v2669_v24 = vor.u32 %v2668_v59, %v2667_v23  ;;  %v2670_v62 = vshll.u32 %v4457_v14, %v2655_v29 }
 0x2b0   : > { %v2517_v15 = vxor.u32 2147483648, %v2516_v27  ;;  %v2603_v53 = vsub.s32 0, %v6478_v46  ;;  %v6484_v63 = vshll.u32 %v2649_v20, 8  ;;  %v2623_v0 = vsub.s32 4, %v6466_v16 }
 0x2b1   : > { %v2657_v7 = vshrl.u32 %v4453_v4, %v2656_v45  ;;  %vm2673_vm7 = vcmp.lt.s32.totalorder %v2654_v32, 1  ;;  %v2749_v19 = vshrl.u32 %v2748_v48, 23  ;;  %v2672_v54 = vor.u32 %v2671_v6, %v2670_v62 }
 0x2b2   : > { %v2518_v41 = vsel %vm2435_vm14, %v2517_v15, %v2516_v27  ;;  %v3997_v22 = vmin.u32 %v2603_v53, %v6478_v46  ;;  %vm2676_vm9 = vcmp.lt.s32.totalorder %v2654_v32, 4  ;;  %v2681_v20 = vsel %vm2673_vm7, %v2660_v17, %v2663_v52 }
 0x2b3   : > { %v2521_v9 = vsel %vm6399_vm2, %v6143_v21, %v2518_v41  ;;  %v2678_v29 = vsel %vm2676_vm9, %v2666_v58, 2102212464  ;;  %v2682_v36 = vsel %vm2676_vm9, %v2669_v24, 920167782  ;;  %vm2674_vm10 = vcmp.lt.s32.totalorder %v2654_v32, 2 }
 0x2b4   : > { %4320 = vcosq.f32 %v2521_v9  ;;  %v2605_v45 = vclz %v3997_v22  ;;  %vm2675_vm11 = vcmp.lt.s32.totalorder %v2654_v32, 3  ;;  %vm6499_vm8 = vcmp.le.f32.partialorder %v2537_v61, 0.7853982 }
 0x2b5   : > { %4322 = vsinq.f32 %v2521_v9  ;;  %v2677_v34 = vsel %vm2673_vm7, %v2657_v7, %v2660_v17  ;;  %v2683_v38 = vsel %vm2675_vm11, %v2666_v58, %v2682_v36  ;;  %v2685_v5 = vsel %vm2673_vm7, %v2663_v52, %v2666_v58 }
 0x2b6   : > { %v3998_v40 = vadd.s32 4294967294, %v2605_v45  ;;  %v2679_v55 = vsel %vm2675_vm11, %v2663_v52, %v2678_v29  ;;  %v2684_v28 = vsel %vm2674_vm10, %v2681_v20, %v2683_v38  ;;  %v2686_v59 = vsel %vm2676_vm9, %v2672_v54, 1326507024 }
 0x2b7   : > { %v2687_v39 = vsel %vm2675_vm11, %v2669_v24, %v2686_v59  ;;  %v6508_v37 = vmul.u32.u64.low %v6484_v63, %v2684_v28  ;;  %v6509_v23 = vmul.u32.u64.high %v6484_v63, %v2684_v28, %v6508_v37  ;;  %v4004_v61 = vadd.s32 4294967169, %v2749_v19 }
 0x2b8   : > { %v2527_v27 = vand.u32 3, %v2526_v60  ;;  %vm2539_vm14 = vcmp.lt.s32.totalorder %v6208_v57, 0  ;;  %vm3999_vm12 = vcmp.lt.s32.totalorder %v3998_v40, 0  ;;  %v2688_v17 = vsel %vm2674_vm10, %v2685_v5, %v2687_v39 }
 0x2b9   : > { %v2608_v58 = vsel %vm3999_vm12, 0, %v3998_v40  ;;  %v6515_v52 = vmul.u32.u64.low %v6484_v63, %v2688_v17  ;;  %v6516_v6 = vmul.u32.u64.high %v6484_v63, %v2688_v17, %v6515_v52  ;;  %v2755_v15 = vadd.s32 1, %v4004_v61 }
 0x2ba   : > { %v2593_v24 = vadd.s32 %v6410_v2, %v6420_v50  ;;  %v2609_v53 = vsub.s32 32, %v2608_v58  ;;  %v2613_v62 = vsub.s32 4294967266, %v2608_v58  ;;  %v2680_v7 = vsel %vm2674_vm10, %v2677_v34, %v2679_v55 }
 0x2bb   : > { %vm2525_vm13 = vweird.f32 %v6143_v21  ;;  %v2624_v60 = vsel %vm2539_vm14, %v2623_v0, %v6466_v16  ;;  %v2699_v19 = vadd.s32 1, %v6509_v23  ;;  %v2752_v41 = vand.u32 8388607, %v2745_v1 }
 0x2bc   : > { %vm2756_vm0 = vcmp.gt.s32.totalorder %v2755_v15, 0  ;;  %v2610_v22 = vshll.u32 %v6478_v46, %v2608_v58  ;;  %v2611_v54 = vshrl.u32 %v2593_v24, %v2609_v53  ;;  %v2614_v2 = vadd.s32 127, %v2613_v62 }
 0x2bd   : > { %v2757_v50 = vsel %vm2756_vm0, %v2755_v15, 0  ;;  %vm2528_vm15 = vcmp.lt.s32.totalorder %v2527_v27, 2  ;;  %v2696_v32 = vmul.u32 %v6484_v63, %v2680_v7  ;;  %vm2698_vm2 = vc.u32 %v6516_v6, %v6508_v37 }
 0x2be   : > { %v2759_v9 = vand.u32 31, %v2757_v50  ;;  %v4321_v29 = vpop.eup %4320  ;;  %v2612_v16 = vor.u32 %v2611_v54, %v2610_v22  ;;  %v2615_v0 = vshll.u32 %v2614_v2, 23  ;;  %v2626_v20 = vsel %vm6499_vm8, 0, %v2624_v60 }
 0x2bf   : > { %v2700_v36 = vsel %vm2698_vm2, %v2699_v19, %v6509_v23  ;;  %v4323_v45 = vpop.eup %4322  ;;  %vm2529_vm1 = vcmp.eq.s32.totalorder %v2527_v27, 0  ;;  %v2533_v46 = vxor.u32 2147483648, %v4321_v29  ;;  %vm2532_vm3 = vcmp.eq.s32.totalorder %v2527_v27, 2 }
 0x2c0   : > { %v2701_v34 = vadd.s32 %v2700_v36, %v2696_v32  ;;  %v2760_v38 = vsub.s32 32, %v2759_v9  ;;  %v2530_v5 = vxor.u32 2147483648, %v4323_v45  ;;  %v2616_v63 = vor.u32 4788187, %v2615_v0 }
 0x2c1   : > { %v2753_v40 = vor.u32 8388608, %v2752_v41  ;;  %v2534_v55 = vsel %vm2532_vm3, %v2533_v46, %v4323_v45  ;;  %v2630_v28 = vadd.s32 3, %v2626_v20  ;;  %v2852_v39 = vand.u32 2139095040, %v6452_v47 }
 0x2c2   : > { %v2702_v59 = vadd.s32 536870912, %v2701_v34  ;;  %v2531_v61 = vsel %vm2529_vm1, %v4321_v29, %v2530_v5  ;;  %v2617_v17 = vand.u32 2147483647, %v2616_v63  ;;  %v2619_v58 = vcvt.s32.f32 %v2612_v16 }
 0x2c3   : > { %v2758_v52 = vshrl.u32 %v2757_v50, 5  ;;  %v2535_v23 = vsel %vm2528_vm15, %v2531_v61, %v2534_v55  ;;  %v2763_v24 = vshrl.u32 %v4454_v8, %v2760_v38  ;;  %v2769_v53 = vshrl.u32 %v4456_v12, %v2760_v38 }
 0x2c4   : > { %v6537_v15 = vshrl.u32 %v2702_v59, 30  ;;  %v2536_v62 = vsel %vm2525_vm13, nan, %v2535_v23  ;;  %v2620_v7 = vmul.f32 %v2619_v58, %v2617_v17  ;;  %v2762_v60 = vshll.u32 %v4453_v4, %v2759_v9 }
 0x2c5   : > { %v2766_v19 = vshrl.u32 %v4455_v10, %v2760_v38  ;;  %v2765_v22 = vshll.u32 %v4454_v8, %v2759_v9  ;;  %v2768_v27 = vshll.u32 %v4455_v10, %v2759_v9  ;;  %v2772_v54 = vshrl.u32 %v4457_v14, %v2760_v38  ;;  %3788 = vst [vmem:[%s4951_s10 + $0x98] sm:$0xff] %v2536_v62 }
 0x2c6   : > { %v2704_v41 = vshll.u32 %v6537_v15, 30  ;;  %v2621_v2 = vxor.u32 2147483648, %v2620_v7  ;;  %v2771_v50 = vshll.u32 %v4456_v12, %v2759_v9  ;;  %v2774_v21 = vshll.u32 %v4457_v14, %v2759_v9 }
 0x2c7   : > { %v2775_v32 = vshrl.u32 %v7389_v44, %v2760_v38  ;;  %v6555_v29 = vadd.f32 %v6444_v11, %v5330_v56  ;;  %v2764_v0 = vor.u32 %v2763_v24, %v2762_v60  ;;  %v2770_v20 = vor.u32 %v2769_v53, %v2768_v27 }
 0x2c8   : > { %v6557_v16 = vsub.s32 %v2701_v34, %v2704_v41  ;;  %v2622_v36 = vsel %vm2539_vm14, %v2621_v2, %v2620_v7  ;;  %v2767_v45 = vor.u32 %v2766_v19, %v2765_v22  ;;  %v2773_v46 = vor.u32 %v2772_v54, %v2771_v50 }
 0x2c9   : > { %v2776_v5 = vor.u32 %v2775_v32, %v2774_v21  ;;  %v2625_v9 = vsel %vm6499_vm8, %v6208_v57, %v2622_v36  ;;  %v6564_v63 = vand.u32 3, %v2630_v28  ;;  %v2793_v56 = vshll.u32 %v2753_v40, 8 }
 0x2ca   : > { %v2707_v55 = vsub.s32 0, %v6557_v16  ;;  %4324 = vcosq.f32 %v2625_v9  ;;  %v2761_v11 = vshrl.u32 %v4453_v4, %v2760_v38  ;;  %vm2780_vm4 = vcmp.lt.s32.totalorder %v2758_v52, 4 }
 0x2cb   : > { %v2853_v34 = vshrl.u32 %v2852_v39, 23  ;;  %4326 = vsinq.f32 %v2625_v9  ;;  %vm2777_vm5 = vcmp.lt.s32.totalorder %v2758_v52, 1  ;;  %v2782_v61 = vsel %vm2780_vm4, %v2770_v20, 2102212464 }
 0x2cc   : > { %v4001_v59 = vmin.u32 %v2707_v55, %v6557_v16  ;;  %v2785_v17 = vsel %vm2777_vm5, %v2764_v0, %v2767_v45  ;;  %v2786_v58 = vsel %vm2780_vm4, %v2773_v46, 920167782  ;;  %v2789_v23 = vsel %vm2777_vm5, %v2767_v45, %v2770_v20 }
 0x2cd   : > { %v2790_v48 = vsel %vm2780_vm4, %v2776_v5, 1326507024  ;;  %vm2778_vm6 = vcmp.lt.s32.totalorder %v2758_v52, 2  ;;  %vm2779_vm7 = vcmp.lt.s32.totalorder %v2758_v52, 3  ;;  %v2781_v28 = vsel %vm2777_vm5, %v2761_v11, %v2764_v0 }
 0x2ce   : > { %v2709_v24 = vclz %v4001_v59  ;;  %v2783_v53 = vsel %vm2779_vm7, %v2767_v45, %v2782_v61  ;;  %v2787_v40 = vsel %vm2779_vm7, %v2770_v20, %v2786_v58  ;;  %v2791_v62 = vsel %vm2779_vm7, %v2773_v46, %v2790_v48 }
 0x2cf   : > { %v4008_v7 = vadd.s32 4294967169, %v2853_v34  ;;  %vm2643_vm9 = vcmp.lt.s32.totalorder %v6238_v33, 0  ;;  %v2788_v39 = vsel %vm2778_vm6, %v2785_v17, %v2787_v40  ;;  %v2792_v60 = vsel %vm2778_vm6, %v2789_v23, %v2791_v62 }
 0x2d0   : > { %v4002_v38 = vadd.s32 4294967294, %v2709_v24  ;;  %v6572_v19 = vmul.u32.u64.low %v2793_v56, %v2792_v60  ;;  %v6573_v41 = vmul.u32.u64.high %v2793_v56, %v2792_v60, %v6572_v19  ;;  %vm2629_vm10 = vweird.f32 %v6208_v57 }
 0x2d1   : > { %v6575_v22 = vmul.u32.u64.low %v2793_v56, %v2788_v39  ;;  %v6576_v27 = vmul.u32.u64.high %v2793_v56, %v2788_v39, %v6575_v22  ;;  %vm2633_vm11 = vcmp.eq.s32.totalorder %v6564_v63, 0  ;;  %v2784_v54 = vsel %vm2778_vm6, %v2781_v28, %v2783_v53 }
 0x2d2   : > { %vm4003_vm8 = vcmp.lt.s32.totalorder %v4002_v38, 0  ;;  %v2859_v2 = vadd.s32 1, %v4008_v7  ;;  %vm2636_vm14 = vcmp.eq.s32.totalorder %v6564_v63, 2  ;;  %v2727_v21 = vsub.s32 4, %v6537_v15 }
 0x2d3   : > { %v2712_v50 = vsel %vm4003_vm8, 0, %v4002_v38  ;;  %v2849_v32 = vand.u32 2147483647, %v6452_v47  ;;  %v2697_v0 = vadd.s32 %v6508_v37, %v6516_v6  ;;  %v2800_v46 = vmul.u32 %v2793_v56, %v2784_v54 }
 0x2d4   : > { %v2713_v20 = vsub.s32 32, %v2712_v50  ;;  %v2717_v36 = vsub.s32 4294967266, %v2712_v50  ;;  %vm2860_vm12 = vcmp.gt.s32.totalorder %v2859_v2, 0  ;;  %v4325_v45 = vpop.eup %4324  ;;  %vm2802_vm13 = vc.u32 %v6573_v41, %v6575_v22 }
 0x2d5   : > { %v2803_v52 = vadd.s32 1, %v6576_v27  ;;  %v2861_v5 = vsel %vm2860_vm12, %v2859_v2, 0  ;;  %v4327_v9 = vpop.eup %4326  ;;  %v2637_v55 = vxor.u32 2147483648, %v4325_v45  ;;  %v2714_v11 = vshll.u32 %v6557_v16, %v2712_v50 }
 0x2d6   : > { %v2715_v34 = vshrl.u32 %v2697_v0, %v2713_v20  ;;  %v2718_v59 = vadd.s32 127, %v2717_v36  ;;  %v2634_v61 = vxor.u32 2147483648, %v4327_v9  ;;  %v2728_v37 = vsel %vm2643_vm9, %v2727_v21, %v6537_v15 }
 0x2d7   : > { %v2804_v6 = vsel %vm2802_vm13, %v2803_v52, %v6576_v27  ;;  %v2863_v56 = vand.u32 31, %v2861_v5  ;;  %v2638_v17 = vsel %vm2636_vm14, %v2637_v55, %v4327_v9  ;;  %vm2632_vm0 = vcmp.lt.s32.totalorder %v6564_v63, 2 }
 0x2d8   : > { %v2716_v58 = vor.u32 %v2715_v34, %v2714_v11  ;;  %v2719_v23 = vshll.u32 %v2718_v59, 23  ;;  %v2805_v48 = vadd.s32 %v2804_v6, %v2800_v46  ;;  %v2635_v16 = vsel %vm2633_vm11, %v4325_v45, %v2634_v61 }
 0x2d9   : > { %vm6602_vm15 = vcmp.le.f32.partialorder %v2641_v13, 0.7853982  ;;  %v2864_v15 = vsub.s32 32, %v2863_v56  ;;  %v2639_v28 = vsel %vm2632_vm0, %v2635_v16, %v2638_v17  ;;  %v2856_v62 = vand.u32 8388607, %v2849_v32 }
 0x2da   : > { %v2720_v53 = vor.u32 4788187, %v2719_v23  ;;  %v2806_v40 = vadd.s32 536870912, %v2805_v48  ;;  %v2640_v7 = vsel %vm2629_vm10, nan, %v2639_v28  ;;  %v2723_v38 = vcvt.s32.f32 %v2716_v58 }
 0x2db   : > { %v2730_v63 = vsel %vm6602_vm15, 0, %v2728_v37  ;;  %v2867_v39 = vshrl.u32 %v4454_v8, %v2864_v15  ;;  %v2870_v19 = vshrl.u32 %v4455_v10, %v2864_v15  ;;  %v2873_v27 = vshrl.u32 %v4456_v12, %v2864_v15  ;;  %3789 = vst [vmem:[%s4951_s10 + $0xa0] sm:$0xff] %v2640_v7 }
 0x2dc   : > { %v2721_v13 = vand.u32 2147483647, %v2720_v53  ;;  %v2807_v60 = vshrl.u32 %v2806_v40, 30  ;;  %v2862_v54 = vshrl.u32 %v2861_v5, 5  ;;  %v2866_v2 = vshll.u32 %v4453_v4, %v2863_v56 }
 0x2dd   : > { %v2875_v50 = vshll.u32 %v4456_v12, %v2863_v56  ;;  %v2876_v57 = vshrl.u32 %v4457_v14, %v2864_v15  ;;  %v2869_v20 = vshll.u32 %v4454_v8, %v2863_v56  ;;  %v2872_v36 = vshll.u32 %v4455_v10, %v2863_v56 }
 0x2de   : > { %v2724_v21 = vmul.f32 %v2723_v38, %v2721_v13  ;;  %v2808_v0 = vshll.u32 %v2807_v60, 30  ;;  %v2734_v45 = vadd.s32 3, %v2730_v63  ;;  %v2868_v46 = vor.u32 %v2867_v39, %v2866_v2 }
 0x2df   : > { %v2877_v52 = vor.u32 %v2876_v57, %v2875_v50  ;;  %v2879_v9 = vshrl.u32 %v7389_v44, %v2864_v15  ;;  %vm2747_vm2 = vcmp.lt.s32.totalorder %v6377_v18, 0  ;;  %v2871_v11 = vor.u32 %v2870_v19, %v2869_v20 }
 0x2e0   : > { %v2725_v55 = vxor.u32 2147483648, %v2724_v21  ;;  %v6623_v5 = vsub.s32 %v2805_v48, %v2808_v0  ;;  %v2874_v34 = vor.u32 %v2873_v27, %v2872_v36  ;;  %v2857_v59 = vor.u32 8388608, %v2856_v62 }
 0x2e1   : > { %v2865_v61 = vshrl.u32 %v4453_v4, %v2864_v15  ;;  %v2878_v37 = vshll.u32 %v4457_v14, %v2863_v56  ;;  %v2956_v6 = vand.u32 2139095040, %v6456_v42  ;;  %vm2881_vm1 = vcmp.lt.s32.totalorder %v2862_v54, 1 }
 0x2e2   : > { %v2726_v17 = vsel %vm2643_vm9, %v2725_v55, %v2724_v21  ;;  %v2811_v58 = vsub.s32 0, %v6623_v5  ;;  %vm2884_vm3 = vcmp.lt.s32.totalorder %v2862_v54, 4  ;;  %vm2883_vm4 = vcmp.lt.s32.totalorder %v2862_v54, 3 }
 0x2e3   : > { %v2729_v23 = vsel %vm6602_vm15, %v6238_v33, %v2726_v17  ;;  %v2880_v48 = vor.u32 %v2879_v9, %v2878_v37  ;;  %v2890_v16 = vsel %vm2884_vm3, %v2877_v52, 920167782  ;;  %v2886_v15 = vsel %vm2884_vm3, %v2874_v34, 2102212464 }
 0x2e4   : > { %4328 = vcosq.f32 %v2729_v23  ;;  %v4005_v56 = vmin.u32 %v2811_v58, %v6623_v5  ;;  %v2889_v28 = vsel %vm2881_vm1, %v2868_v46, %v2871_v11  ;;  %v2831_v53 = vsub.s32 4, %v2807_v60 }
 0x2e5   : > { %4330 = vsinq.f32 %v2729_v23  ;;  %v2891_v40 = vsel %vm2883_vm4, %v2874_v34, %v2890_v16  ;;  %v2897_v62 = vshll.u32 %v2857_v59, 8  ;;  %vm2882_vm5 = vcmp.lt.s32.totalorder %v2862_v54, 2 }
 0x2e6   : > { %v2813_v7 = vclz %v4005_v56  ;;  %v2885_v24 = vsel %vm2881_vm1, %v2865_v61, %v2868_v46  ;;  %v2893_v38 = vsel %vm2881_vm1, %v2871_v11, %v2874_v34  ;;  %v2887_v63 = vsel %vm2883_vm4, %v2871_v11, %v2886_v15 }
 0x2e7   : > { %v2892_v39 = vsel %vm2882_vm5, %v2889_v28, %v2891_v40  ;;  %v2894_v13 = vsel %vm2884_vm3, %v2880_v48, 1326507024  ;;  %v2957_v19 = vshrl.u32 %v2956_v6, 23  ;;  %v2735_v21 = vand.u32 3, %v2734_v45 }
 0x2e8   : > { %v4006_v27 = vadd.s32 4294967294, %v2813_v7  ;;  %v2895_v2 = vsel %vm2883_vm4, %v2877_v52, %v2894_v13  ;;  %v6644_v50 = vmul.u32.u64.low %v2897_v62, %v2892_v39  ;;  %v6645_v57 = vmul.u32.u64.high %v2897_v62, %v2892_v39, %v6644_v50 }
 0x2e9   : > { %v2832_v0 = vsel %vm2747_vm2, %v2831_v53, %v2807_v60  ;;  %v2896_v20 = vsel %vm2882_vm5, %v2893_v38, %v2895_v2  ;;  %v4012_v36 = vadd.s32 4294967169, %v2957_v19  ;;  %v2888_v46 = vsel %vm2882_vm5, %v2885_v24, %v2887_v63 }
 0x2ea   : > { %vm4007_vm6 = vcmp.lt.s32.totalorder %v4006_v27, 0  ;;  %v6650_v9 = vmul.u32.u64.low %v2897_v62, %v2896_v20  ;;  %v6651_v55 = vmul.u32.u64.high %v2897_v62, %v2896_v20, %v6650_v9  ;;  %vm2733_vm7 = vweird.f32 %v6238_v33 }
 0x2eb   : > { %vm6656_vm9 = vcmp.le.f32.partialorder %v2745_v1, 0.7853982  ;;  %v2816_v52 = vsel %vm4007_vm6, 0, %v4006_v27  ;;  %v2953_v45 = vand.u32 2147483647, %v6456_v42  ;;  %v2963_v11 = vadd.s32 1, %v4012_v36 }
 0x2ec   : > { %v2801_v60 = vadd.s32 %v6575_v22, %v6573_v41  ;;  %v2817_v34 = vsub.s32 32, %v2816_v52  ;;  %v2821_v59 = vsub.s32 4294967266, %v2816_v52  ;;  %v2907_v61 = vadd.s32 1, %v6645_v57 }
 0x2ed   : > { %vm2740_vm10 = vcmp.eq.s32.totalorder %v2735_v21, 2  ;;  %v2834_v37 = vsel %vm6656_vm9, 0, %v2832_v0  ;;  %v2904_v6 = vmul.u32 %v2897_v62, %v2888_v46  ;;  %vm2964_vm11 = vcmp.gt.s32.totalorder %v2963_v11, 0 }
 0x2ee   : > { %v4329_v1 = vpop.eup %4328  ;;  %v2818_v17 = vshll.u32 %v6623_v5, %v2816_v52  ;;  %v2819_v58 = vshrl.u32 %v2801_v60, %v2817_v34  ;;  %v2822_v23 = vadd.s32 127, %v2821_v59  ;;  %vm2906_vm8 = vc.u32 %v6651_v55, %v6644_v50 }
 0x2ef   : > { %v4331_v48 = vpop.eup %4330  ;;  %v2741_v41 = vxor.u32 2147483648, %v4329_v1  ;;  %v2908_v22 = vsel %vm2906_vm8, %v2907_v61, %v6645_v57  ;;  %v2960_v16 = vand.u32 8388607, %v2953_v45  ;;  %v2965_v56 = vsel %vm2964_vm11, %v2963_v11, 0 }
 0x2f0   : > { %v2738_v15 = vxor.u32 2147483648, %v4331_v48  ;;  %v2820_v28 = vor.u32 %v2819_v58, %v2818_v17  ;;  %v2823_v53 = vshll.u32 %v2822_v23, 23  ;;  %v2909_v40 = vadd.s32 %v2908_v22, %v2904_v6 }
 0x2f1   : > { %vm2737_vm14 = vcmp.eq.s32.totalorder %v2735_v21, 0  ;;  %v2742_v5 = vsel %vm2740_vm10, %v2741_v41, %v4331_v48  ;;  %v2967_v62 = vand.u32 31, %v2965_v56  ;;  %v3060_v7 = vand.u32 2139095040, %v6460_v25 }
 0x2f2   : > { %vm2736_vm12 = vcmp.lt.s32.totalorder %v2735_v21, 2  ;;  %v2739_v24 = vsel %vm2737_vm14, %v4329_v1, %v2738_v15  ;;  %v2824_v38 = vor.u32 4788187, %v2823_v53  ;;  %v2910_v63 = vadd.s32 536870912, %v2909_v40 }
 0x2f3   : > { %v2743_v39 = vsel %vm2736_vm12, %v2739_v24, %v2742_v5  ;;  %v2838_v13 = vadd.s32 3, %v2834_v37  ;;  %v2961_v19 = vor.u32 8388608, %v2960_v16  ;;  %v2968_v27 = vsub.s32 32, %v2967_v62 }
 0x2f4   : > { %v2744_v2 = vsel %vm2733_vm7, nan, %v2743_v39  ;;  %v2825_v57 = vand.u32 2147483647, %v2824_v38  ;;  %v2827_v0 = vcvt.s32.f32 %v2820_v28  ;;  %v6676_v20 = vshrl.u32 %v2910_v63, 30 }
 0x2f5   : > { %v2971_v36 = vshrl.u32 %v4454_v8, %v2968_v27  ;;  %v2974_v46 = vshrl.u32 %v4455_v10, %v2968_v27  ;;  %v2977_v21 = vshrl.u32 %v4456_v12, %v2968_v27  ;;  %v3061_v9 = vshrl.u32 %v3060_v7, 23  ;;  %3790 = vst [vmem:[%s4951_s10 + $0xa8] sm:$0xff] %v2744_v2 }
 0x2f6   : > { %v2828_v52 = vmul.f32 %v2827_v0, %v2825_v57  ;;  %v2912_v11 = vshll.u32 %v6676_v20, 30  ;;  %v2970_v60 = vshll.u32 %v4453_v4, %v2967_v62  ;;  %v2973_v33 = vshll.u32 %v4454_v8, %v2967_v62 }
 0x2f7   : > { %v2966_v34 = vshrl.u32 %v2965_v56, 5  ;;  %v2976_v59 = vshll.u32 %v4455_v10, %v2967_v62  ;;  %v2979_v61 = vshll.u32 %v4456_v12, %v2967_v62  ;;  %v2980_v37 = vshrl.u32 %v4457_v14, %v2968_v27 }
 0x2f8   : > { %v2829_v6 = vxor.u32 2147483648, %v2828_v52  ;;  %v6688_v1 = vsub.s32 %v2909_v40, %v2912_v11  ;;  %v2972_v17 = vor.u32 %v2971_v36, %v2970_v60  ;;  %v2975_v58 = vor.u32 %v2974_v46, %v2973_v33 }
 0x2f9   : > { %v2978_v23 = vor.u32 %v2977_v21, %v2976_v59  ;;  %v2981_v48 = vor.u32 %v2980_v37, %v2979_v61  ;;  %v2982_v41 = vshll.u32 %v4457_v14, %v2967_v62  ;;  %v2983_v22 = vshrl.u32 %v7389_v44, %v2968_v27 }
 0x2fa   : > { %v2830_v16 = vsel %vm2747_vm2, %v2829_v6, %v2828_v52  ;;  %v6694_v56 = vand.u32 3, %v2838_v13  ;;  %v2915_v15 = vsub.s32 0, %v6688_v1  ;;  %v3001_v28 = vshll.u32 %v2961_v19, 8 }
 0x2fb   : > { %v2833_v53 = vsel %vm6656_vm9, %v6377_v18, %v2830_v16  ;;  %v2969_v40 = vshrl.u32 %v4453_v4, %v2968_v27  ;;  %v2984_v5 = vor.u32 %v2983_v22, %v2982_v41  ;;  %v4016_v7 = vadd.s32 4294967169, %v3061_v9 }
 0x2fc   : > { %4332 = vcosq.f32 %v2833_v53  ;;  %v4009_v62 = vmin.u32 %v2915_v15, %v6688_v1  ;;  %vm2985_vm13 = vcmp.lt.s32.totalorder %v2966_v34, 1  ;;  %vm2988_vm0 = vcmp.lt.s32.totalorder %v2966_v34, 4 }
 0x2fd   : > { %4334 = vsinq.f32 %v2833_v53  ;;  %v2990_v24 = vsel %vm2988_vm0, %v2978_v23, 2102212464  ;;  %v2993_v38 = vsel %vm2985_vm13, %v2972_v17, %v2975_v58  ;;  %v2994_v63 = vsel %vm2988_vm0, %v2981_v48, 920167782 }
 0x2fe   : > { %v2917_v39 = vclz %v4009_v62  ;;  %vm2986_vm15 = vcmp.lt.s32.totalorder %v2966_v34, 2  ;;  %vm2987_vm2 = vcmp.lt.s32.totalorder %v2966_v34, 3  ;;  %v2989_v13 = vsel %vm2985_vm13, %v2969_v40, %v2972_v17 }
 0x2ff   : > { %v2991_v19 = vsel %vm2987_vm2, %v2975_v58, %v2990_v24  ;;  %v2995_v54 = vsel %vm2987_vm2, %v2978_v23, %v2994_v63  ;;  %v2997_v2 = vsel %vm2985_vm13, %v2975_v58, %v2978_v23  ;;  %v2998_v57 = vsel %vm2988_vm0, %v2984_v5, 1326507024 }
 0x300   : > { %v4010_v27 = vadd.s32 4294967294, %v2917_v39  ;;  %v2935_v0 = vsub.s32 4, %v6676_v20  ;;  %v2996_v36 = vsel %vm2986_vm15, %v2993_v38, %v2995_v54  ;;  %v2999_v46 = vsel %vm2987_vm2, %v2981_v48, %v2998_v57 }
 0x301   : > { %vm6705_vm1 = vcmp.le.f32.partialorder %v2849_v32, 0.7853982  ;;  %v3000_v9 = vsel %vm2986_vm15, %v2997_v2, %v2999_v46  ;;  %v6709_v52 = vmul.u32.u64.low %v3001_v28, %v2996_v36  ;;  %v6710_v11 = vmul.u32.u64.high %v3001_v28, %v2996_v36, %v6709_v52 }
 0x302   : > { %vm4011_vm3 = vcmp.lt.s32.totalorder %v4010_v27, 0  ;;  %v2992_v60 = vsel %vm2986_vm15, %v2989_v13, %v2991_v19  ;;  %v6713_v33 = vmul.u32.u64.low %v3001_v28, %v3000_v9  ;;  %v6714_v34 = vmul.u32.u64.high %v3001_v28, %v3000_v9, %v6713_v33 }
 0x303   : > { %vm2844_vm4 = vcmp.eq.s32.totalorder %v6694_v56, 2  ;;  %vm2851_vm5 = vcmp.lt.s32.totalorder %v6452_v47, 0  ;;  %v2920_v59 = vsel %vm4011_vm3, 0, %v4010_v27  ;;  %v3067_v61 = vadd.s32 1, %v4016_v7 }
 0x304   : > { %v2905_v32 = vadd.s32 %v6644_v50, %v6651_v55  ;;  %v2921_v37 = vsub.s32 32, %v2920_v59  ;;  %v2925_v6 = vsub.s32 4294967266, %v2920_v59  ;;  %v2936_v17 = vsel %vm2851_vm5, %v2935_v0, %v6676_v20 }
 0x305   : > { %v3008_v58 = vmul.u32 %v3001_v28, %v2992_v60  ;;  %v3011_v23 = vadd.s32 1, %v6710_v11  ;;  %v3057_v48 = vand.u32 2147483647, %v6460_v25  ;;  %vm3068_vm6 = vcmp.gt.s32.totalorder %v3067_v61, 0 }
 0x306   : > { %v4333_v41 = vpop.eup %4332  ;;  %v2922_v22 = vshll.u32 %v6688_v1, %v2920_v59  ;;  %v2923_v16 = vshrl.u32 %v2905_v32, %v2921_v37  ;;  %v2926_v15 = vadd.s32 127, %v2925_v6  ;;  %vm3010_vm7 = vc.u32 %v6714_v34, %v6709_v52 }
 0x307   : > { %v4335_v50 = vpop.eup %4334  ;;  %v2845_v55 = vxor.u32 2147483648, %v4333_v41  ;;  %v2938_v53 = vsel %vm6705_vm1, 0, %v2936_v17  ;;  %v3012_v20 = vsel %vm3010_vm7, %v3011_v23, %v6710_v11  ;;  %v3069_v28 = vsel %vm3068_vm6, %v3067_v61, 0 }
 0x308   : > { %v2842_v40 = vxor.u32 2147483648, %v4335_v50  ;;  %v2924_v5 = vor.u32 %v2923_v16, %v2922_v22  ;;  %v2927_v7 = vshll.u32 %v2926_v15, 23  ;;  %v3013_v62 = vadd.s32 %v3012_v20, %v3008_v58 }
 0x309   : > { %vm2841_vm9 = vcmp.eq.s32.totalorder %v6694_v56, 0  ;;  %v2846_v1 = vsel %vm2844_vm4, %v2845_v55, %v4335_v50  ;;  %v3064_v24 = vand.u32 8388607, %v3057_v48  ;;  %v3071_v38 = vand.u32 31, %v3069_v28 }
 0x30a   : > { %vm2840_vm10 = vcmp.lt.s32.totalorder %v6694_v56, 2  ;;  %v2843_v63 = vsel %vm2841_vm9, %v4333_v41, %v2842_v40  ;;  %v2928_v39 = vor.u32 4788187, %v2927_v7  ;;  %v3014_v13 = vadd.s32 536870912, %v3013_v62 }
 0x30b   : > { %vm2837_vm11 = vweird.f32 %v6377_v18  ;;  %v2847_v19 = vsel %vm2840_vm10, %v2843_v63, %v2846_v1  ;;  %v2942_v54 = vadd.s32 3, %v2938_v53  ;;  %v3072_v2 = vsub.s32 32, %v3071_v38 }
 0x30c   : > { %v2848_v57 = vsel %vm2837_vm11, nan, %v2847_v19  ;;  %v2929_v27 = vand.u32 2147483647, %v2928_v39  ;;  %v2931_v0 = vcvt.s32.f32 %v2924_v5  ;;  %v6738_v36 = vshrl.u32 %v3014_v13, 30 }
 0x30d   : > { %v3065_v46 = vor.u32 8388608, %v3064_v24  ;;  %v3075_v9 = vshrl.u32 %v4454_v8, %v3072_v2  ;;  %v3078_v11 = vshrl.u32 %v4455_v10, %v3072_v2  ;;  %v3081_v56 = vshrl.u32 %v4456_v12, %v3072_v2  ;;  %3791 = vst [vmem:[%s4951_s10 + $0xb0] sm:$0xff] %v2848_v57 }
 0x30e   : > { %v2932_v60 = vmul.f32 %v2931_v0, %v2929_v27  ;;  %v3016_v33 = vshll.u32 %v6738_v36, 30  ;;  %v3074_v18 = vshll.u32 %v4453_v4, %v3071_v38  ;;  %v3077_v59 = vshll.u32 %v4454_v8, %v3071_v38 }
 0x30f   : > { %v3070_v61 = vshrl.u32 %v3069_v28, 5  ;;  %v3080_v32 = vshll.u32 %v4455_v10, %v3071_v38  ;;  %v3083_v37 = vshll.u32 %v4456_v12, %v3071_v38  ;;  %v3084_v6 = vshrl.u32 %v4457_v14, %v3072_v2 }
 0x310   : > { %v2933_v17 = vxor.u32 2147483648, %v2932_v60  ;;  %v6750_v58 = vsub.s32 %v3013_v62, %v3016_v33  ;;  %v3076_v23 = vor.u32 %v3075_v9, %v3074_v18  ;;  %v3079_v41 = vor.u32 %v3078_v11, %v3077_v59 }
 0x311   : > { %v3082_v22 = vor.u32 %v3081_v56, %v3080_v32  ;;  %v3085_v16 = vor.u32 %v3084_v6, %v3083_v37  ;;  %v3086_v15 = vshll.u32 %v4457_v14, %v3071_v38  ;;  %v3087_v50 = vshrl.u32 %v7389_v44, %v3072_v2 }
 0x312   : > { %v2934_v55 = vsel %vm2851_vm5, %v2933_v17, %v2932_v60  ;;  %v6756_v53 = vand.u32 3, %v2942_v54  ;;  %v3019_v20 = vsub.s32 0, %v6750_v58  ;;  %v3105_v28 = vshll.u32 %v3065_v46, 8 }
 0x313   : > { %v2937_v40 = vsel %vm6705_vm1, %v6452_v47, %v2934_v55  ;;  %v3073_v5 = vshrl.u32 %v4453_v4, %v3072_v2  ;;  %v3088_v7 = vor.u32 %v3087_v50, %v3086_v15  ;;  %v3164_v62 = vand.u32 2139095040, %v6464_v49 }
 0x314   : > { %4336 = vcosq.f32 %v2937_v40  ;;  %v4013_v1 = vmin.u32 %v3019_v20, %v6750_v58  ;;  %vm3089_vm8 = vcmp.lt.s32.totalorder %v3070_v61, 1  ;;  %vm3092_vm14 = vcmp.lt.s32.totalorder %v3070_v61, 4 }
 0x315   : > { %4338 = vsinq.f32 %v2937_v40  ;;  %v3094_v24 = vsel %vm3092_vm14, %v3082_v22, 2102212464  ;;  %v3097_v38 = vsel %vm3089_vm8, %v3076_v23, %v3079_v41  ;;  %v3098_v63 = vsel %vm3092_vm14, %v3085_v16, 920167782 }
 0x316   : > { %v3021_v39 = vclz %v4013_v1  ;;  %vm3090_vm12 = vcmp.lt.s32.totalorder %v3070_v61, 2  ;;  %vm3091_vm13 = vcmp.lt.s32.totalorder %v3070_v61, 3  ;;  %v3093_v13 = vsel %vm3089_vm8, %v3073_v5, %v3076_v23 }
 0x317   : > { %v3095_v21 = vsel %vm3091_vm13, %v3079_v41, %v3094_v24  ;;  %v3099_v19 = vsel %vm3091_vm13, %v3082_v22, %v3098_v63  ;;  %v3101_v54 = vsel %vm3089_vm8, %v3079_v41, %v3082_v22  ;;  %v3102_v2 = vsel %vm3092_vm14, %v3088_v7, 1326507024 }
 0x318   : > { %v4014_v57 = vadd.s32 4294967294, %v3021_v39  ;;  %v3039_v27 = vsub.s32 4, %v6738_v36  ;;  %v3100_v0 = vsel %vm3090_vm12, %v3097_v38, %v3099_v19  ;;  %v3103_v46 = vsel %vm3091_vm13, %v3085_v16, %v3102_v2 }
 0x319   : > { %v3096_v9 = vsel %vm3090_vm12, %v3093_v13, %v3095_v21  ;;  %v3104_v11 = vsel %vm3090_vm12, %v3101_v54, %v3103_v46  ;;  %v6766_v56 = vmul.u32.u64.low %v3105_v28, %v3100_v0  ;;  %v6767_v60 = vmul.u32.u64.high %v3105_v28, %v3100_v0, %v6766_v56 }
 0x31a   : > { %vm4015_vm0 = vcmp.lt.s32.totalorder %v4014_v57, 0  ;;  %v6770_v33 = vmul.u32.u64.low %v3105_v28, %v3104_v11  ;;  %v6771_v18 = vmul.u32.u64.high %v3105_v28, %v3104_v11, %v6770_v33  ;;  %v3165_v59 = vshrl.u32 %v3164_v62, 23 }
 0x31b   : > { %vm2941_vm15 = vweird.f32 %v6452_v47  ;;  %vm6776_vm2 = vcmp.le.f32.partialorder %v2953_v45, 0.7853982  ;;  %vm2955_vm1 = vcmp.lt.s32.totalorder %v6456_v42, 0  ;;  %v3009_v32 = vadd.s32 %v6709_v52, %v6714_v34 }
 0x31c   : > { %v3024_v37 = vsel %vm4015_vm0, 0, %v4014_v57  ;;  %v3040_v23 = vsel %vm2955_vm1, %v3039_v27, %v6738_v36  ;;  %v4020_v41 = vadd.s32 4294967169, %v3165_v59  ;;  %vm2948_vm3 = vcmp.eq.s32.totalorder %v6756_v53, 2 }
 0x31d   : > { %v3025_v6 = vsub.s32 32, %v3024_v37  ;;  %v3029_v17 = vsub.s32 4294967266, %v3024_v37  ;;  %v3112_v22 = vmul.u32 %v3105_v28, %v3096_v9  ;;  %v3115_v45 = vadd.s32 1, %v6767_v60 }
 0x31e   : > { %v3161_v16 = vand.u32 2147483647, %v6464_v49  ;;  %v4337_v15 = vpop.eup %4336  ;;  %v3026_v50 = vshll.u32 %v6750_v58, %v3024_v37  ;;  %vm3114_vm4 = vc.u32 %v6771_v18, %v6766_v56  ;;  %v3042_v36 = vsel %vm6776_vm2, 0, %v3040_v23 }
 0x31f   : > { %v3027_v55 = vshrl.u32 %v3009_v32, %v3025_v6  ;;  %v3030_v52 = vadd.s32 127, %v3029_v17  ;;  %v4339_v34 = vpop.eup %4338  ;;  %v2949_v20 = vxor.u32 2147483648, %v4337_v15  ;;  %v3116_v40 = vsel %vm3114_vm4, %v3115_v45, %v6767_v60 }
 0x320   : > { %v3171_v28 = vadd.s32 1, %v4020_v41  ;;  %v2946_v5 = vxor.u32 2147483648, %v4339_v34  ;;  %v3117_v1 = vadd.s32 %v3116_v40, %v3112_v22  ;;  %vm2944_vm5 = vcmp.lt.s32.totalorder %v6756_v53, 2 }
 0x321   : > { %v3028_v7 = vor.u32 %v3027_v55, %v3026_v50  ;;  %v3031_v62 = vshll.u32 %v3030_v52, 23  ;;  %vm2945_vm6 = vcmp.eq.s32.totalorder %v6756_v53, 0  ;;  %v2950_v58 = vsel %vm2948_vm3, %v2949_v20, %v4339_v34 }
 0x322   : > { %vm3172_vm7 = vcmp.gt.s32.totalorder %v3171_v28, 0  ;;  %v2947_v24 = vsel %vm2945_vm6, %v4337_v15, %v2946_v5  ;;  %v3046_v63 = vadd.s32 3, %v3042_v36  ;;  %v3118_v39 = vadd.s32 536870912, %v3117_v1 }
 0x323   : > { %v3032_v38 = vor.u32 4788187, %v3031_v62  ;;  %v2951_v13 = vsel %vm2944_vm5, %v2947_v24, %v2950_v58  ;;  %v3168_v21 = vand.u32 8388607, %v3161_v16  ;;  %v3173_v19 = vsel %vm3172_vm7, %v3171_v28, 0 }
 0x324   : > { %v3268_v54 = vand.u32 2139095040, %v6555_v29  ;;  %v2952_v2 = vsel %vm2941_vm15, nan, %v2951_v13  ;;  %v3035_v27 = vcvt.s32.f32 %v3028_v7  ;;  %v6804_v53 = vshrl.u32 %v3118_v39, 30 }
 0x325   : > { %v3033_v57 = vand.u32 2147483647, %v3032_v38  ;;  %v6808_v0 = vmul.f32 %v5962_v43, %v4624_v30  ;;  %v6812_v46 = vmul.f32 %v5951_v51, %v4626_v31  ;;  %v3175_v9 = vand.u32 31, %v3173_v19  ;;  %3792 = vst [vmem:[%s4951_s10 + $0xb8] sm:$0xff] %v2952_v2 }
 0x326   : > { %v6817_v11 = vmul.f32 %v5962_v43, %v4626_v31  ;;  %v6821_v47 = vadd.f32 %v6448_v26, %v5531_v35  ;;  %v3120_v33 = vshll.u32 %v6804_v53, 30  ;;  %v6824_v59 = vand.u32 3, %v3046_v63 }
 0x327   : > { %v3036_v60 = vmul.f32 %v3035_v27, %v3033_v57  ;;  %v3169_v30 = vor.u32 8388608, %v3168_v21  ;;  %v3176_v32 = vsub.s32 32, %v3175_v9  ;;  %v3265_v51 = vand.u32 2147483647, %v6555_v29 }
 0x328   : > { %v6827_v6 = vsub.s32 %v3117_v1, %v3120_v33  ;;  %v6829_v17 = vshrl.u32 %v3173_v19, 5  ;;  %v3269_v31 = vshrl.u32 %v3268_v54, 23  ;;  %v3178_v43 = vshll.u32 %v4453_v4, %v3175_v9 }
 0x329   : > { %v3037_v37 = vxor.u32 2147483648, %v3036_v60  ;;  %v3179_v26 = vshrl.u32 %v4454_v8, %v3176_v32  ;;  %v3181_v23 = vshll.u32 %v4454_v8, %v3175_v9  ;;  %v3182_v41 = vshrl.u32 %v4455_v10, %v3176_v32 }
 0x32a   : > { %v3123_v45 = vsub.s32 0, %v6827_v6  ;;  %v3184_v15 = vshll.u32 %v4455_v10, %v3175_v9  ;;  %v3185_v50 = vshrl.u32 %v4456_v12, %v3176_v32  ;;  %v3187_v34 = vshll.u32 %v4456_v12, %v3175_v9 }
 0x32b   : > { %v3038_v22 = vsel %vm2955_vm1, %v3037_v37, %v3036_v60  ;;  %v3180_v52 = vor.u32 %v3179_v26, %v3178_v43  ;;  %v3188_v20 = vshrl.u32 %v4457_v14, %v3176_v32  ;;  %v3183_v40 = vor.u32 %v3182_v41, %v3181_v23 }
 0x32c   : > { %v3041_v55 = vsel %vm6776_vm2, %v6456_v42, %v3038_v22  ;;  %v4017_v36 = vmin.u32 %v3123_v45, %v6827_v6  ;;  %v3186_v28 = vor.u32 %v3185_v50, %v3184_v15  ;;  %v3190_v7 = vshll.u32 %v4457_v14, %v3175_v9 }
 0x32d   : > { %4340 = vcosq.f32 %v3041_v55  ;;  %v3189_v5 = vor.u32 %v3188_v20, %v3187_v34  ;;  %v3191_v62 = vshrl.u32 %v7389_v44, %v3176_v32  ;;  %v3113_v61 = vadd.s32 %v6766_v56, %v6771_v18 }
 0x32e   : > { %4342 = vsinq.f32 %v3041_v55  ;;  %v3125_v1 = vclz %v4017_v36  ;;  %v6850_v58 = vshll.u32 %v3169_v30, 8  ;;  %v4024_v24 = vadd.s32 4294967169, %v3269_v31 }
 0x32f   : > { %v3143_v38 = vsub.s32 4, %v6804_v53  ;;  %v3177_v63 = vshrl.u32 %v4453_v4, %v3176_v32  ;;  %v3192_v39 = vor.u32 %v3191_v62, %v3190_v7  ;;  %vm3193_vm9 = vcmp.lt.s32.totalorder %v6829_v17, 1 }
 0x330   : > { %vm3059_vm10 = vcmp.lt.s32.totalorder %v6460_v25, 0  ;;  %v4018_v13 = vadd.s32 4294967294, %v3125_v1  ;;  %vm3195_vm11 = vcmp.lt.s32.totalorder %v6829_v17, 3  ;;  %vm3196_vm8 = vcmp.lt.s32.totalorder %v6829_v17, 4 }
 0x331   : > { %v3201_v56 = vsel %vm3193_vm9, %v3180_v52, %v3183_v40  ;;  %vm3049_vm14 = vcmp.eq.s32.totalorder %v6824_v59, 0  ;;  %v3198_v18 = vsel %vm3196_vm8, %v3186_v28, 2102212464  ;;  %v3202_v21 = vsel %vm3196_vm8, %v3189_v5, 920167782 }
 0x332   : > { %v3205_v19 = vsel %vm3193_vm9, %v3183_v40, %v3186_v28  ;;  %v3206_v54 = vsel %vm3196_vm8, %v3192_v39, 1326507024  ;;  %vm3048_vm12 = vcmp.lt.s32.totalorder %v6824_v59, 2  ;;  %vm4019_vm13 = vcmp.lt.s32.totalorder %v4018_v13, 0 }
 0x333   : > { %vm3194_vm0 = vcmp.lt.s32.totalorder %v6829_v17, 2  ;;  %v3203_v2 = vsel %vm3195_vm11, %v3186_v28, %v3202_v21  ;;  %v3207_v57 = vsel %vm3195_vm11, %v3189_v5, %v3206_v54  ;;  %vm3045_vm15 = vweird.f32 %v6456_v42 }
 0x334   : > { %v3128_v27 = vsel %vm4019_vm13, 0, %v4018_v13  ;;  %v3197_v9 = vsel %vm3193_vm9, %v3177_v63, %v3180_v52  ;;  %v3204_v60 = vsel %vm3194_vm0, %v3201_v56, %v3203_v2  ;;  %v3208_v33 = vsel %vm3194_vm0, %v3205_v19, %v3207_v57 }
 0x335   : > { %vm6878_vm2 = vcmp.le.f32.partialorder %v3057_v48, 0.7853982  ;;  %v3129_v32 = vsub.s32 32, %v3128_v27  ;;  %v3133_v37 = vsub.s32 4294967266, %v3128_v27  ;;  %v3199_v31 = vsel %vm3195_vm11, %v3183_v40, %v3198_v18 }
 0x336   : > { %v3275_v43 = vadd.s32 1, %v4024_v24  ;;  %v6885_v26 = vmul.u32.u64.low %v6850_v58, %v3208_v33  ;;  %v6886_v23 = vmul.u32.u64.high %v6850_v58, %v3208_v33, %v6885_v26  ;;  %v3130_v48 = vshll.u32 %v6827_v6, %v3128_v27 }
 0x337   : > { %v6889_v41 = vmul.u32.u64.low %v6850_v58, %v3204_v60  ;;  %v6890_v22 = vmul.u32.u64.high %v6850_v58, %v3204_v60, %v6889_v41  ;;  %v4341_v45 = vpop.eup %4340  ;;  %v3131_v15 = vshrl.u32 %v3113_v61, %v3129_v32  ;;  %v3134_v50 = vadd.s32 127, %v3133_v37 }
 0x338   : > { %vm3276_vm1 = vcmp.gt.s32.totalorder %v3275_v43, 0  ;;  %v4343_v55 = vpop.eup %4342  ;;  %v3053_v52 = vxor.u32 2147483648, %v4341_v45  ;;  %v3200_v34 = vsel %vm3194_vm0, %v3197_v9, %v3199_v31  ;;  %v3272_v20 = vand.u32 8388607, %v3265_v51 }
 0x339   : > { %v3277_v36 = vsel %vm3276_vm1, %v3275_v43, 0  ;;  %v3050_v40 = vxor.u32 2147483648, %v4343_v55  ;;  %vm3052_vm3 = vcmp.eq.s32.totalorder %v6824_v59, 2  ;;  %v3132_v28 = vor.u32 %v3131_v15, %v3130_v48 }
 0x33a   : > { %v3135_v5 = vshll.u32 %v3134_v50, 23  ;;  %v3054_v7 = vsel %vm3052_vm3, %v3053_v52, %v4343_v55  ;;  %v3144_v6 = vsel %vm3059_vm10, %v3143_v38, %v6804_v53  ;;  %vm3218_vm4 = vc.u32 %v6886_v23, %v6889_v41 }
 0x33b   : > { %v3219_v17 = vadd.s32 1, %v6890_v22  ;;  %v3051_v62 = vsel %vm3049_vm14, %v4341_v45, %v3050_v40  ;;  %v3216_v1 = vmul.u32 %v6850_v58, %v3200_v34  ;;  %v3279_v24 = vand.u32 31, %v3277_v36 }
 0x33c   : > { %v3136_v61 = vor.u32 4788187, %v3135_v5  ;;  %v3055_v63 = vsel %vm3048_vm12, %v3051_v62, %v3054_v7  ;;  %v3139_v39 = vcvt.s32.f32 %v3132_v28  ;;  %v3273_v53 = vor.u32 8388608, %v3272_v20 }
 0x33d   : > { %v3220_v13 = vsel %vm3218_vm4, %v3219_v17, %v6890_v22  ;;  %v3056_v38 = vsel %vm3045_vm15, nan, %v3055_v63  ;;  %v3280_v21 = vsub.s32 32, %v3279_v24  ;;  %v3146_v19 = vsel %vm6878_vm2, 0, %v3144_v6 }
 0x33e   : > { %v3137_v56 = vand.u32 2147483647, %v3136_v61  ;;  %v3221_v18 = vadd.s32 %v3220_v13, %v3216_v1  ;;  %v6915_v54 = vshrl.u32 %v3277_v36, 5  ;;  %v3282_v58 = vshll.u32 %v4453_v4, %v3279_v24  ;;  %3793 = vst [vmem:[%s4951_s10 + $0xc0] sm:$0xff] %v3056_v38 }
 0x33f   : > { %v3285_v59 = vshll.u32 %v4454_v8, %v3279_v24  ;;  %v3283_v27 = vshrl.u32 %v4454_v8, %v3280_v21  ;;  %v3288_v42 = vshll.u32 %v4455_v10, %v3279_v24  ;;  %vm3163_vm5 = vcmp.lt.s32.totalorder %v6464_v49, 0 }
 0x340   : > { %v3140_v2 = vmul.f32 %v3139_v39, %v3137_v56  ;;  %v3222_v57 = vadd.s32 536870912, %v3221_v18  ;;  %v3286_v9 = vshrl.u32 %v4455_v10, %v3280_v21  ;;  %v3289_v60 = vshrl.u32 %v4456_v12, %v3280_v21 }
 0x341   : > { %v3291_v33 = vshll.u32 %v4456_v12, %v3279_v24  ;;  %v3292_v32 = vshrl.u32 %v4457_v14, %v3280_v21  ;;  %v3284_v43 = vor.u32 %v3283_v27, %v3282_v58  ;;  %v3295_v26 = vshrl.u32 %v7389_v44, %v3280_v21 }
 0x342   : > { %v3141_v37 = vxor.u32 2147483648, %v3140_v2  ;;  %v3223_v31 = vshrl.u32 %v3222_v57, 30  ;;  %v3287_v22 = vor.u32 %v3286_v9, %v3285_v59  ;;  %v3294_v48 = vshll.u32 %v4457_v14, %v3279_v24 }
 0x343   : > { %v3293_v45 = vor.u32 %v3292_v32, %v3291_v33  ;;  %v6929_v15 = vshll.u32 %v3273_v53, 8  ;;  %v3150_v55 = vadd.s32 3, %v3146_v19  ;;  %v3290_v34 = vor.u32 %v3289_v60, %v3288_v42 }
 0x344   : > { %v3142_v50 = vsel %vm3059_vm10, %v3141_v37, %v3140_v2  ;;  %v3224_v52 = vshll.u32 %v3223_v31, 30  ;;  %v3247_v36 = vsub.s32 4, %v3223_v31  ;;  %v3296_v40 = vor.u32 %v3295_v26, %v3294_v48 }
 0x345   : > { %v3145_v20 = vsel %vm6878_vm2, %v6460_v25, %v3142_v50  ;;  %vm3297_vm6 = vcmp.lt.s32.totalorder %v6915_v54, 1  ;;  %vm3300_vm7 = vcmp.lt.s32.totalorder %v6915_v54, 4  ;;  %vm3299_vm9 = vcmp.lt.s32.totalorder %v6915_v54, 3 }
 0x346   : > { %4344 = vcosq.f32 %v3145_v20  ;;  %v6937_v28 = vsub.s32 %v3221_v18, %v3224_v52  ;;  %v3305_v5 = vsel %vm3297_vm6, %v3284_v43, %v3287_v22  ;;  %v3306_v7 = vsel %vm3300_vm7, %v3293_v45, 920167782 }
 0x347   : > { %4346 = vsinq.f32 %v3145_v20  ;;  %v3372_v6 = vand.u32 2139095040, %v6821_v47  ;;  %v3151_v30 = vand.u32 3, %v3150_v55  ;;  %vm3298_vm10 = vcmp.lt.s32.totalorder %v6915_v54, 2 }
 0x348   : > { %v3227_v17 = vsub.s32 0, %v6937_v28  ;;  %v3307_v62 = vsel %vm3299_vm9, %v3290_v34, %v3306_v7  ;;  %v3302_v61 = vsel %vm3300_vm7, %v3290_v34, 2102212464  ;;  %v3309_v24 = vsel %vm3297_vm6, %v3287_v22, %v3290_v34 }
 0x349   : > { %v3308_v1 = vsel %vm3298_vm10, %v3305_v5, %v3307_v62  ;;  %v3310_v63 = vsel %vm3300_vm7, %v3296_v40, 1326507024  ;;  %v3248_v13 = vsel %vm3163_vm5, %v3247_v36, %v3223_v31  ;;  %v3281_v53 = vshrl.u32 %v4453_v4, %v3280_v21 }
 0x34a   : > { %v4021_v39 = vmin.u32 %v3227_v17, %v6937_v28  ;;  %v3311_v38 = vsel %vm3299_vm9, %v3293_v45, %v3310_v63  ;;  %v6961_v18 = vmul.u32.u64.low %v6929_v15, %v3308_v1  ;;  %v6962_v19 = vmul.u32.u64.high %v6929_v15, %v3308_v1, %v6961_v18 }
 0x34b   : > { %v3312_v56 = vsel %vm3298_vm10, %v3309_v24, %v3311_v38  ;;  %v3373_v58 = vshrl.u32 %v3372_v6, 23  ;;  %v6967_v59 = vadd.f32 %v6808_v0, %v5531_v35  ;;  %v3301_v21 = vsel %vm3297_vm6, %v3281_v53, %v3284_v43 }
 0x34c   : > { %v3229_v2 = vclz %v4021_v39  ;;  %v3303_v57 = vsel %vm3299_vm9, %v3287_v22, %v3302_v61  ;;  %vm6975_vm11 = vcmp.le.f32.partialorder %v3161_v16, 0.7853982  ;;  %vm3149_vm8 = vweird.f32 %v6460_v25 }
 0x34d   : > { %v6980_v42 = vmul.u32.u64.low %v6929_v15, %v3312_v56  ;;  %v6981_v9 = vmul.u32.u64.high %v6929_v15, %v3312_v56, %v6980_v42  ;;  %v4028_v60 = vadd.s32 4294967169, %v3373_v58  ;;  %vm3152_vm14 = vcmp.lt.s32.totalorder %v3151_v30, 2 }
 0x34e   : > { %v4022_v35 = vadd.s32 4294967294, %v3229_v2  ;;  %v3250_v0 = vsel %vm6975_vm11, 0, %v3248_v13  ;;  %vm3153_vm12 = vcmp.eq.s32.totalorder %v3151_v30, 0  ;;  %v3304_v33 = vsel %vm3298_vm10, %v3301_v21, %v3303_v57 }
 0x34f   : > { %v3323_v16 = vadd.s32 1, %v6962_v19  ;;  %v3379_v32 = vadd.s32 1, %v4028_v60  ;;  %vm3156_vm13 = vcmp.eq.s32.totalorder %v3151_v30, 2  ;;  %v3217_v31 = vadd.s32 %v6889_v41, %v6886_v23 }
 0x350   : > { %v4345_v37 = vpop.eup %4344  ;;  %vm4023_vm0 = vcmp.lt.s32.totalorder %v4022_v35, 0  ;;  %v3369_v43 = vand.u32 2147483647, %v6821_v47  ;;  %v3254_v48 = vadd.s32 3, %v3250_v0  ;;  %vm3322_vm15 = vc.u32 %v6981_v9, %v6961_v18 }
 0x351   : > { %v4347_v26 = vpop.eup %4346  ;;  %v3157_v22 = vxor.u32 2147483648, %v4345_v37  ;;  %v3232_v45 = vsel %vm4023_vm0, 0, %v4022_v35  ;;  %v3320_v52 = vmul.u32 %v6929_v15, %v3304_v33  ;;  %v3324_v23 = vsel %vm3322_vm15, %v3323_v16, %v6962_v19 }
 0x352   : > { %v3154_v54 = vxor.u32 2147483648, %v4347_v26  ;;  %v3233_v50 = vsub.s32 32, %v3232_v45  ;;  %v3237_v55 = vsub.s32 4294967266, %v3232_v45  ;;  %v3234_v20 = vshll.u32 %v6937_v28, %v3232_v45 }
 0x353   : > { %v3158_v34 = vsel %vm3156_vm13, %v3157_v22, %v4347_v26  ;;  %vm3380_vm2 = vcmp.gt.s32.totalorder %v3379_v32, 0  ;;  %v3325_v5 = vadd.s32 %v3324_v23, %v3320_v52  ;;  %v3376_v6 = vand.u32 8388607, %v3369_v43 }
 0x354   : > { %v3155_v41 = vsel %vm3153_vm12, %v4345_v37, %v3154_v54  ;;  %v3235_v36 = vshrl.u32 %v3217_v31, %v3233_v50  ;;  %v3238_v40 = vadd.s32 127, %v3237_v55  ;;  %v3381_v17 = vsel %vm3380_vm2, %v3379_v32, 0 }
 0x355   : > { %v3159_v7 = vsel %vm3152_vm14, %v3155_v41, %v3158_v34  ;;  %v3473_v15 = vand.u32 2147483647, %v6967_v59  ;;  %v3326_v1 = vadd.s32 536870912, %v3325_v5  ;;  %v3383_v24 = vand.u32 31, %v3381_v17 }
 0x356   : > { %v3160_v28 = vsel %vm3149_vm8, nan, %v3159_v7  ;;  %v3236_v62 = vor.u32 %v3235_v36, %v3234_v20  ;;  %v3239_v61 = vshll.u32 %v3238_v40, 23  ;;  %v7007_v63 = vadd.f32 %v6812_v46, %v5677_v3 }
 0x357   : > { %3794 = vst [vmem:[%s4951_s10 + $0xc8] sm:$0xff] %v3160_v28  ;;  %v7011_v30 = vadd.f32 %v6817_v11, %v5677_v3  ;;  %v7013_v13 = vshrl.u32 %v3326_v1, 30  ;;  %v7015_v53 = vand.u32 3, %v3254_v48  ;;  %v3377_v25 = vor.u32 8388608, %v3376_v6 }
 0x358   : > { %v3240_v39 = vor.u32 4788187, %v3239_v61  ;;  %v3384_v38 = vsub.s32 32, %v3383_v24  ;;  %v3476_v56 = vand.u32 2139095040, %v6967_v59  ;;  %v3243_v58 = vcvt.s32.f32 %v3236_v62 }
 0x359   : > { %v3328_v2 = vshll.u32 %v7013_v13, 30  ;;  %v7021_v46 = vand.u32 8388607, %v3473_v15  ;;  %v3321_v3 = vadd.s32 %v6961_v18, %v6981_v9  ;;  %v3386_v35 = vshll.u32 %v4453_v4, %v3383_v24 }
 0x35a   : > { %v3241_v19 = vand.u32 2147483647, %v3240_v39  ;;  %v3387_v11 = vshrl.u32 %v4454_v8, %v3384_v38  ;;  %v3390_v21 = vshrl.u32 %v4455_v10, %v3384_v38  ;;  %v3393_v57 = vshrl.u32 %v4456_v12, %v3384_v38 }
 0x35b   : > { %v7028_v60 = vsub.s32 %v3325_v5, %v3328_v2  ;;  %v3396_v0 = vshrl.u32 %v4457_v14, %v3384_v38  ;;  %v3382_v33 = vshrl.u32 %v3381_v17, 5  ;;  %v3389_v16 = vshll.u32 %v4454_v8, %v3383_v24 }
 0x35c   : > { %v3244_v42 = vmul.f32 %v3243_v58, %v3241_v19  ;;  %v3392_v32 = vshll.u32 %v4455_v10, %v3383_v24  ;;  %v3477_v37 = vshrl.u32 %v3476_v56, 23  ;;  %v3388_v31 = vor.u32 %v3387_v11, %v3386_v35 }
 0x35d   : > { %v3331_v9 = vsub.s32 0, %v7028_v60  ;;  %v3395_v26 = vshll.u32 %v4456_v12, %v3383_v24  ;;  %v3391_v22 = vor.u32 %v3390_v21, %v3389_v16  ;;  %v3398_v48 = vshll.u32 %v4457_v14, %v3383_v24 }
 0x35e   : > { %v3245_v18 = vxor.u32 2147483648, %v3244_v42  ;;  %v3394_v45 = vor.u32 %v3393_v57, %v3392_v32  ;;  %v3399_v54 = vshrl.u32 %v7389_v44, %v3384_v38  ;;  %v7041_v34 = vshll.u32 %v3377_v25, 8 }
 0x35f   : > { %v4025_v55 = vmin.u32 %v3331_v9, %v7028_v60  ;;  %v3397_v52 = vor.u32 %v3396_v0, %v3395_v26  ;;  %v3385_v23 = vshrl.u32 %v4453_v4, %v3384_v38  ;;  %v4032_v36 = vadd.s32 4294967169, %v3477_v37 }
 0x360   : > { %v3246_v50 = vsel %vm3163_vm5, %v3245_v18, %v3244_v42  ;;  %v3400_v41 = vor.u32 %v3399_v54, %v3398_v48  ;;  %vm3401_vm1 = vcmp.lt.s32.totalorder %v3382_v33, 1  ;;  %vm3404_vm3 = vcmp.lt.s32.totalorder %v3382_v33, 4 }
 0x361   : > { %v3249_v20 = vsel %vm6975_vm11, %v6464_v49, %v3246_v50  ;;  %v3333_v40 = vclz %v4025_v55  ;;  %vm3402_vm4 = vcmp.lt.s32.totalorder %v3382_v33, 2  ;;  %v3406_v5 = vsel %vm3404_vm3, %v3394_v45, 2102212464 }
 0x362   : > { %4348 = vcosq.f32 %v3249_v20  ;;  %v3409_v7 = vsel %vm3401_vm1, %v3388_v31, %v3391_v22  ;;  %vm3403_vm5 = vcmp.lt.s32.totalorder %v3382_v33, 3  ;;  %v3410_v17 = vsel %vm3404_vm3, %v3397_v52, 920167782 }
 0x363   : > { %4350 = vsinq.f32 %v3249_v20  ;;  %v4026_v6 = vadd.s32 4294967294, %v3333_v40  ;;  %v3413_v28 = vsel %vm3401_vm1, %v3391_v22, %v3394_v45  ;;  %v3405_v62 = vsel %vm3401_vm1, %v3385_v23, %v3388_v31 }
 0x364   : > { %v3411_v61 = vsel %vm3403_vm5, %v3394_v45, %v3410_v17  ;;  %v3414_v27 = vsel %vm3404_vm3, %v3400_v41, 1326507024  ;;  %v3483_v1 = vadd.s32 1, %v4032_v36  ;;  %vm7049_vm6 = vcmp.le.f32.partialorder %v3265_v51, 0.7853982 }
 0x365   : > { %vm4027_vm7 = vcmp.lt.s32.totalorder %v4026_v6, 0  ;;  %v3407_v39 = vsel %vm3403_vm5, %v3391_v22, %v3406_v5  ;;  %v3412_v25 = vsel %vm3402_vm4, %v3409_v7, %v3411_v61  ;;  %v3415_v38 = vsel %vm3403_vm5, %v3397_v52, %v3414_v27 }
 0x366   : > { %v3336_v56 = vsel %vm4027_vm7, 0, %v4026_v6  ;;  %v3416_v19 = vsel %vm3402_vm4, %v3413_v28, %v3415_v38  ;;  %v7056_v58 = vmul.u32.u64.low %v7041_v34, %v3412_v25  ;;  %v7057_v2 = vmul.u32.u64.high %v7041_v34, %v3412_v25, %v7056_v58 }
 0x367   : > { %v3337_v11 = vsub.s32 32, %v3336_v56  ;;  %v3341_v21 = vsub.s32 4294967266, %v3336_v56  ;;  %v3351_v51 = vsub.s32 4, %v7013_v13  ;;  %vm3484_vm9 = vcmp.gt.s32.totalorder %v3483_v1, 0 }
 0x368   : > { %vm3253_vm10 = vweird.f32 %v6464_v49  ;;  %v3408_v57 = vsel %vm3402_vm4, %v3405_v62, %v3407_v39  ;;  %v7064_v42 = vmul.u32.u64.low %v7041_v34, %v3416_v19  ;;  %v7065_v35 = vmul.u32.u64.high %v7041_v34, %v3416_v19, %v7064_v42 }
 0x369   : > { %v3485_v0 = vsel %vm3484_vm9, %v3483_v1, 0  ;;  %v3338_v16 = vshll.u32 %v7028_v60, %v3336_v56  ;;  %v3339_v32 = vshrl.u32 %v3321_v3, %v3337_v11  ;;  %v3342_v37 = vadd.s32 127, %v3341_v21 }
 0x36a   : > { %v3487_v18 = vand.u32 31, %v3485_v0  ;;  %vm3256_vm11 = vcmp.lt.s32.totalorder %v7015_v53, 2  ;;  %vm3267_vm8 = vcmp.lt.s32.totalorder %v6555_v29, 0  ;;  %v3427_v9 = vadd.s32 1, %v7057_v2 }
 0x36b   : > { %v3481_v31 = vor.u32 8388608, %v7021_v46  ;;  %vm3257_vm14 = vcmp.eq.s32.totalorder %v7015_v53, 0  ;;  %v3340_v26 = vor.u32 %v3339_v32, %v3338_v16  ;;  %v3343_v22 = vshll.u32 %v3342_v37, 23 }
 0x36c   : > { %v4349_v33 = vpop.eup %4348  ;;  %v3352_v60 = vsel %vm3267_vm8, %v3351_v51, %v7013_v13  ;;  %v3424_v48 = vmul.u32 %v7041_v34, %v3408_v57  ;;  %vm3426_vm12 = vc.u32 %v7065_v35, %v7056_v58  ;;  %v3488_v54 = vsub.s32 32, %v3487_v18 }
 0x36d   : > { %v4351_v3 = vpop.eup %4350  ;;  %v3261_v45 = vxor.u32 2147483648, %v4349_v33  ;;  %vm3260_vm13 = vcmp.eq.s32.totalorder %v7015_v53, 2  ;;  %v3344_v46 = vor.u32 4788187, %v3343_v22  ;;  %v3428_v55 = vsel %vm3426_vm12, %v3427_v9, %v7057_v2 }
 0x36e   : > { %v3258_v50 = vxor.u32 2147483648, %v4351_v3  ;;  %v3354_v20 = vsel %vm7049_vm6, 0, %v3352_v60  ;;  %v3429_v23 = vadd.s32 %v3428_v55, %v3424_v48  ;;  %v7083_v13 = vshll.u32 %v3481_v31, 8 }
 0x36f   : > { %v3262_v52 = vsel %vm3260_vm13, %v3261_v45, %v4351_v3  ;;  %v3345_v41 = vand.u32 2147483647, %v3344_v46  ;;  %v3347_v36 = vcvt.s32.f32 %v3340_v26  ;;  %v7087_v40 = vshrl.u32 %v3485_v0, 5 }
 0x370   : > { %v3259_v34 = vsel %vm3257_vm14, %v4349_v33, %v3258_v50  ;;  %v3430_v7 = vadd.s32 536870912, %v3429_v23  ;;  %v3491_v6 = vshrl.u32 %v4454_v8, %v3488_v54  ;;  %v3494_v17 = vshrl.u32 %v4455_v10, %v3488_v54 }
 0x371   : > { %v3263_v5 = vsel %vm3256_vm11, %v3259_v34, %v3262_v52  ;;  %v3348_v62 = vmul.f32 %v3347_v36, %v3345_v41  ;;  %v3490_v61 = vshll.u32 %v4453_v4, %v3487_v18  ;;  %v3497_v27 = vshrl.u32 %v4456_v12, %v3488_v54 }
 0x372   : > { %v3264_v28 = vsel %vm3253_vm10, nan, %v3263_v5  ;;  %v3431_v1 = vshrl.u32 %v3430_v7, 30  ;;  %v3493_v39 = vshll.u32 %v4454_v8, %v3487_v18  ;;  %v3496_v25 = vshll.u32 %v4455_v10, %v3487_v18 }
 0x373   : > { %v3500_v53 = vshrl.u32 %v4457_v14, %v3488_v54  ;;  %3795 = vst [vmem:[%s4951_s10 + $0xd0] sm:$0xff] %v3264_v28  ;;  %v3349_v38 = vxor.u32 2147483648, %v3348_v62  ;;  %v3499_v56 = vshll.u32 %v4456_v12, %v3487_v18  ;;  %v3502_v19 = vshll.u32 %v4457_v14, %v3487_v18 }
 0x374   : > { %v3503_v49 = vshrl.u32 %v7389_v44, %v3488_v54  ;;  %v3358_v2 = vadd.s32 3, %v3354_v20  ;;  %v3432_v11 = vshll.u32 %v3431_v1, 30  ;;  %v3492_v21 = vor.u32 %v3491_v6, %v3490_v61 }
 0x375   : > { %v3495_v51 = vor.u32 %v3494_v17, %v3493_v39  ;;  %v3350_v57 = vsel %vm3267_vm8, %v3349_v38, %v3348_v62  ;;  %vm3371_vm0 = vcmp.lt.s32.totalorder %v6821_v47, 0  ;;  %v3498_v42 = vor.u32 %v3497_v27, %v3496_v25 }
 0x376   : > { %v3501_v0 = vor.u32 %v3500_v53, %v3499_v56  ;;  %v3504_v16 = vor.u32 %v3503_v49, %v3502_v19  ;;  %v3353_v32 = vsel %vm7049_vm6, %v6555_v29, %v3350_v57  ;;  %v7110_v37 = vsub.s32 %v3429_v23, %v3432_v11 }
 0x377   : > { %v3489_v18 = vshrl.u32 %v4453_v4, %v3488_v54  ;;  %v3580_v9 = vand.u32 2139095040, %v7007_v63  ;;  %4352 = vcosq.f32 %v3353_v32  ;;  %vm3505_vm15 = vcmp.lt.s32.totalorder %v7087_v40, 1 }
 0x378   : > { %vm3506_vm2 = vcmp.lt.s32.totalorder %v7087_v40, 2  ;;  %vm3507_vm1 = vcmp.lt.s32.totalorder %v7087_v40, 3  ;;  %4354 = vsinq.f32 %v3353_v32  ;;  %v3435_v31 = vsub.s32 0, %v7110_v37 }
 0x379   : > { %vm3508_vm3 = vcmp.lt.s32.totalorder %v7087_v40, 4  ;;  %v3513_v24 = vsel %vm3505_vm15, %v3492_v21, %v3495_v51  ;;  %v3517_v22 = vsel %vm3505_vm15, %v3495_v51, %v3498_v42  ;;  %v3455_v45 = vsub.s32 4, %v3431_v1 }
 0x37a   : > { %v3510_v33 = vsel %vm3508_vm3, %v3498_v42, 2102212464  ;;  %v3514_v26 = vsel %vm3508_vm3, %v3501_v0, 920167782  ;;  %v3518_v60 = vsel %vm3508_vm3, %v3504_v16, 1326507024  ;;  %v4029_v3 = vmin.u32 %v3435_v31, %v7110_v37 }
 0x37b   : > { %v3515_v48 = vsel %vm3507_vm1, %v3498_v42, %v3514_v26  ;;  %v3519_v54 = vsel %vm3507_vm1, %v3501_v0, %v3518_v60  ;;  %v3359_v50 = vand.u32 3, %v3358_v2  ;;  %v3581_v52 = vshrl.u32 %v3580_v9, 23 }
 0x37c   : > { %v3516_v46 = vsel %vm3506_vm2, %v3513_v24, %v3515_v48  ;;  %v3520_v55 = vsel %vm3506_vm2, %v3517_v22, %v3519_v54  ;;  %v3437_v20 = vclz %v4029_v3  ;;  %v3509_v23 = vsel %vm3505_vm15, %v3489_v18, %v3492_v21 }
 0x37d   : > { %v3511_v34 = vsel %vm3507_vm1, %v3495_v51, %v3510_v33  ;;  %v3577_v41 = vand.u32 2147483647, %v7007_v63  ;;  %v7138_v36 = vmul.u32.u64.low %v7083_v13, %v3520_v55  ;;  %v7139_v5 = vmul.u32.u64.high %v7083_v13, %v3520_v55, %v7138_v36 }
 0x37e   : > { %v7142_v7 = vmul.u32.u64.low %v7083_v13, %v3516_v46  ;;  %v7143_v6 = vmul.u32.u64.high %v7083_v13, %v3516_v46, %v7142_v7  ;;  %vm3357_vm4 = vweird.f32 %v6555_v29  ;;  %v4030_v17 = vadd.s32 4294967294, %v3437_v20 }
 0x37f   : > { %v3456_v28 = vsel %vm3371_vm0, %v3455_v45, %v3431_v1  ;;  %v4036_v62 = vadd.s32 4294967169, %v3581_v52  ;;  %vm3361_vm5 = vcmp.eq.s32.totalorder %v3359_v50, 0  ;;  %vm3364_vm6 = vcmp.eq.s32.totalorder %v3359_v50, 2 }
 0x380   : > { %vm7151_vm7 = vcmp.le.f32.partialorder %v3369_v43, 0.7853982  ;;  %v3512_v27 = vsel %vm3506_vm2, %v3509_v23, %v3511_v34  ;;  %v3425_v39 = vadd.s32 %v7056_v58, %v7065_v35  ;;  %vm4031_vm9 = vcmp.lt.s32.totalorder %v4030_v17, 0 }
 0x381   : > { %v3584_v25 = vand.u32 8388607, %v3577_v41  ;;  %v3587_v1 = vadd.s32 1, %v4036_v62  ;;  %v4353_v53 = vpop.eup %4352  ;;  %v3440_v38 = vsel %vm4031_vm9, 0, %v4030_v17  ;;  %v3458_v56 = vsel %vm7151_vm7, 0, %v3456_v28 }
 0x382   : > { %vm3530_vm10 = vc.u32 %v7139_v5, %v7142_v7  ;;  %v3531_v43 = vadd.s32 1, %v7143_v6  ;;  %v4355_v40 = vpop.eup %4354  ;;  %v3365_v19 = vxor.u32 2147483648, %v4353_v53  ;;  %v3441_v49 = vsub.s32 32, %v3440_v38 }
 0x383   : > { %v3445_v2 = vsub.s32 4294967266, %v3440_v38  ;;  %v3528_v58 = vmul.u32 %v7083_v13, %v3512_v27  ;;  %v3362_v35 = vxor.u32 2147483648, %v4355_v40  ;;  %v3442_v11 = vshll.u32 %v7110_v37, %v3440_v38 }
 0x384   : > { %v3532_v21 = vsel %vm3530_vm10, %v3531_v43, %v7143_v6  ;;  %vm3588_vm11 = vcmp.gt.s32.totalorder %v3587_v1, 0  ;;  %v3366_v51 = vsel %vm3364_vm6, %v3365_v19, %v4355_v40  ;;  %v3443_v57 = vshrl.u32 %v3425_v39, %v3441_v49 }
 0x385   : > { %v3446_v42 = vadd.s32 127, %v3445_v2  ;;  %v3533_v0 = vadd.s32 %v3532_v21, %v3528_v58  ;;  %vm3360_vm8 = vcmp.lt.s32.totalorder %v3359_v50, 2  ;;  %v3363_v16 = vsel %vm3361_vm5, %v4353_v53, %v3362_v35 }
 0x386   : > { %v3462_v32 = vadd.s32 3, %v3458_v56  ;;  %v3589_v18 = vsel %vm3588_vm11, %v3587_v1, 0  ;;  %v3367_v9 = vsel %vm3360_vm8, %v3363_v16, %v3366_v51  ;;  %v3444_v31 = vor.u32 %v3443_v57, %v3442_v11 }
 0x387   : > { %v3447_v13 = vshll.u32 %v3446_v42, 23  ;;  %v3534_v24 = vadd.s32 536870912, %v3533_v0  ;;  %v3368_v37 = vsel %vm3357_vm4, nan, %v3367_v9  ;;  %v3585_v33 = vor.u32 8388608, %v3584_v25 }
 0x388   : > { %v3591_v26 = vand.u32 31, %v3589_v18  ;;  %3796 = vst [vmem:[%s4951_s10 + $0xd8] sm:$0xff] %v3368_v37  ;;  %v3684_v45 = vand.u32 2139095040, %v7011_v30  ;;  %v3451_v54 = vcvt.s32.f32 %v3444_v31  ;;  %v7177_v50 = vand.u32 3, %v3462_v32 }
 0x389   : > { %v3448_v22 = vor.u32 4788187, %v3447_v13  ;;  %v7173_v60 = vshrl.u32 %v3534_v24, 30  ;;  %v7183_v20 = vshll.u32 %v3585_v33, 8  ;;  %v3590_v17 = vshrl.u32 %v3589_v18, 5 }
 0x38a   : > { %v3592_v3 = vsub.s32 32, %v3591_v26  ;;  %v3594_v36 = vshll.u32 %v4453_v4, %v3591_v26  ;;  %v3597_v28 = vshll.u32 %v4454_v8, %v3591_v26  ;;  %v3600_v62 = vshll.u32 %v4455_v10, %v3591_v26 }
 0x38b   : > { %v3449_v48 = vand.u32 2147483647, %v3448_v22  ;;  %v3536_v46 = vshll.u32 %v7173_v60, 30  ;;  %v3685_v27 = vshrl.u32 %v3684_v45, 23  ;;  %v3603_v53 = vshll.u32 %v4456_v12, %v3591_v26 }
 0x38c   : > { %v3595_v55 = vshrl.u32 %v4454_v8, %v3592_v3  ;;  %v3598_v29 = vshrl.u32 %v4455_v10, %v3592_v3  ;;  %v3601_v52 = vshrl.u32 %v4456_v12, %v3592_v3  ;;  %v3604_v6 = vshrl.u32 %v4457_v14, %v3592_v3 }
 0x38d   : > { %v3452_v23 = vmul.f32 %v3451_v54, %v3449_v48  ;;  %v7185_v34 = vsub.s32 %v3533_v0, %v3536_v46  ;;  %v3606_v43 = vshll.u32 %v4457_v14, %v3591_v26  ;;  %v3607_v40 = vshrl.u32 %v7389_v44, %v3592_v3 }
 0x38e   : > { %v3596_v1 = vor.u32 %v3595_v55, %v3594_v36  ;;  %v3599_v38 = vor.u32 %v3598_v29, %v3597_v28  ;;  %v3602_v56 = vor.u32 %v3601_v52, %v3600_v62  ;;  %v3529_v49 = vadd.s32 %v7142_v7, %v7139_v5 }
 0x38f   : > { %v3453_v39 = vxor.u32 2147483648, %v3452_v23  ;;  %v3539_v25 = vsub.s32 0, %v7185_v34  ;;  %v3605_v58 = vor.u32 %v3604_v6, %v3603_v53  ;;  %v3593_v11 = vshrl.u32 %v4453_v4, %v3592_v3 }
 0x390   : > { %v3608_v21 = vor.u32 %v3607_v40, %v3606_v43  ;;  %v4040_v51 = vadd.s32 4294967169, %v3685_v27  ;;  %vm3609_vm14 = vcmp.lt.s32.totalorder %v3590_v17, 1  ;;  %vm3612_vm12 = vcmp.lt.s32.totalorder %v3590_v17, 4 }
 0x391   : > { %v3454_v19 = vsel %vm3371_vm0, %v3453_v39, %v3452_v23  ;;  %v4033_v2 = vmin.u32 %v3539_v25, %v7185_v34  ;;  %vm3475_vm13 = vcmp.lt.s32.totalorder %v6967_v59, 0  ;;  %vm3610_vm0 = vcmp.lt.s32.totalorder %v3590_v17, 2 }
 0x392   : > { %v3457_v35 = vsel %vm7151_vm7, %v6821_v47, %v3454_v19  ;;  %v3614_v5 = vsel %vm3612_vm12, %v3602_v56, 2102212464  ;;  %v3617_v7 = vsel %vm3609_vm14, %v3596_v1, %v3599_v38  ;;  %vm3611_vm15 = vcmp.lt.s32.totalorder %v3590_v17, 3 }
 0x393   : > { %4356 = vcosq.f32 %v3457_v35  ;;  %v3541_v57 = vclz %v4033_v2  ;;  %v3618_v0 = vsel %vm3612_vm12, %v3605_v58, 920167782  ;;  %v3621_v16 = vsel %vm3609_vm14, %v3599_v38, %v3602_v56 }
 0x394   : > { %4358 = vsinq.f32 %v3457_v35  ;;  %v3613_v61 = vsel %vm3609_vm14, %v3593_v11, %v3596_v1  ;;  %v3619_v32 = vsel %vm3611_vm15, %v3602_v56, %v3618_v0  ;;  %v3622_v18 = vsel %vm3612_vm12, %v3608_v21, 1326507024 }
 0x395   : > { %v4034_v42 = vadd.s32 4294967294, %v3541_v57  ;;  %v3691_v9 = vadd.s32 1, %v4040_v51  ;;  %v3615_v31 = vsel %vm3611_vm15, %v3599_v38, %v3614_v5  ;;  %v3620_v13 = vsel %vm3610_vm0, %v3617_v7, %v3619_v32 }
 0x396   : > { %v3623_v24 = vsel %vm3611_vm15, %v3605_v58, %v3622_v18  ;;  %v7208_v26 = vmul.u32.u64.low %v7183_v20, %v3620_v13  ;;  %v7209_v22 = vmul.u32.u64.high %v7183_v20, %v3620_v13, %v7208_v26  ;;  %v3559_v48 = vsub.s32 4, %v7173_v60 }
 0x397   : > { %vm4035_vm2 = vcmp.lt.s32.totalorder %v4034_v42, 0  ;;  %v3624_v33 = vsel %vm3610_vm0, %v3621_v16, %v3623_v24  ;;  %vm3692_vm1 = vcmp.gt.s32.totalorder %v3691_v9, 0  ;;  %vm3461_vm3 = vweird.f32 %v6821_v47 }
 0x398   : > { %v3544_v37 = vsel %vm4035_vm2, 0, %v4034_v42  ;;  %v3616_v54 = vsel %vm3610_vm0, %v3613_v61, %v3615_v31  ;;  %v7216_v46 = vmul.u32.u64.low %v7183_v20, %v3624_v33  ;;  %v7217_v55 = vmul.u32.u64.high %v7183_v20, %v3624_v33, %v7216_v46 }
 0x399   : > { %v3545_v3 = vsub.s32 32, %v3544_v37  ;;  %v3549_v45 = vsub.s32 4294967266, %v3544_v37  ;;  %v3693_v29 = vsel %vm3692_vm1, %v3691_v9, 0  ;;  %v3546_v52 = vshll.u32 %v7185_v34, %v3544_v37 }
 0x39a   : > { %v3695_v6 = vand.u32 31, %v3693_v29  ;;  %vm3464_vm4 = vcmp.lt.s32.totalorder %v7177_v50, 2  ;;  %vm7223_vm5 = vcmp.le.f32.partialorder %v3473_v15, 0.7853982  ;;  %v3635_v17 = vadd.s32 1, %v7209_v22 }
 0x39b   : > { %v3547_v23 = vshrl.u32 %v3529_v49, %v3545_v3  ;;  %v3550_v36 = vadd.s32 127, %v3549_v45  ;;  %v3681_v62 = vand.u32 2147483647, %v7011_v30  ;;  %vm3465_vm6 = vcmp.eq.s32.totalorder %v7177_v50, 0 }
 0x39c   : > { %v3560_v25 = vsel %vm3475_vm13, %v3559_v48, %v7173_v60  ;;  %v3632_v15 = vmul.u32 %v7183_v20, %v3616_v54  ;;  %vm3634_vm7 = vc.u32 %v7217_v55, %v7208_v26  ;;  %v3696_v38 = vsub.s32 32, %v3695_v6 }
 0x39d   : > { %v4357_v27 = vpop.eup %4356  ;;  %v3548_v39 = vor.u32 %v3547_v23, %v3546_v52  ;;  %v3551_v34 = vshll.u32 %v3550_v36, 23  ;;  %vm3468_vm9 = vcmp.eq.s32.totalorder %v7177_v50, 2  ;;  %v3636_v40 = vsel %vm3634_vm7, %v3635_v17, %v7209_v22 }
 0x39e   : > { %v4359_v1 = vpop.eup %4358  ;;  %v3469_v53 = vxor.u32 2147483648, %v4357_v27  ;;  %v3562_v49 = vsel %vm7223_vm5, 0, %v3560_v25  ;;  %v3637_v2 = vadd.s32 %v3636_v40, %v3632_v15  ;;  %v3688_v60 = vand.u32 8388607, %v3681_v62 }
 0x39f   : > { %v3466_v56 = vxor.u32 2147483648, %v4359_v1  ;;  %v3552_v43 = vor.u32 4788187, %v3551_v34  ;;  %v3555_v35 = vcvt.s32.f32 %v3548_v39  ;;  %v3694_v11 = vshrl.u32 %v3693_v29, 5 }
 0x3a0   : > { %v3470_v19 = vsel %vm3468_vm9, %v3469_v53, %v4359_v1  ;;  %v3638_v51 = vadd.s32 536870912, %v3637_v2  ;;  %v3699_v57 = vshrl.u32 %v4454_v8, %v3696_v38  ;;  %v3702_v5 = vshrl.u32 %v4455_v10, %v3696_v38 }
 0x3a1   : > { %v3467_v20 = vsel %vm3465_vm6, %v4357_v27, %v3466_v56  ;;  %v3553_v58 = vand.u32 2147483647, %v3552_v43  ;;  %v3698_v0 = vshll.u32 %v4453_v4, %v3695_v6  ;;  %v3705_v16 = vshrl.u32 %v4456_v12, %v3696_v38 }
 0x3a2   : > { %v3471_v21 = vsel %vm3464_vm4, %v3467_v20, %v3470_v19  ;;  %v7252_v61 = vshrl.u32 %v3638_v51, 30  ;;  %v3701_v32 = vshll.u32 %v4454_v8, %v3695_v6  ;;  %v3704_v50 = vshll.u32 %v4455_v10, %v3695_v6 }
 0x3a3   : > { %v3472_v7 = vsel %vm3461_vm3, nan, %v3471_v21  ;;  %v3556_v42 = vmul.f32 %v3555_v35, %v3553_v58  ;;  %v3708_v18 = vshrl.u32 %v4457_v14, %v3696_v38  ;;  %v3707_v31 = vshll.u32 %v4456_v12, %v3695_v6 }
 0x3a4   : > { %3797 = vst [vmem:[%s4951_s10 + $0xe0] sm:$0xff] %v3472_v7  ;;  %v3710_v47 = vshll.u32 %v4457_v14, %v3695_v6  ;;  %v3711_v13 = vshrl.u32 %v7389_v44, %v3696_v38  ;;  %v3640_v24 = vshll.u32 %v7252_v61, 30  ;;  %v3700_v37 = vor.u32 %v3699_v57, %v3698_v0 }
 0x3a5   : > { %v3557_v9 = vxor.u32 2147483648, %v3556_v42  ;;  %v3703_v33 = vor.u32 %v3702_v5, %v3701_v32  ;;  %v3706_v8 = vor.u32 %v3705_v16, %v3704_v50  ;;  %v3709_v3 = vor.u32 %v3708_v18, %v3707_v31 }
 0x3a6   : > { %v3712_v10 = vor.u32 %v3711_v13, %v3710_v47  ;;  %v3566_v48 = vadd.s32 3, %v3562_v49  ;;  %v3641_v12 = vsub.s32 %v3637_v2, %v3640_v24  ;;  %v3689_v54 = vor.u32 8388608, %v3688_v60 }
 0x3a7   : > { %v3558_v22 = vsel %vm3475_vm13, %v3557_v9, %v3556_v42  ;;  %v3697_v14 = vshrl.u32 %v4453_v4, %v3696_v38  ;;  %vm3713_vm10 = vcmp.lt.s32.totalorder %v3694_v11, 1  ;;  %vm3715_vm11 = vcmp.lt.s32.totalorder %v3694_v11, 3 }
 0x3a8   : > { %v3561_v45 = vsel %vm7223_vm5, %v6967_v59, %v3558_v22  ;;  %v3643_v44 = vsub.s32 0, %v3641_v12  ;;  %vm3716_vm8 = vcmp.lt.s32.totalorder %v3694_v11, 4  ;;  %v3721_v46 = vsel %vm3713_vm10, %v3700_v37, %v3703_v33 }
 0x3a9   : > { %4360 = vcosq.f32 %v3561_v45  ;;  %v3718_v29 = vsel %vm3716_vm8, %v3706_v8, 2102212464  ;;  %v3722_v52 = vsel %vm3716_vm8, %v3709_v3, 920167782  ;;  %v3725_v23 = vsel %vm3713_vm10, %v3703_v33, %v3706_v8 }
 0x3aa   : > { %4362 = vsinq.f32 %v3561_v45  ;;  %v3726_v36 = vsel %vm3716_vm8, %v3712_v10, 1326507024  ;;  %v4037_v6 = vmin.u32 %v3643_v44, %v3641_v12  ;;  %vm3714_vm14 = vcmp.lt.s32.totalorder %v3694_v11, 2 }
 0x3ab   : > { %v3723_v28 = vsel %vm3715_vm11, %v3706_v8, %v3722_v52  ;;  %v3727_v17 = vsel %vm3715_vm11, %v3709_v3, %v3726_v36  ;;  %v3729_v39 = vshll.u32 %v3689_v54, 8  ;;  %v3567_v34 = vand.u32 3, %v3566_v48 }
 0x3ac   : > { %v3724_v27 = vsel %vm3714_vm14, %v3721_v46, %v3723_v28  ;;  %v3728_v4 = vsel %vm3714_vm14, %v3725_v23, %v3727_v17  ;;  %v3645_v25 = vclz %v4037_v6  ;;  %v3717_v1 = vsel %vm3713_vm10, %v3697_v14, %v3700_v37 }
 0x3ad   : > { %v3719_v53 = vsel %vm3715_vm11, %v3703_v33, %v3718_v29  ;;  %v7274_v15 = vmul.u32.u64.low %v3729_v39, %v3728_v4  ;;  %v7275_v38 = vmul.u32.u64.high %v3729_v39, %v3728_v4, %v7274_v15  ;;  %vm3569_vm12 = vcmp.eq.s32.totalorder %v3567_v34, 0 }
 0x3ae   : > { %v7277_v56 = vmul.u32.u64.low %v3729_v39, %v3724_v27  ;;  %v7278_v43 = vmul.u32.u64.high %v3729_v39, %v3724_v27, %v7277_v56  ;;  %v4038_v40 = vadd.s32 4294967294, %v3645_v25  ;;  %v3720_v19 = vsel %vm3714_vm14, %v3717_v1, %v3719_v53 }
 0x3af   : > { %v3633_v2 = vadd.s32 %v7208_v26, %v7217_v55  ;;  %v3736_v51 = vmul.u32 %v3729_v39, %v3720_v19  ;;  %vm3572_vm15 = vcmp.eq.s32.totalorder %v3567_v34, 2  ;;  %vm3565_vm2 = vweird.f32 %v6967_v59 }
 0x3b0   : > { %vm4039_vm13 = vcmp.lt.s32.totalorder %v4038_v40, 0  ;;  %vm3738_vm0 = vc.u32 %v7275_v38, %v7277_v56  ;;  %v3739_v20 = vadd.s32 1, %v7278_v43  ;;  %vm3568_vm1 = vcmp.lt.s32.totalorder %v3567_v34, 2 }
 0x3b1   : > { %v3648_v60 = vsel %vm4039_vm13, 0, %v4038_v40  ;;  %v3663_v8 = vsub.s32 4, %v7252_v61  ;;  %vm3579_vm3 = vcmp.lt.s32.totalorder %v7007_v63, 0  ;;  %vm3578_vm4 = vcmp.le.f32.partialorder %v3577_v41, 0.7853982 }
 0x3b2   : > { %v3649_v11 = vsub.s32 32, %v3648_v60  ;;  %v3653_v21 = vsub.s32 4294967266, %v3648_v60  ;;  %v3650_v5 = vshll.u32 %v3641_v12, %v3648_v60  ;;  %v3740_v7 = vsel %vm3738_vm0, %v3739_v20, %v7278_v43 }
 0x3b3   : > { %v4361_v49 = vpop.eup %4360  ;;  %v3741_v26 = vadd.s32 %v3740_v7, %v3736_v51  ;;  %v3664_v48 = vsel %vm3579_vm3, %v3663_v8, %v7252_v61  ;;  %v3737_v23 = vadd.s32 %v7277_v56, %v7275_v38  ;;  %vm3669_vm10 = vweird.f32 %v7007_v63 }
 0x3b4   : > { %v4363_v58 = vpop.eup %4362  ;;  %v3573_v35 = vxor.u32 2147483648, %v4361_v49  ;;  %v3651_v0 = vshrl.u32 %v3633_v2, %v3649_v11  ;;  %v3654_v16 = vadd.s32 127, %v3653_v21  ;;  %v3666_v44 = vsel %vm3578_vm4, 0, %v3664_v48 }
 0x3b5   : > { %v3570_v57 = vxor.u32 2147483648, %v4363_v58  ;;  %v3742_v9 = vadd.s32 536870912, %v3741_v26  ;;  %v3670_v29 = vadd.s32 3, %v3666_v44  ;;  %vm3683_vm11 = vcmp.lt.s32.totalorder %v7011_v30, 0 }
 0x3b6   : > { %v3574_v42 = vsel %vm3572_vm15, %v3573_v35, %v4363_v58  ;;  %v3652_v50 = vor.u32 %v3651_v0, %v3650_v5  ;;  %v3655_v18 = vshll.u32 %v3654_v16, 23  ;;  %vm3682_vm8 = vcmp.le.f32.partialorder %v3681_v62, 0.7853982 }
 0x3b7   : > { %v3571_v55 = vsel %vm3569_vm12, %v4361_v49, %v3570_v57  ;;  %v3743_v13 = vshrl.u32 %v3742_v9, 30  ;;  %v3671_v28 = vand.u32 3, %v3670_v29  ;;  %vm3773_vm0 = vweird.f32 %v7011_v30 }
 0x3b8   : > { %v3575_v32 = vsel %vm3568_vm1, %v3571_v55, %v3574_v42  ;;  %v3656_v47 = vor.u32 4788187, %v3655_v18  ;;  %v3659_v37 = vcvt.s32.f32 %v3652_v50 }
 0x3b9   : > { %v3576_v31 = vsel %vm3565_vm2, nan, %v3575_v32  ;;  %v3744_v33 = vshll.u32 %v3743_v13, 30  ;;  %vm3676_vm6 = vcmp.eq.s32.totalorder %v3671_v28, 2  ;;  %vm3673_vm7 = vcmp.eq.s32.totalorder %v3671_v28, 0 }
 0x3ba   : > { %3798 = vst [vmem:[%s4951_s10 + $0xe8] sm:$0xff] %v3576_v31  ;;  %v3657_v24 = vand.u32 2147483647, %v3656_v47  ;;  %vm3672_vm9 = vcmp.lt.s32.totalorder %v3671_v28, 2  ;;  %v3767_v2 = vsub.s32 4, %v3743_v13 }
 0x3bb   : > { %v3745_v3 = vsub.s32 %v3741_v26, %v3744_v33 }
 0x3bc   : > { %v3660_v22 = vmul.f32 %v3659_v37, %v3657_v24  ;;  %v3768_v58 = vsel %vm3683_vm11, %v3767_v2, %v3743_v13 }
 0x3bd   : > { %v3747_v59 = vsub.s32 0, %v3745_v3  ;;  %v3770_v11 = vsel %vm3682_vm8, 0, %v3768_v58 }
 0x3be   : > { %v3661_v10 = vxor.u32 2147483648, %v3660_v22 }
 0x3bf   : > { %v4041_v12 = vmin.u32 %v3747_v59, %v3745_v3 }
 0x3c0   : > { %v3662_v45 = vsel %vm3579_vm3, %v3661_v10, %v3660_v22 }
 0x3c1   : > { %v3665_v54 = vsel %vm3578_vm4, %v7007_v63, %v3662_v45  ;;  %v3749_v14 = vclz %v4041_v12  ;;  %v3774_v63 = vadd.s32 3, %v3770_v11 }
 0x3c2   : > { %4364 = vcosq.f32 %v3665_v54 }
 0x3c3   : > { %4366 = vsinq.f32 %v3665_v54  ;;  %v4042_v46 = vadd.s32 4294967294, %v3749_v14  ;;  %v3775_v21 = vand.u32 3, %v3774_v63 }
 0x3c5   : > { %vm4043_vm5 = vcmp.lt.s32.totalorder %v4042_v46, 0  ;;  %vm3780_vm14 = vcmp.eq.s32.totalorder %v3775_v21, 2  ;;  %vm3777_vm12 = vcmp.eq.s32.totalorder %v3775_v21, 0  ;;  %vm3776_vm13 = vcmp.lt.s32.totalorder %v3775_v21, 2 }
 0x3c6   : > { %v3752_v52 = vsel %vm4043_vm5, 0, %v4042_v46 }
 0x3c7   : > { %v3753_v36 = vsub.s32 32, %v3752_v52  ;;  %v3757_v6 = vsub.s32 4294967266, %v3752_v52  ;;  %v3754_v41 = vshll.u32 %v3745_v3, %v3752_v52 }
 0x3c9   : > { %v3755_v17 = vshrl.u32 %v3737_v23, %v3753_v36  ;;  %v3758_v27 = vadd.s32 127, %v3757_v6 }
 0x3cb   : > { %v3756_v4 = vor.u32 %v3755_v17, %v3754_v41  ;;  %v3759_v39 = vshll.u32 %v3758_v27, 23 }
 0x3cc   : > { %v4365_v61 = vpop.eup %4364 }
 0x3cd   : > { %v4367_v34 = vpop.eup %4366  ;;  %v3677_v25 = vxor.u32 2147483648, %v4365_v61  ;;  %v3760_v53 = vor.u32 4788187, %v3759_v39  ;;  %v3763_v56 = vcvt.s32.f32 %v3756_v4 }
 0x3ce   : > { %v3674_v1 = vxor.u32 2147483648, %v4367_v34 }
 0x3cf   : > { %v3678_v15 = vsel %vm3676_vm6, %v3677_v25, %v4367_v34  ;;  %v3761_v38 = vand.u32 2147483647, %v3760_v53 }
 0x3d0   : > { %v3675_v43 = vsel %vm3673_vm7, %v4365_v61, %v3674_v1 }
 0x3d1   : > { %v3679_v40 = vsel %vm3672_vm9, %v3675_v43, %v3678_v15  ;;  %v3764_v49 = vmul.f32 %v3763_v56, %v3761_v38 }
 0x3d2   : > { %v3680_v19 = vsel %vm3669_vm10, nan, %v3679_v40 }
 0x3d3   : > { %3799 = vst [vmem:[%s4951_s10 + $0xf0] sm:$0xff] %v3680_v19  ;;  %v3765_v60 = vxor.u32 2147483648, %v3764_v49 }
 0x3d5   : > { %v3766_v20 = vsel %vm3683_vm11, %v3765_v60, %v3764_v49 }
 0x3d6   : > { %v3769_v35 = vsel %vm3682_vm8, %v7011_v30, %v3766_v20 }
 0x3d7   : > { %4368 = vcosq.f32 %v3769_v35 }
 0x3d8   : > { %4370 = vsinq.f32 %v3769_v35 }
 0x3e1   : > { %v4369_v51 = vpop.eup %4368 }
 0x3e2   : > { %v4371_v57 = vpop.eup %4370  ;;  %v3781_v5 = vxor.u32 2147483648, %v4369_v51 }
 0x3e3   : > { %v3778_v7 = vxor.u32 2147483648, %v4371_v57 }
 0x3e4   : > { %v3782_v62 = vsel %vm3780_vm14, %v3781_v5, %v4371_v57 }
 0x3e5   : > { %v3779_v42 = vsel %vm3777_vm12, %v4369_v51, %v3778_v7 }
 0x3e6   : > { %v3783_v0 = vsel %vm3776_vm13, %v3779_v42, %v3782_v62 }
 0x3e7   : > { %v3784_v16 = vsel %vm3773_vm0, nan, %v3783_v0 }
 0x3e8   : > { %3800 = vst [vmem:[%s4951_s10 + $0xf8] sm:$0xff] %v3784_v16 }
 0x3e9   : > { %4385 = shalt.err (!%p4382_p5)
}
 0x3ea   : > { %s4386_s7 = scalar_lea.hbm %s7306_s26, 4096  ;;  %s4390_s10 = scalar_lea.hbm %s7364_s4, 8192 }
 0x3eb   : > { %p4387_p6 = scmp.ne.s32.totalorder %s7306_s26, %s4386_s7  ;;  %p4391_p10 = scmp.lt.u32.totalorder %s7306_s26, %s7364_s4 }
 0x3ec   : > { %p4392_p11 = scmp.lt.u32.totalorder %s4390_s10, %s4386_s7  ;;  %p4394_p13 = scmp.lt.u32.totalorder %s4386_s7, %s7306_s26 }
 0x3ed   : > { %p4388_p7 = pnand %p4387_p6, %p4527_p4 }
 0x3ee   : > { %p4393_p12 = por %p4392_p11, %p4391_p10 }
 0x3ef   : > { %p4389_p9 = pneg %p4388_p7 }
 0x3f0   : > { %p4395_p0 = por %p4394_p13, %p4393_p12 }
 0x3f2   : > { %p4396_p1 = pnand %p4395_p0, %p4389_p9 }
 0x3f4   : > { %4399 = shalt.err (!%p4396_p1)
}
 0x3f5   : > { %s4460_s13 = smov 256   ;;  %s4461_s14 = smov 16  }
 0x3f6   : > { %4178 = dma.vmem_to_hbm [thread:$0]  (%p4527_p4), %s7308_s21, 4096, %s7306_s26, %s7314_s18, %s4460_s13, %s4460_s13, %s4461_s14  }
 0x3f7 PF: > { %p4184_p2 = scmp.ge.s32.totalorder %s4450_s20, 2  ;;  %s3832_s22 = sand.u32 1, %s4430_s15  }
 0x3f8   : > { %s3833_s24 = scalar_lea.sflag [#allocation3], %s3832_s22 }
 0x3f9   : > { %p4181_p3 = pnand %p4184_p2, %p4534_p8 }
 0x3fb   : > { %4425 = dma.done.wait (!%p4181_p3), %s3833_s24, 4096  }
 0x3fc   : > { %4427 = vsyncadd (!%p4181_p3), %s3833_s24, 4294963200  ;;  %s17_s20 = sadd.s32 1, %s4450_s20   ;;  %s7440_s15 = smov %s4434_s16 }
 0x3fd   : > { %p14_p5 = scmp.ge.s32.totalorder %s17_s20, 4   ;;  %s7441_s16 = smov %s4438_s17 }
 0x3fe   : > { %s7442_s17 = smov %s4540_s28  ;;  %s7443_s18 = smov %s4446_s19 }
 0x3ff   : > { %s7444_s19 = smov %s7446_s23  ;;  %16 = sbr.rel (!%p14_p5) target bundleno = 4 (0x4), region = 74 }
 0x406   :  { %3838 = vsyncpa [#allocation3], 1 }
 0x407   :  { %3840 = vsyncpa [#allocation3 + $0x1], 1 }

</bundles_post_ra>
